<compile_context>
chip_gen: v7x
topology: tpu7x:2x2x1
jax: 0.10.0
libtpu: 0.0.40
codegen_flags: <defaults>
</compile_context>

<pallas_src>
import functools
import math

import jax
import jax.numpy as jnp
from jax import lax
from jax.experimental import pallas as pl
from jax.experimental.pallas import tpu as pltpu

LRELU_SLOPE = 0.2
BN_EPS = 1e-5
KSIZE = 4
PAD = 1


# ----------------------------------------------------------------------------
# Pallas kernel: direct 4x4 conv for one batch element (one grid step).
#   stride==2 : inputs are 4 parity-split padded activations x[p][q][n,i,j,c]
#               = a_pad[n, 2i+p, 2j+q, c]; every window is a static slice.
#   stride==1 : input is the single padded activation a_pad.
# Per output row: 16 small (OW,C)x(C,OC) bf16 matmuls accumulated in f32,
# bias added, optional fused LeakyReLU / sigmoid, bf16 (or f32) store, and
# optional per-channel sum / sum-of-squares accumulation for BatchNorm.
# ----------------------------------------------------------------------------
def _conv4x4_kernel(*refs, stride, OH, OW, post_act, emit_stats):
    n_x = 4 if stride == 2 else 1
    x_refs = refs[:n_x]
    w_ref = refs[n_x]          # (16, C, OC)  bf16
    b_ref = refs[n_x + 1]      # (1, OC)      f32
    o_ref = refs[n_x + 2]      # (1, OH, OW, OC)
    stats_ref = refs[n_x + 3] if emit_stats else None   # (1, 2, OC) f32

    OC = w_ref.shape[-1]
    bias = b_ref[...]          # (1, OC)

    def row_body(oh, carry):
        s_acc, q_acc = carry
        acc = jnp.zeros((OW, OC), jnp.float32)
        for kh in range(KSIZE):
            for kw in range(KSIZE):
                if stride == 2:
                    xr = x_refs[(kh % 2) * 2 + (kw % 2)]
                    r = oh + (kh // 2)
                    c0 = kw // 2
                else:
                    xr = x_refs[0]
                    r = oh + kh
                    c0 = kw
                win = xr[0, r, c0:c0 + OW, :]            # (OW, C) bf16
                acc = acc + jnp.dot(win, w_ref[kh * KSIZE + kw],
                                    preferred_element_type=jnp.float32)
        acc = acc + bias
        if post_act == "lrelu":
            acc = jnp.where(acc >= 0, acc, LRELU_SLOPE * acc)
        elif post_act == "sigmoid":
            acc = jax.nn.sigmoid(acc)
        o_ref[0, oh] = acc.astype(o_ref.dtype)
        if emit_stats:
            s_acc = s_acc + jnp.sum(acc, axis=0, keepdims=True)
            q_acc = q_acc + jnp.sum(acc * acc, axis=0, keepdims=True)
        return (s_acc, q_acc)

    zeros = jnp.zeros((1, OC), jnp.float32)
    s_tot, q_tot = lax.fori_loop(0, OH, row_body, (zeros, zeros))
    if emit_stats:
        stats_ref[0, 0:1, :] = s_tot
        stats_ref[0, 1:2, :] = q_tot


# ----------------------------------------------------------------------------
# Layer wrapper.  `x` is the NHWC bf16 activation (pre-conv activation already
# applied by the caller); only zero-padding / parity split happen here.
# ----------------------------------------------------------------------------
def conv4x4(x, w, b, *, stride, post_act="none", emit_stats=False):
    assert post_act in ("none", "lrelu", "sigmoid")
    # BN stats must be computed on the raw conv output, never post-activation.
    assert not (emit_stats and post_act != "none")

    N, H, W, C = x.shape
    OC = w.shape[0]
    OH = (H + 2 * PAD - KSIZE) // stride + 1
    OW = (W + 2 * PAD - KSIZE) // stride + 1

    xp = jnp.pad(x, ((0, 0), (PAD, PAD), (PAD, PAD), (0, 0)))
    if stride == 2:
        # Parity split so the kernel only needs contiguous static slices.
        xs = tuple(xp[:, p::2, q::2, :] for p in (0, 1) for q in (0, 1))
    else:
        xs = (xp,)

    w_k = jnp.transpose(w, (2, 3, 1, 0)).reshape(KSIZE * KSIZE, C, OC)
    w_k = w_k.astype(jnp.bfloat16)
    b_k = b.reshape(1, OC).astype(jnp.float32)

    out_dtype = jnp.float32 if post_act == "sigmoid" else jnp.bfloat16
    out_bytes = 4 if out_dtype == jnp.float32 else 2

    out_shapes = [jax.ShapeDtypeStruct((N, OH, OW, OC), out_dtype)]
    out_specs = [pl.BlockSpec((1, OH, OW, OC), lambda n: (n, 0, 0, 0))]
    if emit_stats:
        out_shapes.append(jax.ShapeDtypeStruct((N, 2, OC), jnp.float32))
        out_specs.append(pl.BlockSpec((1, 2, OC), lambda n: (n, 0, 0)))

    in_specs = [pl.BlockSpec((1,) + xi.shape[1:], lambda n: (n, 0, 0, 0))
                for xi in xs]
    in_specs.append(pl.BlockSpec(w_k.shape, lambda n: (0, 0, 0)))   # resident
    in_specs.append(pl.BlockSpec(b_k.shape, lambda n: (0, 0)))      # resident

    # VMEM budget: double-buffered input/output blocks + resident weights.
    bytes_in = sum(int(math.prod(xi.shape[1:])) * 2 for xi in xs)
    bytes_w = int(w_k.size) * 2 + int(b_k.size) * 4
    bytes_out = OH * OW * OC * out_bytes + 2 * OC * 4
    est = 2 * bytes_in + 2 * bytes_w + 2 * bytes_out
    vmem_limit = int(min(max(2 * est, 8 * 2**20), 48 * 2**20))

    cost = pl.CostEstimate(
        flops=2 * N * OH * OW * KSIZE * KSIZE * C * OC,
        transcendentals=(N * OH * OW * OC if post_act == "sigmoid" else 0),
        bytes_accessed=N * (bytes_in + OH * OW * OC * out_bytes) + bytes_w)

    kern = functools.partial(_conv4x4_kernel, stride=stride, OH=OH, OW=OW,
                             post_act=post_act, emit_stats=emit_stats)
    return pl.pallas_call(
        kern,
        out_shape=tuple(out_shapes) if emit_stats else out_shapes[0],
        grid=(N,),
        in_specs=in_specs,
        out_specs=tuple(out_specs) if emit_stats else out_specs[0],
        compiler_params=pltpu.CompilerParams(
            dimension_semantics=("parallel",),     # batch-parallel (v7x 2 TCs)
            vmem_limit_bytes=vmem_limit),
        cost_estimate=cost,
    )(*xs, w_k, b_k)


# ----------------------------------------------------------------------------
# BatchNorm finalization (tiny (N,2,OC) reduction) + LeakyReLU, kept in bf16.
# ----------------------------------------------------------------------------
def _bn_scale_shift(stats, count):
    tot = jnp.sum(stats, axis=0)                     # (2, OC) f32
    mean = tot[0] / count
    var = jnp.maximum(tot[1] / count - mean * mean, 0.0)   # clamp cancellation
    scale = lax.rsqrt(var + BN_EPS)
    return scale, -mean * scale


def _bn_lrelu(h, stats):
    n, oh, ow, oc = h.shape
    scale, shift = _bn_scale_shift(stats, n * oh * ow)
    y = h.astype(jnp.float32) * scale + shift
    return jnp.where(y >= 0, y, LRELU_SLOPE * y).astype(jnp.bfloat16)


# ----------------------------------------------------------------------------
# Full discriminator forward (Pallas).  Input/output NCHW like PyTorch.
# ----------------------------------------------------------------------------
def d_forward(params, x_nchw):
    x = jnp.transpose(x_nchw, (0, 2, 3, 1)).astype(jnp.bfloat16)   # -> NHWC

    a1 = conv4x4(x, params['w1'], params['b1'], stride=2, post_act='lrelu')
    h2, st2 = conv4x4(a1, params['w2'], params['b2'], stride=2, emit_stats=True)
    a2 = _bn_lrelu(h2, st2)
    h3, st3 = conv4x4(a2, params['w3'], params['b3'], stride=2, emit_stats=True)
    a3 = _bn_lrelu(h3, st3)
    h4, st4 = conv4x4(a3, params['w4'], params['b4'], stride=1, emit_stats=True)
    a4 = _bn_lrelu(h4, st4)
    h5 = conv4x4(a4, params['w5'], params['b5'], stride=1, post_act='sigmoid')
    return jnp.transpose(h5, (0, 3, 1, 2))                         # -> NCHW


# ----------------------------------------------------------------------------
# Pure-JAX f32 reference (lax.conv) for the correctness check.
# ----------------------------------------------------------------------------
def _conv_ref(x, w, b, stride):
    y = lax.conv_general_dilated(x, w, (stride, stride), [(1, 1), (1, 1)],
                                 dimension_numbers=('NCHW', 'OIHW', 'NCHW'),
                                 precision=lax.Precision.HIGHEST)
    return y + b[None, :, None, None]


def _bn_ref(y):
    mean = jnp.mean(y, axis=(0, 2, 3), keepdims=True)
    var = jnp.mean((y - mean) ** 2, axis=(0, 2, 3), keepdims=True)
    return (y - mean) / jnp.sqrt(var + BN_EPS)


def _leaky(y):
    return jnp.where(y >= 0, y, LRELU_SLOPE * y)


def d_ref(params, x):
    h1 = _conv_ref(x, params['w1'], params['b1'], 2)
    h2 = _bn_ref(_conv_ref(_leaky(h1), params['w2'], params['b2'], 2))
    h3 = _bn_ref(_conv_ref(_leaky(h2), params['w3'], params['b3'], 2))
    h4 = _bn_ref(_conv_ref(_leaky(h3), params['w4'], params['b4'], 1))
    h5 = _conv_ref(_leaky(h4), params['w5'], params['b5'], 1)
    return jax.nn.sigmoid(h5)


def init_params(key, in_nc, ndf):
    shapes = {
        'w1': (ndf, in_nc, 4, 4),       'b1': (ndf,),
        'w2': (ndf * 2, ndf, 4, 4),     'b2': (ndf * 2,),
        'w3': (ndf * 4, ndf * 2, 4, 4), 'b3': (ndf * 4,),
        'w4': (ndf * 8, ndf * 4, 4, 4), 'b4': (ndf * 8,),
        'w5': (1, ndf * 8, 4, 4),       'b5': (1,),
    }
    params = {}
    for name, shape in shapes.items():
        key, sub = jax.random.split(key)
        params[name] = 0.05 * jax.random.normal(sub, shape, jnp.float32)
    return params


if __name__ == "__main__":
    key = jax.random.PRNGKey(0)
    in_nc, ndf = 3, 8
    N, H, W = 2, 32, 32              # 32x32 is the smallest input giving a
                                     # valid 2x2 output through the 5 convs

    pkey, xkey = jax.random.split(key)
    params = init_params(pkey, in_nc, ndf)
    x = jax.random.normal(xkey, (N, in_nc, H, W), jnp.float32)

    fwd = jax.jit(d_forward)
    out = jax.block_until_ready(fwd(params, x))
    ref = jax.block_until_ready(d_ref(params, x))

    assert out.shape == ref.shape == (N, 1, 2, 2), out.shape
    err = float(jnp.max(jnp.abs(out.astype(jnp.float32) - ref)))
    # bf16 matmul operands / bf16 activation storage vs. f32 HIGHEST reference.
    assert err < 4e-2, err
    print("KERNEL_OK")
</pallas_src>

<mosaic_0001>
module attributes {stable_mosaic.version = 11 : i64} {
  func.func @_conv4x4_kernel(%arg0: i32, %arg1: memref<1x17x17x3xbf16, #tpu.memory_space<vmem>>, %arg2: memref<1x17x17x3xbf16, #tpu.memory_space<vmem>>, %arg3: memref<1x17x17x3xbf16, #tpu.memory_space<vmem>>, %arg4: memref<1x17x17x3xbf16, #tpu.memory_space<vmem>>, %arg5: memref<16x3x8xbf16, #tpu.memory_space<vmem>>, %arg6: memref<1x8xf32, #tpu.memory_space<vmem>>, %arg7: memref<1x16x16x8xbf16, #tpu.memory_space<vmem>>) attributes {dimension_semantics = [#tpu.dimension_semantics<parallel>], iteration_bounds = array<i64: 2>, scalar_prefetch = 0 : i64, scratch_operands = 0 : i64, tpu.core_type = #tpu.core_type<tc>, window_params = [{transform_indices = @transform_0, window_bounds = array<i64: 1, 17, 17, 3>}, {transform_indices = @transform_1, window_bounds = array<i64: 1, 17, 17, 3>}, {transform_indices = @transform_2, window_bounds = array<i64: 1, 17, 17, 3>}, {transform_indices = @transform_3, window_bounds = array<i64: 1, 17, 17, 3>}, {pipeline_mode = #tpu.pipeline_mode<synchronous>, transform_indices = @transform_4, window_bounds = array<i64: 16, 3, 8>}, {pipeline_mode = #tpu.pipeline_mode<synchronous>, transform_indices = @transform_5, window_bounds = array<i64: 1, 8>}, {transform_indices = @transform_6, window_bounds = array<i64: 1, 16, 16, 8>}]} {
    %c0 = arith.constant 0 : index
    %c0_0 = arith.constant 0 : index
    %0 = vector.load %arg6[%c0, %c0_0] : memref<1x8xf32, #tpu.memory_space<vmem>>, vector<1x8xf32>
    %c0_i32 = arith.constant 0 : i32
    %c16_i32 = arith.constant 16 : i32
    %1 = arith.addi %c0_i32, %c16_i32 : i32
    %c1_i32 = arith.constant 1 : i32
    scf.for %arg8 = %c0_i32 to %1 step %c1_i32  : i32 {
      %cst = arith.constant 0.000000e+00 : f32
      %2 = vector.broadcast %cst : f32 to vector<16x8xf32>
      %c0_i32_2 = arith.constant 0 : i32
      %3 = arith.addi %arg8, %c0_i32_2 : i32
      %c0_3 = arith.constant 0 : index
      %4 = arith.index_cast %3 : i32 to index
      %c0_4 = arith.constant 0 : index
      %c0_5 = arith.constant 0 : index
      %5 = vector.load %arg1[%c0_3, %4, %c0_4, %c0_5] : memref<1x17x17x3xbf16, #tpu.memory_space<vmem>>, vector<1x1x16x3xbf16>
      %6 = vector.shape_cast %5 : vector<1x1x16x3xbf16> to vector<16x3xbf16>
      %c0_6 = arith.constant 0 : index
      %c0_7 = arith.constant 0 : index
      %c0_8 = arith.constant 0 : index
      %7 = vector.load %arg5[%c0_6, %c0_7, %c0_8] : memref<16x3x8xbf16, #tpu.memory_space<vmem>>, vector<1x3x8xbf16>
      %8 = vector.shape_cast %7 : vector<1x3x8xbf16> to vector<3x8xbf16>
      %cst_9 = arith.constant dense<0.000000e+00> : vector<16x8xf32>
      %9 = tpu.matmul %6, %8, %cst_9 {dimension_numbers = #tpu.dot_dimension_numbers<[1], [0], [0], [1], [0, 0, 1, 1], [], []>} : vector<16x3xbf16>, vector<3x8xbf16>, vector<16x8xf32> -> vector<16x8xf32>
      %10 = arith.addf %2, %9 : vector<16x8xf32>
      %c0_i32_10 = arith.constant 0 : i32
      %11 = arith.addi %arg8, %c0_i32_10 : i32
      %c0_11 = arith.constant 0 : index
      %12 = arith.index_cast %11 : i32 to index
      %c0_12 = arith.constant 0 : index
      %c0_13 = arith.constant 0 : index
      %13 = vector.load %arg2[%c0_11, %12, %c0_12, %c0_13] : memref<1x17x17x3xbf16, #tpu.memory_space<vmem>>, vector<1x1x16x3xbf16>
      %14 = vector.shape_cast %13 : vector<1x1x16x3xbf16> to vector<16x3xbf16>
      %c1 = arith.constant 1 : index
      %c0_14 = arith.constant 0 : index
      %c0_15 = arith.constant 0 : index
      %15 = vector.load %arg5[%c1, %c0_14, %c0_15] : memref<16x3x8xbf16, #tpu.memory_space<vmem>>, vector<1x3x8xbf16>
      %16 = vector.shape_cast %15 : vector<1x3x8xbf16> to vector<3x8xbf16>
      %cst_16 = arith.constant dense<0.000000e+00> : vector<16x8xf32>
      %17 = tpu.matmul %14, %16, %cst_16 {dimension_numbers = #tpu.dot_dimension_numbers<[1], [0], [0], [1], [0, 0, 1, 1], [], []>} : vector<16x3xbf16>, vector<3x8xbf16>, vector<16x8xf32> -> vector<16x8xf32>
      %18 = arith.addf %10, %17 : vector<16x8xf32>
      %c0_i32_17 = arith.constant 0 : i32
      %19 = arith.addi %arg8, %c0_i32_17 : i32
      %c0_18 = arith.constant 0 : index
      %20 = arith.index_cast %19 : i32 to index
      %c1_19 = arith.constant 1 : index
      %c0_20 = arith.constant 0 : index
      %21 = vector.load %arg1[%c0_18, %20, %c1_19, %c0_20] : memref<1x17x17x3xbf16, #tpu.memory_space<vmem>>, vector<1x1x16x3xbf16>
      %22 = vector.shape_cast %21 : vector<1x1x16x3xbf16> to vector<16x3xbf16>
      %c2 = arith.constant 2 : index
      %c0_21 = arith.constant 0 : index
      %c0_22 = arith.constant 0 : index
      %23 = vector.load %arg5[%c2, %c0_21, %c0_22] : memref<16x3x8xbf16, #tpu.memory_space<vmem>>, vector<1x3x8xbf16>
      %24 = vector.shape_cast %23 : vector<1x3x8xbf16> to vector<3x8xbf16>
      %cst_23 = arith.constant dense<0.000000e+00> : vector<16x8xf32>
      %25 = tpu.matmul %22, %24, %cst_23 {dimension_numbers = #tpu.dot_dimension_numbers<[1], [0], [0], [1], [0, 0, 1, 1], [], []>} : vector<16x3xbf16>, vector<3x8xbf16>, vector<16x8xf32> -> vector<16x8xf32>
      %26 = arith.addf %18, %25 : vector<16x8xf32>
      %c0_i32_24 = arith.constant 0 : i32
      %27 = arith.addi %arg8, %c0_i32_24 : i32
      %c0_25 = arith.constant 0 : index
      %28 = arith.index_cast %27 : i32 to index
      %c1_26 = arith.constant 1 : index
      %c0_27 = arith.constant 0 : index
      %29 = vector.load %arg2[%c0_25, %28, %c1_26, %c0_27] : memref<1x17x17x3xbf16, #tpu.memory_space<vmem>>, vector<1x1x16x3xbf16>
      %30 = vector.shape_cast %29 : vector<1x1x16x3xbf16> to vector<16x3xbf16>
      %c3 = arith.constant 3 : index
      %c0_28 = arith.constant 0 : index
      %c0_29 = arith.constant 0 : index
      %31 = vector.load %arg5[%c3, %c0_28, %c0_29] : memref<16x3x8xbf16, #tpu.memory_space<vmem>>, vector<1x3x8xbf16>
      %32 = vector.shape_cast %31 : vector<1x3x8xbf16> to vector<3x8xbf16>
      %cst_30 = arith.constant dense<0.000000e+00> : vector<16x8xf32>
      %33 = tpu.matmul %30, %32, %cst_30 {dimension_numbers = #tpu.dot_dimension_numbers<[1], [0], [0], [1], [0, 0, 1, 1], [], []>} : vector<16x3xbf16>, vector<3x8xbf16>, vector<16x8xf32> -> vector<16x8xf32>
      %34 = arith.addf %26, %33 : vector<16x8xf32>
      %c0_i32_31 = arith.constant 0 : i32
      %35 = arith.addi %arg8, %c0_i32_31 : i32
      %c0_32 = arith.constant 0 : index
      %36 = arith.index_cast %35 : i32 to index
      %c0_33 = arith.constant 0 : index
      %c0_34 = arith.constant 0 : index
      %37 = vector.load %arg3[%c0_32, %36, %c0_33, %c0_34] : memref<1x17x17x3xbf16, #tpu.memory_space<vmem>>, vector<1x1x16x3xbf16>
      %38 = vector.shape_cast %37 : vector<1x1x16x3xbf16> to vector<16x3xbf16>
      %c4 = arith.constant 4 : index
      %c0_35 = arith.constant 0 : index
      %c0_36 = arith.constant 0 : index
      %39 = vector.load %arg5[%c4, %c0_35, %c0_36] : memref<16x3x8xbf16, #tpu.memory_space<vmem>>, vector<1x3x8xbf16>
      %40 = vector.shape_cast %39 : vector<1x3x8xbf16> to vector<3x8xbf16>
      %cst_37 = arith.constant dense<0.000000e+00> : vector<16x8xf32>
      %41 = tpu.matmul %38, %40, %cst_37 {dimension_numbers = #tpu.dot_dimension_numbers<[1], [0], [0], [1], [0, 0, 1, 1], [], []>} : vector<16x3xbf16>, vector<3x8xbf16>, vector<16x8xf32> -> vector<16x8xf32>
      %42 = arith.addf %34, %41 : vector<16x8xf32>
      %c0_i32_38 = arith.constant 0 : i32
      %43 = arith.addi %arg8, %c0_i32_38 : i32
      %c0_39 = arith.constant 0 : index
      %44 = arith.index_cast %43 : i32 to index
      %c0_40 = arith.constant 0 : index
      %c0_41 = arith.constant 0 : index
      %45 = vector.load %arg4[%c0_39, %44, %c0_40, %c0_41] : memref<1x17x17x3xbf16, #tpu.memory_space<vmem>>, vector<1x1x16x3xbf16>
      %46 = vector.shape_cast %45 : vector<1x1x16x3xbf16> to vector<16x3xbf16>
      %c5 = arith.constant 5 : index
      %c0_42 = arith.constant 0 : index
      %c0_43 = arith.constant 0 : index
      %47 = vector.load %arg5[%c5, %c0_42, %c0_43] : memref<16x3x8xbf16, #tpu.memory_space<vmem>>, vector<1x3x8xbf16>
      %48 = vector.shape_cast %47 : vector<1x3x8xbf16> to vector<3x8xbf16>
      %cst_44 = arith.constant dense<0.000000e+00> : vector<16x8xf32>
      %49 = tpu.matmul %46, %48, %cst_44 {dimension_numbers = #tpu.dot_dimension_numbers<[1], [0], [0], [1], [0, 0, 1, 1], [], []>} : vector<16x3xbf16>, vector<3x8xbf16>, vector<16x8xf32> -> vector<16x8xf32>
      %50 = arith.addf %42, %49 : vector<16x8xf32>
      %c0_i32_45 = arith.constant 0 : i32
      %51 = arith.addi %arg8, %c0_i32_45 : i32
      %c0_46 = arith.constant 0 : index
      %52 = arith.index_cast %51 : i32 to index
      %c1_47 = arith.constant 1 : index
      %c0_48 = arith.constant 0 : index
      %53 = vector.load %arg3[%c0_46, %52, %c1_47, %c0_48] : memref<1x17x17x3xbf16, #tpu.memory_space<vmem>>, vector<1x1x16x3xbf16>
      %54 = vector.shape_cast %53 : vector<1x1x16x3xbf16> to vector<16x3xbf16>
      %c6 = arith.constant 6 : index
      %c0_49 = arith.constant 0 : index
      %c0_50 = arith.constant 0 : index
      %55 = vector.load %arg5[%c6, %c0_49, %c0_50] : memref<16x3x8xbf16, #tpu.memory_space<vmem>>, vector<1x3x8xbf16>
      %56 = vector.shape_cast %55 : vector<1x3x8xbf16> to vector<3x8xbf16>
      %cst_51 = arith.constant dense<0.000000e+00> : vector<16x8xf32>
      %57 = tpu.matmul %54, %56, %cst_51 {dimension_numbers = #tpu.dot_dimension_numbers<[1], [0], [0], [1], [0, 0, 1, 1], [], []>} : vector<16x3xbf16>, vector<3x8xbf16>, vector<16x8xf32> -> vector<16x8xf32>
      %58 = arith.addf %50, %57 : vector<16x8xf32>
      %c0_i32_52 = arith.constant 0 : i32
      %59 = arith.addi %arg8, %c0_i32_52 : i32
      %c0_53 = arith.constant 0 : index
      %60 = arith.index_cast %59 : i32 to index
      %c1_54 = arith.constant 1 : index
      %c0_55 = arith.constant 0 : index
      %61 = vector.load %arg4[%c0_53, %60, %c1_54, %c0_55] : memref<1x17x17x3xbf16, #tpu.memory_space<vmem>>, vector<1x1x16x3xbf16>
      %62 = vector.shape_cast %61 : vector<1x1x16x3xbf16> to vector<16x3xbf16>
      %c7 = arith.constant 7 : index
      %c0_56 = arith.constant 0 : index
      %c0_57 = arith.constant 0 : index
      %63 = vector.load %arg5[%c7, %c0_56, %c0_57] : memref<16x3x8xbf16, #tpu.memory_space<vmem>>, vector<1x3x8xbf16>
      %64 = vector.shape_cast %63 : vector<1x3x8xbf16> to vector<3x8xbf16>
      %cst_58 = arith.constant dense<0.000000e+00> : vector<16x8xf32>
      %65 = tpu.matmul %62, %64, %cst_58 {dimension_numbers = #tpu.dot_dimension_numbers<[1], [0], [0], [1], [0, 0, 1, 1], [], []>} : vector<16x3xbf16>, vector<3x8xbf16>, vector<16x8xf32> -> vector<16x8xf32>
      %66 = arith.addf %58, %65 : vector<16x8xf32>
      %c1_i32_59 = arith.constant 1 : i32
      %67 = arith.addi %arg8, %c1_i32_59 : i32
      %c0_60 = arith.constant 0 : index
      %68 = arith.index_cast %67 : i32 to index
      %c0_61 = arith.constant 0 : index
      %c0_62 = arith.constant 0 : index
      %69 = vector.load %arg1[%c0_60, %68, %c0_61, %c0_62] : memref<1x17x17x3xbf16, #tpu.memory_space<vmem>>, vector<1x1x16x3xbf16>
      %70 = vector.shape_cast %69 : vector<1x1x16x3xbf16> to vector<16x3xbf16>
      %c8 = arith.constant 8 : index
      %c0_63 = arith.constant 0 : index
      %c0_64 = arith.constant 0 : index
      %71 = vector.load %arg5[%c8, %c0_63, %c0_64] : memref<16x3x8xbf16, #tpu.memory_space<vmem>>, vector<1x3x8xbf16>
      %72 = vector.shape_cast %71 : vector<1x3x8xbf16> to vector<3x8xbf16>
      %cst_65 = arith.constant dense<0.000000e+00> : vector<16x8xf32>
      %73 = tpu.matmul %70, %72, %cst_65 {dimension_numbers = #tpu.dot_dimension_numbers<[1], [0], [0], [1], [0, 0, 1, 1], [], []>} : vector<16x3xbf16>, vector<3x8xbf16>, vector<16x8xf32> -> vector<16x8xf32>
      %74 = arith.addf %66, %73 : vector<16x8xf32>
      %c1_i32_66 = arith.constant 1 : i32
      %75 = arith.addi %arg8, %c1_i32_66 : i32
      %c0_67 = arith.constant 0 : index
      %76 = arith.index_cast %75 : i32 to index
      %c0_68 = arith.constant 0 : index
      %c0_69 = arith.constant 0 : index
      %77 = vector.load %arg2[%c0_67, %76, %c0_68, %c0_69] : memref<1x17x17x3xbf16, #tpu.memory_space<vmem>>, vector<1x1x16x3xbf16>
      %78 = vector.shape_cast %77 : vector<1x1x16x3xbf16> to vector<16x3xbf16>
      %c9 = arith.constant 9 : index
      %c0_70 = arith.constant 0 : index
      %c0_71 = arith.constant 0 : index
      %79 = vector.load %arg5[%c9, %c0_70, %c0_71] : memref<16x3x8xbf16, #tpu.memory_space<vmem>>, vector<1x3x8xbf16>
      %80 = vector.shape_cast %79 : vector<1x3x8xbf16> to vector<3x8xbf16>
      %cst_72 = arith.constant dense<0.000000e+00> : vector<16x8xf32>
      %81 = tpu.matmul %78, %80, %cst_72 {dimension_numbers = #tpu.dot_dimension_numbers<[1], [0], [0], [1], [0, 0, 1, 1], [], []>} : vector<16x3xbf16>, vector<3x8xbf16>, vector<16x8xf32> -> vector<16x8xf32>
      %82 = arith.addf %74, %81 : vector<16x8xf32>
      %c1_i32_73 = arith.constant 1 : i32
      %83 = arith.addi %arg8, %c1_i32_73 : i32
      %c0_74 = arith.constant 0 : index
      %84 = arith.index_cast %83 : i32 to index
      %c1_75 = arith.constant 1 : index
      %c0_76 = arith.constant 0 : index
      %85 = vector.load %arg1[%c0_74, %84, %c1_75, %c0_76] : memref<1x17x17x3xbf16, #tpu.memory_space<vmem>>, vector<1x1x16x3xbf16>
      %86 = vector.shape_cast %85 : vector<1x1x16x3xbf16> to vector<16x3xbf16>
      %c10 = arith.constant 10 : index
      %c0_77 = arith.constant 0 : index
      %c0_78 = arith.constant 0 : index
      %87 = vector.load %arg5[%c10, %c0_77, %c0_78] : memref<16x3x8xbf16, #tpu.memory_space<vmem>>, vector<1x3x8xbf16>
      %88 = vector.shape_cast %87 : vector<1x3x8xbf16> to vector<3x8xbf16>
      %cst_79 = arith.constant dense<0.000000e+00> : vector<16x8xf32>
      %89 = tpu.matmul %86, %88, %cst_79 {dimension_numbers = #tpu.dot_dimension_numbers<[1], [0], [0], [1], [0, 0, 1, 1], [], []>} : vector<16x3xbf16>, vector<3x8xbf16>, vector<16x8xf32> -> vector<16x8xf32>
      %90 = arith.addf %82, %89 : vector<16x8xf32>
      %c1_i32_80 = arith.constant 1 : i32
      %91 = arith.addi %arg8, %c1_i32_80 : i32
      %c0_81 = arith.constant 0 : index
      %92 = arith.index_cast %91 : i32 to index
      %c1_82 = arith.constant 1 : index
      %c0_83 = arith.constant 0 : index
      %93 = vector.load %arg2[%c0_81, %92, %c1_82, %c0_83] : memref<1x17x17x3xbf16, #tpu.memory_space<vmem>>, vector<1x1x16x3xbf16>
      %94 = vector.shape_cast %93 : vector<1x1x16x3xbf16> to vector<16x3xbf16>
      %c11 = arith.constant 11 : index
      %c0_84 = arith.constant 0 : index
      %c0_85 = arith.constant 0 : index
      %95 = vector.load %arg5[%c11, %c0_84, %c0_85] : memref<16x3x8xbf16, #tpu.memory_space<vmem>>, vector<1x3x8xbf16>
      %96 = vector.shape_cast %95 : vector<1x3x8xbf16> to vector<3x8xbf16>
      %cst_86 = arith.constant dense<0.000000e+00> : vector<16x8xf32>
      %97 = tpu.matmul %94, %96, %cst_86 {dimension_numbers = #tpu.dot_dimension_numbers<[1], [0], [0], [1], [0, 0, 1, 1], [], []>} : vector<16x3xbf16>, vector<3x8xbf16>, vector<16x8xf32> -> vector<16x8xf32>
      %98 = arith.addf %90, %97 : vector<16x8xf32>
      %c1_i32_87 = arith.constant 1 : i32
      %99 = arith.addi %arg8, %c1_i32_87 : i32
      %c0_88 = arith.constant 0 : index
      %100 = arith.index_cast %99 : i32 to index
      %c0_89 = arith.constant 0 : index
      %c0_90 = arith.constant 0 : index
      %101 = vector.load %arg3[%c0_88, %100, %c0_89, %c0_90] : memref<1x17x17x3xbf16, #tpu.memory_space<vmem>>, vector<1x1x16x3xbf16>
      %102 = vector.shape_cast %101 : vector<1x1x16x3xbf16> to vector<16x3xbf16>
      %c12 = arith.constant 12 : index
      %c0_91 = arith.constant 0 : index
      %c0_92 = arith.constant 0 : index
      %103 = vector.load %arg5[%c12, %c0_91, %c0_92] : memref<16x3x8xbf16, #tpu.memory_space<vmem>>, vector<1x3x8xbf16>
      %104 = vector.shape_cast %103 : vector<1x3x8xbf16> to vector<3x8xbf16>
      %cst_93 = arith.constant dense<0.000000e+00> : vector<16x8xf32>
      %105 = tpu.matmul %102, %104, %cst_93 {dimension_numbers = #tpu.dot_dimension_numbers<[1], [0], [0], [1], [0, 0, 1, 1], [], []>} : vector<16x3xbf16>, vector<3x8xbf16>, vector<16x8xf32> -> vector<16x8xf32>
      %106 = arith.addf %98, %105 : vector<16x8xf32>
      %c1_i32_94 = arith.constant 1 : i32
      %107 = arith.addi %arg8, %c1_i32_94 : i32
      %c0_95 = arith.constant 0 : index
      %108 = arith.index_cast %107 : i32 to index
      %c0_96 = arith.constant 0 : index
      %c0_97 = arith.constant 0 : index
      %109 = vector.load %arg4[%c0_95, %108, %c0_96, %c0_97] : memref<1x17x17x3xbf16, #tpu.memory_space<vmem>>, vector<1x1x16x3xbf16>
      %110 = vector.shape_cast %109 : vector<1x1x16x3xbf16> to vector<16x3xbf16>
      %c13 = arith.constant 13 : index
      %c0_98 = arith.constant 0 : index
      %c0_99 = arith.constant 0 : index
      %111 = vector.load %arg5[%c13, %c0_98, %c0_99] : memref<16x3x8xbf16, #tpu.memory_space<vmem>>, vector<1x3x8xbf16>
      %112 = vector.shape_cast %111 : vector<1x3x8xbf16> to vector<3x8xbf16>
      %cst_100 = arith.constant dense<0.000000e+00> : vector<16x8xf32>
      %113 = tpu.matmul %110, %112, %cst_100 {dimension_numbers = #tpu.dot_dimension_numbers<[1], [0], [0], [1], [0, 0, 1, 1], [], []>} : vector<16x3xbf16>, vector<3x8xbf16>, vector<16x8xf32> -> vector<16x8xf32>
      %114 = arith.addf %106, %113 : vector<16x8xf32>
      %c1_i32_101 = arith.constant 1 : i32
      %115 = arith.addi %arg8, %c1_i32_101 : i32
      %c0_102 = arith.constant 0 : index
      %116 = arith.index_cast %115 : i32 to index
      %c1_103 = arith.constant 1 : index
      %c0_104 = arith.constant 0 : index
      %117 = vector.load %arg3[%c0_102, %116, %c1_103, %c0_104] : memref<1x17x17x3xbf16, #tpu.memory_space<vmem>>, vector<1x1x16x3xbf16>
      %118 = vector.shape_cast %117 : vector<1x1x16x3xbf16> to vector<16x3xbf16>
      %c14 = arith.constant 14 : index
      %c0_105 = arith.constant 0 : index
      %c0_106 = arith.constant 0 : index
      %119 = vector.load %arg5[%c14, %c0_105, %c0_106] : memref<16x3x8xbf16, #tpu.memory_space<vmem>>, vector<1x3x8xbf16>
      %120 = vector.shape_cast %119 : vector<1x3x8xbf16> to vector<3x8xbf16>
      %cst_107 = arith.constant dense<0.000000e+00> : vector<16x8xf32>
      %121 = tpu.matmul %118, %120, %cst_107 {dimension_numbers = #tpu.dot_dimension_numbers<[1], [0], [0], [1], [0, 0, 1, 1], [], []>} : vector<16x3xbf16>, vector<3x8xbf16>, vector<16x8xf32> -> vector<16x8xf32>
      %122 = arith.addf %114, %121 : vector<16x8xf32>
      %c1_i32_108 = arith.constant 1 : i32
      %123 = arith.addi %arg8, %c1_i32_108 : i32
      %c0_109 = arith.constant 0 : index
      %124 = arith.index_cast %123 : i32 to index
      %c1_110 = arith.constant 1 : index
      %c0_111 = arith.constant 0 : index
      %125 = vector.load %arg4[%c0_109, %124, %c1_110, %c0_111] : memref<1x17x17x3xbf16, #tpu.memory_space<vmem>>, vector<1x1x16x3xbf16>
      %126 = vector.shape_cast %125 : vector<1x1x16x3xbf16> to vector<16x3xbf16>
      %c15 = arith.constant 15 : index
      %c0_112 = arith.constant 0 : index
      %c0_113 = arith.constant 0 : index
      %127 = vector.load %arg5[%c15, %c0_112, %c0_113] : memref<16x3x8xbf16, #tpu.memory_space<vmem>>, vector<1x3x8xbf16>
      %128 = vector.shape_cast %127 : vector<1x3x8xbf16> to vector<3x8xbf16>
      %cst_114 = arith.constant dense<0.000000e+00> : vector<16x8xf32>
      %129 = tpu.matmul %126, %128, %cst_114 {dimension_numbers = #tpu.dot_dimension_numbers<[1], [0], [0], [1], [0, 0, 1, 1], [], []>} : vector<16x3xbf16>, vector<3x8xbf16>, vector<16x8xf32> -> vector<16x8xf32>
      %130 = arith.addf %122, %129 : vector<16x8xf32>
      %131 = vector.broadcast %0 : vector<1x8xf32> to vector<16x8xf32>
      %132 = arith.addf %130, %131 : vector<16x8xf32>
      %cst_115 = arith.constant 0.000000e+00 : f32
      %133 = vector.broadcast %cst_115 : f32 to vector<16x8xf32>
      %134 = arith.cmpf oge, %132, %133 : vector<16x8xf32>
      %cst_116 = arith.constant 2.000000e-01 : f32
      %135 = vector.broadcast %cst_116 : f32 to vector<16x8xf32>
      %136 = arith.mulf %135, %132 : vector<16x8xf32>
      %137 = arith.select %134, %132, %136 : vector<16x8xi1>, vector<16x8xf32>
      %138 = arith.truncf %137 : vector<16x8xf32> to vector<16x8xbf16>
      %c0_117 = arith.constant 0 : index
      %139 = arith.index_cast %arg8 : i32 to index
      %c0_118 = arith.constant 0 : index
      %c0_119 = arith.constant 0 : index
      %140 = vector.load %arg7[%c0_117, %139, %c0_118, %c0_119] : memref<1x16x16x8xbf16, #tpu.memory_space<vmem>>, vector<1x1x16x8xbf16>
      %141 = vector.shape_cast %140 : vector<1x1x16x8xbf16> to vector<16x8xbf16>
      %142 = vector.shape_cast %138 : vector<16x8xbf16> to vector<1x1x16x8xbf16>
      tpu.vector_store %arg7[%c0_117, %139, %c0_118, %c0_119], %142 {strides = array<i32>} : memref<1x16x16x8xbf16, #tpu.memory_space<vmem>>, vector<1x1x16x8xbf16>,
    }
    %c16_i32_1 = arith.constant 16 : i32
    return
  }
  func.func @transform_0(%arg0: i32) -> (i32, i32, i32, i32) {
    %c0_i32 = arith.constant 0 : i32
    %c0_i32_0 = arith.constant 0 : i32
    %c0_i32_1 = arith.constant 0 : i32
    %c0_i32_2 = arith.constant 0 : i32
    return %arg0, %c0_i32, %c0_i32_0, %c0_i32_1 : i32, i32, i32, i32
  }
  func.func @transform_1(%arg0: i32) -> (i32, i32, i32, i32) {
    %c0_i32 = arith.constant 0 : i32
    %c0_i32_0 = arith.constant 0 : i32
    %c0_i32_1 = arith.constant 0 : i32
    %c0_i32_2 = arith.constant 0 : i32
    return %arg0, %c0_i32, %c0_i32_0, %c0_i32_1 : i32, i32, i32, i32
  }
  func.func @transform_2(%arg0: i32) -> (i32, i32, i32, i32) {
    %c0_i32 = arith.constant 0 : i32
    %c0_i32_0 = arith.constant 0 : i32
    %c0_i32_1 = arith.constant 0 : i32
    %c0_i32_2 = arith.constant 0 : i32
    return %arg0, %c0_i32, %c0_i32_0, %c0_i32_1 : i32, i32, i32, i32
  }
  func.func @transform_3(%arg0: i32) -> (i32, i32, i32, i32) {
    %c0_i32 = arith.constant 0 : i32
    %c0_i32_0 = arith.constant 0 : i32
    %c0_i32_1 = arith.constant 0 : i32
    %c0_i32_2 = arith.constant 0 : i32
    return %arg0, %c0_i32, %c0_i32_0, %c0_i32_1 : i32, i32, i32, i32
  }
  func.func @transform_4(%arg0: i32) -> (i32, i32, i32) {
    %c0_i32 = arith.constant 0 : i32
    %c0_i32_0 = arith.constant 0 : i32
    %c0_i32_1 = arith.constant 0 : i32
    %c0_i32_2 = arith.constant 0 : i32
    return %c0_i32, %c0_i32_0, %c0_i32_1 : i32, i32, i32
  }
  func.func @transform_5(%arg0: i32) -> (i32, i32) {
    %c0_i32 = arith.constant 0 : i32
    %c0_i32_0 = arith.constant 0 : i32
    %c0_i32_1 = arith.constant 0 : i32
    return %c0_i32, %c0_i32_0 : i32, i32
  }
  func.func @transform_6(%arg0: i32) -> (i32, i32, i32, i32) {
    %c0_i32 = arith.constant 0 : i32
    %c0_i32_0 = arith.constant 0 : i32
    %c0_i32_1 = arith.constant 0 : i32
    %c0_i32_2 = arith.constant 0 : i32
    return %arg0, %c0_i32, %c0_i32_0, %c0_i32_1 : i32, i32, i32, i32
  }
}

module attributes {stable_mosaic.version = 11 : i64} {
  func.func @_conv4x4_kernel(%arg0: i32, %arg1: memref<1x9x9x8xbf16, #tpu.memory_space<vmem>>, %arg2: memref<1x9x9x8xbf16, #tpu.memory_space<vmem>>, %arg3: memref<1x9x9x8xbf16, #tpu.memory_space<vmem>>, %arg4: memref<1x9x9x8xbf16, #tpu.memory_space<vmem>>, %arg5: memref<16x8x16xbf16, #tpu.memory_space<vmem>>, %arg6: memref<1x16xf32, #tpu.memory_space<vmem>>, %arg7: memref<1x8x8x16xbf16, #tpu.memory_space<vmem>>, %arg8: memref<1x2x16xf32, #tpu.memory_space<vmem>>) attributes {dimension_semantics = [#tpu.dimension_semantics<parallel>], iteration_bounds = array<i64: 2>, scalar_prefetch = 0 : i64, scratch_operands = 0 : i64, tpu.core_type = #tpu.core_type<tc>, window_params = [{transform_indices = @transform_0, window_bounds = array<i64: 1, 9, 9, 8>}, {transform_indices = @transform_1, window_bounds = array<i64: 1, 9, 9, 8>}, {transform_indices = @transform_2, window_bounds = array<i64: 1, 9, 9, 8>}, {transform_indices = @transform_3, window_bounds = array<i64: 1, 9, 9, 8>}, {pipeline_mode = #tpu.pipeline_mode<synchronous>, transform_indices = @transform_4, window_bounds = array<i64: 16, 8, 16>}, {pipeline_mode = #tpu.pipeline_mode<synchronous>, transform_indices = @transform_5, window_bounds = array<i64: 1, 16>}, {transform_indices = @transform_6, window_bounds = array<i64: 1, 8, 8, 16>}, {transform_indices = @transform_7, window_bounds = array<i64: 1, 2, 16>}]} {
    %c0 = arith.constant 0 : index
    %c0_0 = arith.constant 0 : index
    %0 = vector.load %arg6[%c0, %c0_0] : memref<1x16xf32, #tpu.memory_space<vmem>>, vector<1x16xf32>
    %cst = arith.constant 0.000000e+00 : f32
    %1 = vector.broadcast %cst : f32 to vector<1x16xf32>
    %c0_i32 = arith.constant 0 : i32
    %c8_i32 = arith.constant 8 : i32
    %2 = arith.addi %c0_i32, %c8_i32 : i32
    %c1_i32 = arith.constant 1 : i32
    %3:2 = scf.for %arg9 = %c0_i32 to %2 step %c1_i32 iter_args(%arg10 = %1, %arg11 = %1) -> (vector<1x16xf32>, vector<1x16xf32>)  : i32 {
      %cst_7 = arith.constant 0.000000e+00 : f32
      %10 = vector.broadcast %cst_7 : f32 to vector<8x16xf32>
      %c0_i32_8 = arith.constant 0 : i32
      %11 = arith.addi %arg9, %c0_i32_8 : i32
      %c0_9 = arith.constant 0 : index
      %12 = arith.index_cast %11 : i32 to index
      %c0_10 = arith.constant 0 : index
      %c0_11 = arith.constant 0 : index
      %13 = vector.load %arg1[%c0_9, %12, %c0_10, %c0_11] : memref<1x9x9x8xbf16, #tpu.memory_space<vmem>>, vector<1x1x8x8xbf16>
      %14 = vector.shape_cast %13 : vector<1x1x8x8xbf16> to vector<8x8xbf16>
      %c0_12 = arith.constant 0 : index
      %c0_13 = arith.constant 0 : index
      %c0_14 = arith.constant 0 : index
      %15 = vector.load %arg5[%c0_12, %c0_13, %c0_14] : memref<16x8x16xbf16, #tpu.memory_space<vmem>>, vector<1x8x16xbf16>
      %16 = vector.shape_cast %15 : vector<1x8x16xbf16> to vector<8x16xbf16>
      %cst_15 = arith.constant dense<0.000000e+00> : vector<8x16xf32>
      %17 = tpu.matmul %14, %16, %cst_15 {dimension_numbers = #tpu.dot_dimension_numbers<[1], [0], [0], [1], [0, 0, 1, 1], [], []>} : vector<8x8xbf16>, vector<8x16xbf16>, vector<8x16xf32> -> vector<8x16xf32>
      %18 = arith.addf %10, %17 : vector<8x16xf32>
      %c0_i32_16 = arith.constant 0 : i32
      %19 = arith.addi %arg9, %c0_i32_16 : i32
      %c0_17 = arith.constant 0 : index
      %20 = arith.index_cast %19 : i32 to index
      %c0_18 = arith.constant 0 : index
      %c0_19 = arith.constant 0 : index
      %21 = vector.load %arg2[%c0_17, %20, %c0_18, %c0_19] : memref<1x9x9x8xbf16, #tpu.memory_space<vmem>>, vector<1x1x8x8xbf16>
      %22 = vector.shape_cast %21 : vector<1x1x8x8xbf16> to vector<8x8xbf16>
      %c1_20 = arith.constant 1 : index
      %c0_21 = arith.constant 0 : index
      %c0_22 = arith.constant 0 : index
      %23 = vector.load %arg5[%c1_20, %c0_21, %c0_22] : memref<16x8x16xbf16, #tpu.memory_space<vmem>>, vector<1x8x16xbf16>
      %24 = vector.shape_cast %23 : vector<1x8x16xbf16> to vector<8x16xbf16>
      %cst_23 = arith.constant dense<0.000000e+00> : vector<8x16xf32>
      %25 = tpu.matmul %22, %24, %cst_23 {dimension_numbers = #tpu.dot_dimension_numbers<[1], [0], [0], [1], [0, 0, 1, 1], [], []>} : vector<8x8xbf16>, vector<8x16xbf16>, vector<8x16xf32> -> vector<8x16xf32>
      %26 = arith.addf %18, %25 : vector<8x16xf32>
      %c0_i32_24 = arith.constant 0 : i32
      %27 = arith.addi %arg9, %c0_i32_24 : i32
      %c0_25 = arith.constant 0 : index
      %28 = arith.index_cast %27 : i32 to index
      %c1_26 = arith.constant 1 : index
      %c0_27 = arith.constant 0 : index
      %29 = vector.load %arg1[%c0_25, %28, %c1_26, %c0_27] : memref<1x9x9x8xbf16, #tpu.memory_space<vmem>>, vector<1x1x8x8xbf16>
      %30 = vector.shape_cast %29 : vector<1x1x8x8xbf16> to vector<8x8xbf16>
      %c2 = arith.constant 2 : index
      %c0_28 = arith.constant 0 : index
      %c0_29 = arith.constant 0 : index
      %31 = vector.load %arg5[%c2, %c0_28, %c0_29] : memref<16x8x16xbf16, #tpu.memory_space<vmem>>, vector<1x8x16xbf16>
      %32 = vector.shape_cast %31 : vector<1x8x16xbf16> to vector<8x16xbf16>
      %cst_30 = arith.constant dense<0.000000e+00> : vector<8x16xf32>
      %33 = tpu.matmul %30, %32, %cst_30 {dimension_numbers = #tpu.dot_dimension_numbers<[1], [0], [0], [1], [0, 0, 1, 1], [], []>} : vector<8x8xbf16>, vector<8x16xbf16>, vector<8x16xf32> -> vector<8x16xf32>
      %34 = arith.addf %26, %33 : vector<8x16xf32>
      %c0_i32_31 = arith.constant 0 : i32
      %35 = arith.addi %arg9, %c0_i32_31 : i32
      %c0_32 = arith.constant 0 : index
      %36 = arith.index_cast %35 : i32 to index
      %c1_33 = arith.constant 1 : index
      %c0_34 = arith.constant 0 : index
      %37 = vector.load %arg2[%c0_32, %36, %c1_33, %c0_34] : memref<1x9x9x8xbf16, #tpu.memory_space<vmem>>, vector<1x1x8x8xbf16>
      %38 = vector.shape_cast %37 : vector<1x1x8x8xbf16> to vector<8x8xbf16>
      %c3 = arith.constant 3 : index
      %c0_35 = arith.constant 0 : index
      %c0_36 = arith.constant 0 : index
      %39 = vector.load %arg5[%c3, %c0_35, %c0_36] : memref<16x8x16xbf16, #tpu.memory_space<vmem>>, vector<1x8x16xbf16>
      %40 = vector.shape_cast %39 : vector<1x8x16xbf16> to vector<8x16xbf16>
      %cst_37 = arith.constant dense<0.000000e+00> : vector<8x16xf32>
      %41 = tpu.matmul %38, %40, %cst_37 {dimension_numbers = #tpu.dot_dimension_numbers<[1], [0], [0], [1], [0, 0, 1, 1], [], []>} : vector<8x8xbf16>, vector<8x16xbf16>, vector<8x16xf32> -> vector<8x16xf32>
      %42 = arith.addf %34, %41 : vector<8x16xf32>
      %c0_i32_38 = arith.constant 0 : i32
      %43 = arith.addi %arg9, %c0_i32_38 : i32
      %c0_39 = arith.constant 0 : index
      %44 = arith.index_cast %43 : i32 to index
      %c0_40 = arith.constant 0 : index
      %c0_41 = arith.constant 0 : index
      %45 = vector.load %arg3[%c0_39, %44, %c0_40, %c0_41] : memref<1x9x9x8xbf16, #tpu.memory_space<vmem>>, vector<1x1x8x8xbf16>
      %46 = vector.shape_cast %45 : vector<1x1x8x8xbf16> to vector<8x8xbf16>
      %c4 = arith.constant 4 : index
      %c0_42 = arith.constant 0 : index
      %c0_43 = arith.constant 0 : index
      %47 = vector.load %arg5[%c4, %c0_42, %c0_43] : memref<16x8x16xbf16, #tpu.memory_space<vmem>>, vector<1x8x16xbf16>
      %48 = vector.shape_cast %47 : vector<1x8x16xbf16> to vector<8x16xbf16>
      %cst_44 = arith.constant dense<0.000000e+00> : vector<8x16xf32>
      %49 = tpu.matmul %46, %48, %cst_44 {dimension_numbers = #tpu.dot_dimension_numbers<[1], [0], [0], [1], [0, 0, 1, 1], [], []>} : vector<8x8xbf16>, vector<8x16xbf16>, vector<8x16xf32> -> vector<8x16xf32>
      %50 = arith.addf %42, %49 : vector<8x16xf32>
      %c0_i32_45 = arith.constant 0 : i32
      %51 = arith.addi %arg9, %c0_i32_45 : i32
      %c0_46 = arith.constant 0 : index
      %52 = arith.index_cast %51 : i32 to index
      %c0_47 = arith.constant 0 : index
      %c0_48 = arith.constant 0 : index
      %53 = vector.load %arg4[%c0_46, %52, %c0_47, %c0_48] : memref<1x9x9x8xbf16, #tpu.memory_space<vmem>>, vector<1x1x8x8xbf16>
      %54 = vector.shape_cast %53 : vector<1x1x8x8xbf16> to vector<8x8xbf16>
      %c5 = arith.constant 5 : index
      %c0_49 = arith.constant 0 : index
      %c0_50 = arith.constant 0 : index
      %55 = vector.load %arg5[%c5, %c0_49, %c0_50] : memref<16x8x16xbf16, #tpu.memory_space<vmem>>, vector<1x8x16xbf16>
      %56 = vector.shape_cast %55 : vector<1x8x16xbf16> to vector<8x16xbf16>
      %cst_51 = arith.constant dense<0.000000e+00> : vector<8x16xf32>
      %57 = tpu.matmul %54, %56, %cst_51 {dimension_numbers = #tpu.dot_dimension_numbers<[1], [0], [0], [1], [0, 0, 1, 1], [], []>} : vector<8x8xbf16>, vector<8x16xbf16>, vector<8x16xf32> -> vector<8x16xf32>
      %58 = arith.addf %50, %57 : vector<8x16xf32>
      %c0_i32_52 = arith.constant 0 : i32
      %59 = arith.addi %arg9, %c0_i32_52 : i32
      %c0_53 = arith.constant 0 : index
      %60 = arith.index_cast %59 : i32 to index
      %c1_54 = arith.constant 1 : index
      %c0_55 = arith.constant 0 : index
      %61 = vector.load %arg3[%c0_53, %60, %c1_54, %c0_55] : memref<1x9x9x8xbf16, #tpu.memory_space<vmem>>, vector<1x1x8x8xbf16>
      %62 = vector.shape_cast %61 : vector<1x1x8x8xbf16> to vector<8x8xbf16>
      %c6 = arith.constant 6 : index
      %c0_56 = arith.constant 0 : index
      %c0_57 = arith.constant 0 : index
      %63 = vector.load %arg5[%c6, %c0_56, %c0_57] : memref<16x8x16xbf16, #tpu.memory_space<vmem>>, vector<1x8x16xbf16>
      %64 = vector.shape_cast %63 : vector<1x8x16xbf16> to vector<8x16xbf16>
      %cst_58 = arith.constant dense<0.000000e+00> : vector<8x16xf32>
      %65 = tpu.matmul %62, %64, %cst_58 {dimension_numbers = #tpu.dot_dimension_numbers<[1], [0], [0], [1], [0, 0, 1, 1], [], []>} : vector<8x8xbf16>, vector<8x16xbf16>, vector<8x16xf32> -> vector<8x16xf32>
      %66 = arith.addf %58, %65 : vector<8x16xf32>
      %c0_i32_59 = arith.constant 0 : i32
      %67 = arith.addi %arg9, %c0_i32_59 : i32
      %c0_60 = arith.constant 0 : index
      %68 = arith.index_cast %67 : i32 to index
      %c1_61 = arith.constant 1 : index
      %c0_62 = arith.constant 0 : index
      %69 = vector.load %arg4[%c0_60, %68, %c1_61, %c0_62] : memref<1x9x9x8xbf16, #tpu.memory_space<vmem>>, vector<1x1x8x8xbf16>
      %70 = vector.shape_cast %69 : vector<1x1x8x8xbf16> to vector<8x8xbf16>
      %c7 = arith.constant 7 : index
      %c0_63 = arith.constant 0 : index
      %c0_64 = arith.constant 0 : index
      %71 = vector.load %arg5[%c7, %c0_63, %c0_64] : memref<16x8x16xbf16, #tpu.memory_space<vmem>>, vector<1x8x16xbf16>
      %72 = vector.shape_cast %71 : vector<1x8x16xbf16> to vector<8x16xbf16>
      %cst_65 = arith.constant dense<0.000000e+00> : vector<8x16xf32>
      %73 = tpu.matmul %70, %72, %cst_65 {dimension_numbers = #tpu.dot_dimension_numbers<[1], [0], [0], [1], [0, 0, 1, 1], [], []>} : vector<8x8xbf16>, vector<8x16xbf16>, vector<8x16xf32> -> vector<8x16xf32>
      %74 = arith.addf %66, %73 : vector<8x16xf32>
      %c1_i32_66 = arith.constant 1 : i32
      %75 = arith.addi %arg9, %c1_i32_66 : i32
      %c0_67 = arith.constant 0 : index
      %76 = arith.index_cast %75 : i32 to index
      %c0_68 = arith.constant 0 : index
      %c0_69 = arith.constant 0 : index
      %77 = vector.load %arg1[%c0_67, %76, %c0_68, %c0_69] : memref<1x9x9x8xbf16, #tpu.memory_space<vmem>>, vector<1x1x8x8xbf16>
      %78 = vector.shape_cast %77 : vector<1x1x8x8xbf16> to vector<8x8xbf16>
      %c8 = arith.constant 8 : index
      %c0_70 = arith.constant 0 : index
      %c0_71 = arith.constant 0 : index
      %79 = vector.load %arg5[%c8, %c0_70, %c0_71] : memref<16x8x16xbf16, #tpu.memory_space<vmem>>, vector<1x8x16xbf16>
      %80 = vector.shape_cast %79 : vector<1x8x16xbf16> to vector<8x16xbf16>
      %cst_72 = arith.constant dense<0.000000e+00> : vector<8x16xf32>
      %81 = tpu.matmul %78, %80, %cst_72 {dimension_numbers = #tpu.dot_dimension_numbers<[1], [0], [0], [1], [0, 0, 1, 1], [], []>} : vector<8x8xbf16>, vector<8x16xbf16>, vector<8x16xf32> -> vector<8x16xf32>
      %82 = arith.addf %74, %81 : vector<8x16xf32>
      %c1_i32_73 = arith.constant 1 : i32
      %83 = arith.addi %arg9, %c1_i32_73 : i32
      %c0_74 = arith.constant 0 : index
      %84 = arith.index_cast %83 : i32 to index
      %c0_75 = arith.constant 0 : index
      %c0_76 = arith.constant 0 : index
      %85 = vector.load %arg2[%c0_74, %84, %c0_75, %c0_76] : memref<1x9x9x8xbf16, #tpu.memory_space<vmem>>, vector<1x1x8x8xbf16>
      %86 = vector.shape_cast %85 : vector<1x1x8x8xbf16> to vector<8x8xbf16>
      %c9 = arith.constant 9 : index
      %c0_77 = arith.constant 0 : index
      %c0_78 = arith.constant 0 : index
      %87 = vector.load %arg5[%c9, %c0_77, %c0_78] : memref<16x8x16xbf16, #tpu.memory_space<vmem>>, vector<1x8x16xbf16>
      %88 = vector.shape_cast %87 : vector<1x8x16xbf16> to vector<8x16xbf16>
      %cst_79 = arith.constant dense<0.000000e+00> : vector<8x16xf32>
      %89 = tpu.matmul %86, %88, %cst_79 {dimension_numbers = #tpu.dot_dimension_numbers<[1], [0], [0], [1], [0, 0, 1, 1], [], []>} : vector<8x8xbf16>, vector<8x16xbf16>, vector<8x16xf32> -> vector<8x16xf32>
      %90 = arith.addf %82, %89 : vector<8x16xf32>
      %c1_i32_80 = arith.constant 1 : i32
      %91 = arith.addi %arg9, %c1_i32_80 : i32
      %c0_81 = arith.constant 0 : index
      %92 = arith.index_cast %91 : i32 to index
      %c1_82 = arith.constant 1 : index
      %c0_83 = arith.constant 0 : index
      %93 = vector.load %arg1[%c0_81, %92, %c1_82, %c0_83] : memref<1x9x9x8xbf16, #tpu.memory_space<vmem>>, vector<1x1x8x8xbf16>
      %94 = vector.shape_cast %93 : vector<1x1x8x8xbf16> to vector<8x8xbf16>
      %c10 = arith.constant 10 : index
      %c0_84 = arith.constant 0 : index
      %c0_85 = arith.constant 0 : index
      %95 = vector.load %arg5[%c10, %c0_84, %c0_85] : memref<16x8x16xbf16, #tpu.memory_space<vmem>>, vector<1x8x16xbf16>
      %96 = vector.shape_cast %95 : vector<1x8x16xbf16> to vector<8x16xbf16>
      %cst_86 = arith.constant dense<0.000000e+00> : vector<8x16xf32>
      %97 = tpu.matmul %94, %96, %cst_86 {dimension_numbers = #tpu.dot_dimension_numbers<[1], [0], [0], [1], [0, 0, 1, 1], [], []>} : vector<8x8xbf16>, vector<8x16xbf16>, vector<8x16xf32> -> vector<8x16xf32>
      %98 = arith.addf %90, %97 : vector<8x16xf32>
      %c1_i32_87 = arith.constant 1 : i32
      %99 = arith.addi %arg9, %c1_i32_87 : i32
      %c0_88 = arith.constant 0 : index
      %100 = arith.index_cast %99 : i32 to index
      %c1_89 = arith.constant 1 : index
      %c0_90 = arith.constant 0 : index
      %101 = vector.load %arg2[%c0_88, %100, %c1_89, %c0_90] : memref<1x9x9x8xbf16, #tpu.memory_space<vmem>>, vector<1x1x8x8xbf16>
      %102 = vector.shape_cast %101 : vector<1x1x8x8xbf16> to vector<8x8xbf16>
      %c11 = arith.constant 11 : index
      %c0_91 = arith.constant 0 : index
      %c0_92 = arith.constant 0 : index
      %103 = vector.load %arg5[%c11, %c0_91, %c0_92] : memref<16x8x16xbf16, #tpu.memory_space<vmem>>, vector<1x8x16xbf16>
      %104 = vector.shape_cast %103 : vector<1x8x16xbf16> to vector<8x16xbf16>
      %cst_93 = arith.constant dense<0.000000e+00> : vector<8x16xf32>
      %105 = tpu.matmul %102, %104, %cst_93 {dimension_numbers = #tpu.dot_dimension_numbers<[1], [0], [0], [1], [0, 0, 1, 1], [], []>} : vector<8x8xbf16>, vector<8x16xbf16>, vector<8x16xf32> -> vector<8x16xf32>
      %106 = arith.addf %98, %105 : vector<8x16xf32>
      %c1_i32_94 = arith.constant 1 : i32
      %107 = arith.addi %arg9, %c1_i32_94 : i32
      %c0_95 = arith.constant 0 : index
      %108 = arith.index_cast %107 : i32 to index
      %c0_96 = arith.constant 0 : index
      %c0_97 = arith.constant 0 : index
      %109 = vector.load %arg3[%c0_95, %108, %c0_96, %c0_97] : memref<1x9x9x8xbf16, #tpu.memory_space<vmem>>, vector<1x1x8x8xbf16>
      %110 = vector.shape_cast %109 : vector<1x1x8x8xbf16> to vector<8x8xbf16>
      %c12 = arith.constant 12 : index
      %c0_98 = arith.constant 0 : index
      %c0_99 = arith.constant 0 : index
      %111 = vector.load %arg5[%c12, %c0_98, %c0_99] : memref<16x8x16xbf16, #tpu.memory_space<vmem>>, vector<1x8x16xbf16>
      %112 = vector.shape_cast %111 : vector<1x8x16xbf16> to vector<8x16xbf16>
      %cst_100 = arith.constant dense<0.000000e+00> : vector<8x16xf32>
      %113 = tpu.matmul %110, %112, %cst_100 {dimension_numbers = #tpu.dot_dimension_numbers<[1], [0], [0], [1], [0, 0, 1, 1], [], []>} : vector<8x8xbf16>, vector<8x16xbf16>, vector<8x16xf32> -> vector<8x16xf32>
      %114 = arith.addf %106, %113 : vector<8x16xf32>
      %c1_i32_101 = arith.constant 1 : i32
      %115 = arith.addi %arg9, %c1_i32_101 : i32
      %c0_102 = arith.constant 0 : index
      %116 = arith.index_cast %115 : i32 to index
      %c0_103 = arith.constant 0 : index
      %c0_104 = arith.constant 0 : index
      %117 = vector.load %arg4[%c0_102, %116, %c0_103, %c0_104] : memref<1x9x9x8xbf16, #tpu.memory_space<vmem>>, vector<1x1x8x8xbf16>
      %118 = vector.shape_cast %117 : vector<1x1x8x8xbf16> to vector<8x8xbf16>
      %c13 = arith.constant 13 : index
      %c0_105 = arith.constant 0 : index
      %c0_106 = arith.constant 0 : index
      %119 = vector.load %arg5[%c13, %c0_105, %c0_106] : memref<16x8x16xbf16, #tpu.memory_space<vmem>>, vector<1x8x16xbf16>
      %120 = vector.shape_cast %119 : vector<1x8x16xbf16> to vector<8x16xbf16>
      %cst_107 = arith.constant dense<0.000000e+00> : vector<8x16xf32>
      %121 = tpu.matmul %118, %120, %cst_107 {dimension_numbers = #tpu.dot_dimension_numbers<[1], [0], [0], [1], [0, 0, 1, 1], [], []>} : vector<8x8xbf16>, vector<8x16xbf16>, vector<8x16xf32> -> vector<8x16xf32>
      %122 = arith.addf %114, %121 : vector<8x16xf32>
      %c1_i32_108 = arith.constant 1 : i32
      %123 = arith.addi %arg9, %c1_i32_108 : i32
      %c0_109 = arith.constant 0 : index
      %124 = arith.index_cast %123 : i32 to index
      %c1_110 = arith.constant 1 : index
      %c0_111 = arith.constant 0 : index
      %125 = vector.load %arg3[%c0_109, %124, %c1_110, %c0_111] : memref<1x9x9x8xbf16, #tpu.memory_space<vmem>>, vector<1x1x8x8xbf16>
      %126 = vector.shape_cast %125 : vector<1x1x8x8xbf16> to vector<8x8xbf16>
      %c14 = arith.constant 14 : index
      %c0_112 = arith.constant 0 : index
      %c0_113 = arith.constant 0 : index
      %127 = vector.load %arg5[%c14, %c0_112, %c0_113] : memref<16x8x16xbf16, #tpu.memory_space<vmem>>, vector<1x8x16xbf16>
      %128 = vector.shape_cast %127 : vector<1x8x16xbf16> to vector<8x16xbf16>
      %cst_114 = arith.constant dense<0.000000e+00> : vector<8x16xf32>
      %129 = tpu.matmul %126, %128, %cst_114 {dimension_numbers = #tpu.dot_dimension_numbers<[1], [0], [0], [1], [0, 0, 1, 1], [], []>} : vector<8x8xbf16>, vector<8x16xbf16>, vector<8x16xf32> -> vector<8x16xf32>
      %130 = arith.addf %122, %129 : vector<8x16xf32>
      %c1_i32_115 = arith.constant 1 : i32
      %131 = arith.addi %arg9, %c1_i32_115 : i32
      %c0_116 = arith.constant 0 : index
      %132 = arith.index_cast %131 : i32 to index
      %c1_117 = arith.constant 1 : index
      %c0_118 = arith.constant 0 : index
      %133 = vector.load %arg4[%c0_116, %132, %c1_117, %c0_118] : memref<1x9x9x8xbf16, #tpu.memory_space<vmem>>, vector<1x1x8x8xbf16>
      %134 = vector.shape_cast %133 : vector<1x1x8x8xbf16> to vector<8x8xbf16>
      %c15 = arith.constant 15 : index
      %c0_119 = arith.constant 0 : index
      %c0_120 = arith.constant 0 : index
      %135 = vector.load %arg5[%c15, %c0_119, %c0_120] : memref<16x8x16xbf16, #tpu.memory_space<vmem>>, vector<1x8x16xbf16>
      %136 = vector.shape_cast %135 : vector<1x8x16xbf16> to vector<8x16xbf16>
      %cst_121 = arith.constant dense<0.000000e+00> : vector<8x16xf32>
      %137 = tpu.matmul %134, %136, %cst_121 {dimension_numbers = #tpu.dot_dimension_numbers<[1], [0], [0], [1], [0, 0, 1, 1], [], []>} : vector<8x8xbf16>, vector<8x16xbf16>, vector<8x16xf32> -> vector<8x16xf32>
      %138 = arith.addf %130, %137 : vector<8x16xf32>
      %139 = vector.broadcast %0 : vector<1x16xf32> to vector<8x16xf32>
      %140 = arith.addf %138, %139 : vector<8x16xf32>
      %141 = arith.truncf %140 : vector<8x16xf32> to vector<8x16xbf16>
      %c0_122 = arith.constant 0 : index
      %142 = arith.index_cast %arg9 : i32 to index
      %c0_123 = arith.constant 0 : index
      %c0_124 = arith.constant 0 : index
      %143 = vector.load %arg7[%c0_122, %142, %c0_123, %c0_124] : memref<1x8x8x16xbf16, #tpu.memory_space<vmem>>, vector<1x1x8x16xbf16>
      %144 = vector.shape_cast %143 : vector<1x1x8x16xbf16> to vector<8x16xbf16>
      %145 = vector.shape_cast %141 : vector<8x16xbf16> to vector<1x1x8x16xbf16>
      tpu.vector_store %arg7[%c0_122, %142, %c0_123, %c0_124], %145 {strides = array<i32>} : memref<1x8x8x16xbf16, #tpu.memory_space<vmem>>, vector<1x1x8x16xbf16>,
      %cst_125 = arith.constant dense<0.000000e+00> : vector<16xf32>
      %146 = vector.multi_reduction <add>, %140, %cst_125 [0] : vector<8x16xf32> to vector<16xf32>
      %147 = vector.shape_cast %146 : vector<16xf32> to vector<1x16xf32>
      %148 = arith.addf %arg10, %147 : vector<1x16xf32>
      %149 = arith.mulf %140, %140 : vector<8x16xf32>
      %cst_126 = arith.constant dense<0.000000e+00> : vector<16xf32>
      %150 = vector.multi_reduction <add>, %149, %cst_126 [0] : vector<8x16xf32> to vector<16xf32>
      %151 = vector.shape_cast %150 : vector<16xf32> to vector<1x16xf32>
      %152 = arith.addf %arg11, %151 : vector<1x16xf32>
      scf.yield %148, %152 : vector<1x16xf32>, vector<1x16xf32>
    }
    %c8_i32_1 = arith.constant 8 : i32
    %c0_2 = arith.constant 0 : index
    %c0_3 = arith.constant 0 : index
    %c0_4 = arith.constant 0 : index
    %4 = vector.load %arg8[%c0_2, %c0_3, %c0_4] : memref<1x2x16xf32, #tpu.memory_space<vmem>>, vector<1x1x16xf32>
    %5 = vector.shape_cast %4 : vector<1x1x16xf32> to vector<1x16xf32>
    %6 = vector.shape_cast %3#0 : vector<1x16xf32> to vector<1x1x16xf32>
    tpu.vector_store %arg8[%c0_2, %c0_3, %c0_4], %6 {strides = array<i32>} : memref<1x2x16xf32, #tpu.memory_space<vmem>>, vector<1x1x16xf32>,
    %c0_5 = arith.constant 0 : index
    %c1 = arith.constant 1 : index
    %c0_6 = arith.constant 0 : index
    %7 = vector.load %arg8[%c0_5, %c1, %c0_6] : memref<1x2x16xf32, #tpu.memory_space<vmem>>, vector<1x1x16xf32>
    %8 = vector.shape_cast %7 : vector<1x1x16xf32> to vector<1x16xf32>
    %9 = vector.shape_cast %3#1 : vector<1x16xf32> to vector<1x1x16xf32>
    tpu.vector_store %arg8[%c0_5, %c1, %c0_6], %9 {strides = array<i32>} : memref<1x2x16xf32, #tpu.memory_space<vmem>>, vector<1x1x16xf32>,
    return
  }
  func.func @transform_0(%arg0: i32) -> (i32, i32, i32, i32) {
    %c0_i32 = arith.constant 0 : i32
    %c0_i32_0 = arith.constant 0 : i32
    %c0_i32_1 = arith.constant 0 : i32
    %c0_i32_2 = arith.constant 0 : i32
    return %arg0, %c0_i32, %c0_i32_0, %c0_i32_1 : i32, i32, i32, i32
  }
  func.func @transform_1(%arg0: i32) -> (i32, i32, i32, i32) {
    %c0_i32 = arith.constant 0 : i32
    %c0_i32_0 = arith.constant 0 : i32
    %c0_i32_1 = arith.constant 0 : i32
    %c0_i32_2 = arith.constant 0 : i32
    return %arg0, %c0_i32, %c0_i32_0, %c0_i32_1 : i32, i32, i32, i32
  }
  func.func @transform_2(%arg0: i32) -> (i32, i32, i32, i32) {
    %c0_i32 = arith.constant 0 : i32
    %c0_i32_0 = arith.constant 0 : i32
    %c0_i32_1 = arith.constant 0 : i32
    %c0_i32_2 = arith.constant 0 : i32
    return %arg0, %c0_i32, %c0_i32_0, %c0_i32_1 : i32, i32, i32, i32
  }
  func.func @transform_3(%arg0: i32) -> (i32, i32, i32, i32) {
    %c0_i32 = arith.constant 0 : i32
    %c0_i32_0 = arith.constant 0 : i32
    %c0_i32_1 = arith.constant 0 : i32
    %c0_i32_2 = arith.constant 0 : i32
    return %arg0, %c0_i32, %c0_i32_0, %c0_i32_1 : i32, i32, i32, i32
  }
  func.func @transform_4(%arg0: i32) -> (i32, i32, i32) {
    %c0_i32 = arith.constant 0 : i32
    %c0_i32_0 = arith.constant 0 : i32
    %c0_i32_1 = arith.constant 0 : i32
    %c0_i32_2 = arith.constant 0 : i32
    return %c0_i32, %c0_i32_0, %c0_i32_1 : i32, i32, i32
  }
  func.func @transform_5(%arg0: i32) -> (i32, i32) {
    %c0_i32 = arith.constant 0 : i32
    %c0_i32_0 = arith.constant 0 : i32
    %c0_i32_1 = arith.constant 0 : i32
    return %c0_i32, %c0_i32_0 : i32, i32
  }
  func.func @transform_6(%arg0: i32) -> (i32, i32, i32, i32) {
    %c0_i32 = arith.constant 0 : i32
    %c0_i32_0 = arith.constant 0 : i32
    %c0_i32_1 = arith.constant 0 : i32
    %c0_i32_2 = arith.constant 0 : i32
    return %arg0, %c0_i32, %c0_i32_0, %c0_i32_1 : i32, i32, i32, i32
  }
  func.func @transform_7(%arg0: i32) -> (i32, i32, i32) {
    %c0_i32 = arith.constant 0 : i32
    %c0_i32_0 = arith.constant 0 : i32
    %c0_i32_1 = arith.constant 0 : i32
    return %arg0, %c0_i32, %c0_i32_0 : i32, i32, i32
  }
}

module attributes {stable_mosaic.version = 11 : i64} {
  func.func @_conv4x4_kernel(%arg0: i32, %arg1: memref<1x5x5x16xbf16, #tpu.memory_space<vmem>>, %arg2: memref<1x5x5x16xbf16, #tpu.memory_space<vmem>>, %arg3: memref<1x5x5x16xbf16, #tpu.memory_space<vmem>>, %arg4: memref<1x5x5x16xbf16, #tpu.memory_space<vmem>>, %arg5: memref<16x16x32xbf16, #tpu.memory_space<vmem>>, %arg6: memref<1x32xf32, #tpu.memory_space<vmem>>, %arg7: memref<1x4x4x32xbf16, #tpu.memory_space<vmem>>, %arg8: memref<1x2x32xf32, #tpu.memory_space<vmem>>) attributes {dimension_semantics = [#tpu.dimension_semantics<parallel>], iteration_bounds = array<i64: 2>, scalar_prefetch = 0 : i64, scratch_operands = 0 : i64, tpu.core_type = #tpu.core_type<tc>, window_params = [{transform_indices = @transform_0, window_bounds = array<i64: 1, 5, 5, 16>}, {transform_indices = @transform_1, window_bounds = array<i64: 1, 5, 5, 16>}, {transform_indices = @transform_2, window_bounds = array<i64: 1, 5, 5, 16>}, {transform_indices = @transform_3, window_bounds = array<i64: 1, 5, 5, 16>}, {pipeline_mode = #tpu.pipeline_mode<synchronous>, transform_indices = @transform_4, window_bounds = array<i64: 16, 16, 32>}, {pipeline_mode = #tpu.pipeline_mode<synchronous>, transform_indices = @transform_5, window_bounds = array<i64: 1, 32>}, {transform_indices = @transform_6, window_bounds = array<i64: 1, 4, 4, 32>}, {transform_indices = @transform_7, window_bounds = array<i64: 1, 2, 32>}]} {
    %c0 = arith.constant 0 : index
    %c0_0 = arith.constant 0 : index
    %0 = vector.load %arg6[%c0, %c0_0] : memref<1x32xf32, #tpu.memory_space<vmem>>, vector<1x32xf32>
    %cst = arith.constant 0.000000e+00 : f32
    %1 = vector.broadcast %cst : f32 to vector<1x32xf32>
    %c0_i32 = arith.constant 0 : i32
    %c4_i32 = arith.constant 4 : i32
    %2 = arith.addi %c0_i32, %c4_i32 : i32
    %c1_i32 = arith.constant 1 : i32
    %3:2 = scf.for %arg9 = %c0_i32 to %2 step %c1_i32 iter_args(%arg10 = %1, %arg11 = %1) -> (vector<1x32xf32>, vector<1x32xf32>)  : i32 {
      %cst_7 = arith.constant 0.000000e+00 : f32
      %10 = vector.broadcast %cst_7 : f32 to vector<4x32xf32>
      %c0_i32_8 = arith.constant 0 : i32
      %11 = arith.addi %arg9, %c0_i32_8 : i32
      %c0_9 = arith.constant 0 : index
      %12 = arith.index_cast %11 : i32 to index
      %c0_10 = arith.constant 0 : index
      %c0_11 = arith.constant 0 : index
      %13 = vector.load %arg1[%c0_9, %12, %c0_10, %c0_11] : memref<1x5x5x16xbf16, #tpu.memory_space<vmem>>, vector<1x1x4x16xbf16>
      %14 = vector.shape_cast %13 : vector<1x1x4x16xbf16> to vector<4x16xbf16>
      %c0_12 = arith.constant 0 : index
      %c0_13 = arith.constant 0 : index
      %c0_14 = arith.constant 0 : index
      %15 = vector.load %arg5[%c0_12, %c0_13, %c0_14] : memref<16x16x32xbf16, #tpu.memory_space<vmem>>, vector<1x16x32xbf16>
      %16 = vector.shape_cast %15 : vector<1x16x32xbf16> to vector<16x32xbf16>
      %cst_15 = arith.constant dense<0.000000e+00> : vector<4x32xf32>
      %17 = tpu.matmul %14, %16, %cst_15 {dimension_numbers = #tpu.dot_dimension_numbers<[1], [0], [0], [1], [0, 0, 1, 1], [], []>} : vector<4x16xbf16>, vector<16x32xbf16>, vector<4x32xf32> -> vector<4x32xf32>
      %18 = arith.addf %10, %17 : vector<4x32xf32>
      %c0_i32_16 = arith.constant 0 : i32
      %19 = arith.addi %arg9, %c0_i32_16 : i32
      %c0_17 = arith.constant 0 : index
      %20 = arith.index_cast %19 : i32 to index
      %c0_18 = arith.constant 0 : index
      %c0_19 = arith.constant 0 : index
      %21 = vector.load %arg2[%c0_17, %20, %c0_18, %c0_19] : memref<1x5x5x16xbf16, #tpu.memory_space<vmem>>, vector<1x1x4x16xbf16>
      %22 = vector.shape_cast %21 : vector<1x1x4x16xbf16> to vector<4x16xbf16>
      %c1_20 = arith.constant 1 : index
      %c0_21 = arith.constant 0 : index
      %c0_22 = arith.constant 0 : index
      %23 = vector.load %arg5[%c1_20, %c0_21, %c0_22] : memref<16x16x32xbf16, #tpu.memory_space<vmem>>, vector<1x16x32xbf16>
      %24 = vector.shape_cast %23 : vector<1x16x32xbf16> to vector<16x32xbf16>
      %cst_23 = arith.constant dense<0.000000e+00> : vector<4x32xf32>
      %25 = tpu.matmul %22, %24, %cst_23 {dimension_numbers = #tpu.dot_dimension_numbers<[1], [0], [0], [1], [0, 0, 1, 1], [], []>} : vector<4x16xbf16>, vector<16x32xbf16>, vector<4x32xf32> -> vector<4x32xf32>
      %26 = arith.addf %18, %25 : vector<4x32xf32>
      %c0_i32_24 = arith.constant 0 : i32
      %27 = arith.addi %arg9, %c0_i32_24 : i32
      %c0_25 = arith.constant 0 : index
      %28 = arith.index_cast %27 : i32 to index
      %c1_26 = arith.constant 1 : index
      %c0_27 = arith.constant 0 : index
      %29 = vector.load %arg1[%c0_25, %28, %c1_26, %c0_27] : memref<1x5x5x16xbf16, #tpu.memory_space<vmem>>, vector<1x1x4x16xbf16>
      %30 = vector.shape_cast %29 : vector<1x1x4x16xbf16> to vector<4x16xbf16>
      %c2 = arith.constant 2 : index
      %c0_28 = arith.constant 0 : index
      %c0_29 = arith.constant 0 : index
      %31 = vector.load %arg5[%c2, %c0_28, %c0_29] : memref<16x16x32xbf16, #tpu.memory_space<vmem>>, vector<1x16x32xbf16>
      %32 = vector.shape_cast %31 : vector<1x16x32xbf16> to vector<16x32xbf16>
      %cst_30 = arith.constant dense<0.000000e+00> : vector<4x32xf32>
      %33 = tpu.matmul %30, %32, %cst_30 {dimension_numbers = #tpu.dot_dimension_numbers<[1], [0], [0], [1], [0, 0, 1, 1], [], []>} : vector<4x16xbf16>, vector<16x32xbf16>, vector<4x32xf32> -> vector<4x32xf32>
      %34 = arith.addf %26, %33 : vector<4x32xf32>
      %c0_i32_31 = arith.constant 0 : i32
      %35 = arith.addi %arg9, %c0_i32_31 : i32
      %c0_32 = arith.constant 0 : index
      %36 = arith.index_cast %35 : i32 to index
      %c1_33 = arith.constant 1 : index
      %c0_34 = arith.constant 0 : index
      %37 = vector.load %arg2[%c0_32, %36, %c1_33, %c0_34] : memref<1x5x5x16xbf16, #tpu.memory_space<vmem>>, vector<1x1x4x16xbf16>
      %38 = vector.shape_cast %37 : vector<1x1x4x16xbf16> to vector<4x16xbf16>
      %c3 = arith.constant 3 : index
      %c0_35 = arith.constant 0 : index
      %c0_36 = arith.constant 0 : index
      %39 = vector.load %arg5[%c3, %c0_35, %c0_36] : memref<16x16x32xbf16, #tpu.memory_space<vmem>>, vector<1x16x32xbf16>
      %40 = vector.shape_cast %39 : vector<1x16x32xbf16> to vector<16x32xbf16>
      %cst_37 = arith.constant dense<0.000000e+00> : vector<4x32xf32>
      %41 = tpu.matmul %38, %40, %cst_37 {dimension_numbers = #tpu.dot_dimension_numbers<[1], [0], [0], [1], [0, 0, 1, 1], [], []>} : vector<4x16xbf16>, vector<16x32xbf16>, vector<4x32xf32> -> vector<4x32xf32>
      %42 = arith.addf %34, %41 : vector<4x32xf32>
      %c0_i32_38 = arith.constant 0 : i32
      %43 = arith.addi %arg9, %c0_i32_38 : i32
      %c0_39 = arith.constant 0 : index
      %44 = arith.index_cast %43 : i32 to index
      %c0_40 = arith.constant 0 : index
      %c0_41 = arith.constant 0 : index
      %45 = vector.load %arg3[%c0_39, %44, %c0_40, %c0_41] : memref<1x5x5x16xbf16, #tpu.memory_space<vmem>>, vector<1x1x4x16xbf16>
      %46 = vector.shape_cast %45 : vector<1x1x4x16xbf16> to vector<4x16xbf16>
      %c4 = arith.constant 4 : index
      %c0_42 = arith.constant 0 : index
      %c0_43 = arith.constant 0 : index
      %47 = vector.load %arg5[%c4, %c0_42, %c0_43] : memref<16x16x32xbf16, #tpu.memory_space<vmem>>, vector<1x16x32xbf16>
      %48 = vector.shape_cast %47 : vector<1x16x32xbf16> to vector<16x32xbf16>
      %cst_44 = arith.constant dense<0.000000e+00> : vector<4x32xf32>
      %49 = tpu.matmul %46, %48, %cst_44 {dimension_numbers = #tpu.dot_dimension_numbers<[1], [0], [0], [1], [0, 0, 1, 1], [], []>} : vector<4x16xbf16>, vector<16x32xbf16>, vector<4x32xf32> -> vector<4x32xf32>
      %50 = arith.addf %42, %49 : vector<4x32xf32>
      %c0_i32_45 = arith.constant 0 : i32
      %51 = arith.addi %arg9, %c0_i32_45 : i32
      %c0_46 = arith.constant 0 : index
      %52 = arith.index_cast %51 : i32 to index
      %c0_47 = arith.constant 0 : index
      %c0_48 = arith.constant 0 : index
      %53 = vector.load %arg4[%c0_46, %52, %c0_47, %c0_48] : memref<1x5x5x16xbf16, #tpu.memory_space<vmem>>, vector<1x1x4x16xbf16>
      %54 = vector.shape_cast %53 : vector<1x1x4x16xbf16> to vector<4x16xbf16>
      %c5 = arith.constant 5 : index
      %c0_49 = arith.constant 0 : index
      %c0_50 = arith.constant 0 : index
      %55 = vector.load %arg5[%c5, %c0_49, %c0_50] : memref<16x16x32xbf16, #tpu.memory_space<vmem>>, vector<1x16x32xbf16>
      %56 = vector.shape_cast %55 : vector<1x16x32xbf16> to vector<16x32xbf16>
      %cst_51 = arith.constant dense<0.000000e+00> : vector<4x32xf32>
      %57 = tpu.matmul %54, %56, %cst_51 {dimension_numbers = #tpu.dot_dimension_numbers<[1], [0], [0], [1], [0, 0, 1, 1], [], []>} : vector<4x16xbf16>, vector<16x32xbf16>, vector<4x32xf32> -> vector<4x32xf32>
      %58 = arith.addf %50, %57 : vector<4x32xf32>
      %c0_i32_52 = arith.constant 0 : i32
      %59 = arith.addi %arg9, %c0_i32_52 : i32
      %c0_53 = arith.constant 0 : index
      %60 = arith.index_cast %59 : i32 to index
      %c1_54 = arith.constant 1 : index
      %c0_55 = arith.constant 0 : index
      %61 = vector.load %arg3[%c0_53, %60, %c1_54, %c0_55] : memref<1x5x5x16xbf16, #tpu.memory_space<vmem>>, vector<1x1x4x16xbf16>
      %62 = vector.shape_cast %61 : vector<1x1x4x16xbf16> to vector<4x16xbf16>
      %c6 = arith.constant 6 : index
      %c0_56 = arith.constant 0 : index
      %c0_57 = arith.constant 0 : index
      %63 = vector.load %arg5[%c6, %c0_56, %c0_57] : memref<16x16x32xbf16, #tpu.memory_space<vmem>>, vector<1x16x32xbf16>
      %64 = vector.shape_cast %63 : vector<1x16x32xbf16> to vector<16x32xbf16>
      %cst_58 = arith.constant dense<0.000000e+00> : vector<4x32xf32>
      %65 = tpu.matmul %62, %64, %cst_58 {dimension_numbers = #tpu.dot_dimension_numbers<[1], [0], [0], [1], [0, 0, 1, 1], [], []>} : vector<4x16xbf16>, vector<16x32xbf16>, vector<4x32xf32> -> vector<4x32xf32>
      %66 = arith.addf %58, %65 : vector<4x32xf32>
      %c0_i32_59 = arith.constant 0 : i32
      %67 = arith.addi %arg9, %c0_i32_59 : i32
      %c0_60 = arith.constant 0 : index
      %68 = arith.index_cast %67 : i32 to index
      %c1_61 = arith.constant 1 : index
      %c0_62 = arith.constant 0 : index
      %69 = vector.load %arg4[%c0_60, %68, %c1_61, %c0_62] : memref<1x5x5x16xbf16, #tpu.memory_space<vmem>>, vector<1x1x4x16xbf16>
      %70 = vector.shape_cast %69 : vector<1x1x4x16xbf16> to vector<4x16xbf16>
      %c7 = arith.constant 7 : index
      %c0_63 = arith.constant 0 : index
      %c0_64 = arith.constant 0 : index
      %71 = vector.load %arg5[%c7, %c0_63, %c0_64] : memref<16x16x32xbf16, #tpu.memory_space<vmem>>, vector<1x16x32xbf16>
      %72 = vector.shape_cast %71 : vector<1x16x32xbf16> to vector<16x32xbf16>
      %cst_65 = arith.constant dense<0.000000e+00> : vector<4x32xf32>
      %73 = tpu.matmul %70, %72, %cst_65 {dimension_numbers = #tpu.dot_dimension_numbers<[1], [0], [0], [1], [0, 0, 1, 1], [], []>} : vector<4x16xbf16>, vector<16x32xbf16>, vector<4x32xf32> -> vector<4x32xf32>
      %74 = arith.addf %66, %73 : vector<4x32xf32>
      %c1_i32_66 = arith.constant 1 : i32
      %75 = arith.addi %arg9, %c1_i32_66 : i32
      %c0_67 = arith.constant 0 : index
      %76 = arith.index_cast %75 : i32 to index
      %c0_68 = arith.constant 0 : index
      %c0_69 = arith.constant 0 : index
      %77 = vector.load %arg1[%c0_67, %76, %c0_68, %c0_69] : memref<1x5x5x16xbf16, #tpu.memory_space<vmem>>, vector<1x1x4x16xbf16>
      %78 = vector.shape_cast %77 : vector<1x1x4x16xbf16> to vector<4x16xbf16>
      %c8 = arith.constant 8 : index
      %c0_70 = arith.constant 0 : index
      %c0_71 = arith.constant 0 : index
      %79 = vector.load %arg5[%c8, %c0_70, %c0_71] : memref<16x16x32xbf16, #tpu.memory_space<vmem>>, vector<1x16x32xbf16>
      %80 = vector.shape_cast %79 : vector<1x16x32xbf16> to vector<16x32xbf16>
      %cst_72 = arith.constant dense<0.000000e+00> : vector<4x32xf32>
      %81 = tpu.matmul %78, %80, %cst_72 {dimension_numbers = #tpu.dot_dimension_numbers<[1], [0], [0], [1], [0, 0, 1, 1], [], []>} : vector<4x16xbf16>, vector<16x32xbf16>, vector<4x32xf32> -> vector<4x32xf32>
      %82 = arith.addf %74, %81 : vector<4x32xf32>
      %c1_i32_73 = arith.constant 1 : i32
      %83 = arith.addi %arg9, %c1_i32_73 : i32
      %c0_74 = arith.constant 0 : index
      %84 = arith.index_cast %83 : i32 to index
      %c0_75 = arith.constant 0 : index
      %c0_76 = arith.constant 0 : index
      %85 = vector.load %arg2[%c0_74, %84, %c0_75, %c0_76] : memref<1x5x5x16xbf16, #tpu.memory_space<vmem>>, vector<1x1x4x16xbf16>
      %86 = vector.shape_cast %85 : vector<1x1x4x16xbf16> to vector<4x16xbf16>
      %c9 = arith.constant 9 : index
      %c0_77 = arith.constant 0 : index
      %c0_78 = arith.constant 0 : index
      %87 = vector.load %arg5[%c9, %c0_77, %c0_78] : memref<16x16x32xbf16, #tpu.memory_space<vmem>>, vector<1x16x32xbf16>
      %88 = vector.shape_cast %87 : vector<1x16x32xbf16> to vector<16x32xbf16>
      %cst_79 = arith.constant dense<0.000000e+00> : vector<4x32xf32>
      %89 = tpu.matmul %86, %88, %cst_79 {dimension_numbers = #tpu.dot_dimension_numbers<[1], [0], [0], [1], [0, 0, 1, 1], [], []>} : vector<4x16xbf16>, vector<16x32xbf16>, vector<4x32xf32> -> vector<4x32xf32>
      %90 = arith.addf %82, %89 : vector<4x32xf32>
      %c1_i32_80 = arith.constant 1 : i32
      %91 = arith.addi %arg9, %c1_i32_80 : i32
      %c0_81 = arith.constant 0 : index
      %92 = arith.index_cast %91 : i32 to index
      %c1_82 = arith.constant 1 : index
      %c0_83 = arith.constant 0 : index
      %93 = vector.load %arg1[%c0_81, %92, %c1_82, %c0_83] : memref<1x5x5x16xbf16, #tpu.memory_space<vmem>>, vector<1x1x4x16xbf16>
      %94 = vector.shape_cast %93 : vector<1x1x4x16xbf16> to vector<4x16xbf16>
      %c10 = arith.constant 10 : index
      %c0_84 = arith.constant 0 : index
      %c0_85 = arith.constant 0 : index
      %95 = vector.load %arg5[%c10, %c0_84, %c0_85] : memref<16x16x32xbf16, #tpu.memory_space<vmem>>, vector<1x16x32xbf16>
      %96 = vector.shape_cast %95 : vector<1x16x32xbf16> to vector<16x32xbf16>
      %cst_86 = arith.constant dense<0.000000e+00> : vector<4x32xf32>
      %97 = tpu.matmul %94, %96, %cst_86 {dimension_numbers = #tpu.dot_dimension_numbers<[1], [0], [0], [1], [0, 0, 1, 1], [], []>} : vector<4x16xbf16>, vector<16x32xbf16>, vector<4x32xf32> -> vector<4x32xf32>
      %98 = arith.addf %90, %97 : vector<4x32xf32>
      %c1_i32_87 = arith.constant 1 : i32
      %99 = arith.addi %arg9, %c1_i32_87 : i32
      %c0_88 = arith.constant 0 : index
      %100 = arith.index_cast %99 : i32 to index
      %c1_89 = arith.constant 1 : index
      %c0_90 = arith.constant 0 : index
      %101 = vector.load %arg2[%c0_88, %100, %c1_89, %c0_90] : memref<1x5x5x16xbf16, #tpu.memory_space<vmem>>, vector<1x1x4x16xbf16>
      %102 = vector.shape_cast %101 : vector<1x1x4x16xbf16> to vector<4x16xbf16>
      %c11 = arith.constant 11 : index
      %c0_91 = arith.constant 0 : index
      %c0_92 = arith.constant 0 : index
      %103 = vector.load %arg5[%c11, %c0_91, %c0_92] : memref<16x16x32xbf16, #tpu.memory_space<vmem>>, vector<1x16x32xbf16>
      %104 = vector.shape_cast %103 : vector<1x16x32xbf16> to vector<16x32xbf16>
      %cst_93 = arith.constant dense<0.000000e+00> : vector<4x32xf32>
      %105 = tpu.matmul %102, %104, %cst_93 {dimension_numbers = #tpu.dot_dimension_numbers<[1], [0], [0], [1], [0, 0, 1, 1], [], []>} : vector<4x16xbf16>, vector<16x32xbf16>, vector<4x32xf32> -> vector<4x32xf32>
      %106 = arith.addf %98, %105 : vector<4x32xf32>
      %c1_i32_94 = arith.constant 1 : i32
      %107 = arith.addi %arg9, %c1_i32_94 : i32
      %c0_95 = arith.constant 0 : index
      %108 = arith.index_cast %107 : i32 to index
      %c0_96 = arith.constant 0 : index
      %c0_97 = arith.constant 0 : index
      %109 = vector.load %arg3[%c0_95, %108, %c0_96, %c0_97] : memref<1x5x5x16xbf16, #tpu.memory_space<vmem>>, vector<1x1x4x16xbf16>
      %110 = vector.shape_cast %109 : vector<1x1x4x16xbf16> to vector<4x16xbf16>
      %c12 = arith.constant 12 : index
      %c0_98 = arith.constant 0 : index
      %c0_99 = arith.constant 0 : index
      %111 = vector.load %arg5[%c12, %c0_98, %c0_99] : memref<16x16x32xbf16, #tpu.memory_space<vmem>>, vector<1x16x32xbf16>
      %112 = vector.shape_cast %111 : vector<1x16x32xbf16> to vector<16x32xbf16>
      %cst_100 = arith.constant dense<0.000000e+00> : vector<4x32xf32>
      %113 = tpu.matmul %110, %112, %cst_100 {dimension_numbers = #tpu.dot_dimension_numbers<[1], [0], [0], [1], [0, 0, 1, 1], [], []>} : vector<4x16xbf16>, vector<16x32xbf16>, vector<4x32xf32> -> vector<4x32xf32>
      %114 = arith.addf %106, %113 : vector<4x32xf32>
      %c1_i32_101 = arith.constant 1 : i32
      %115 = arith.addi %arg9, %c1_i32_101 : i32
      %c0_102 = arith.constant 0 : index
      %116 = arith.index_cast %115 : i32 to index
      %c0_103 = arith.constant 0 : index
      %c0_104 = arith.constant 0 : index
      %117 = vector.load %arg4[%c0_102, %116, %c0_103, %c0_104] : memref<1x5x5x16xbf16, #tpu.memory_space<vmem>>, vector<1x1x4x16xbf16>
      %118 = vector.shape_cast %117 : vector<1x1x4x16xbf16> to vector<4x16xbf16>
      %c13 = arith.constant 13 : index
      %c0_105 = arith.constant 0 : index
      %c0_106 = arith.constant 0 : index
      %119 = vector.load %arg5[%c13, %c0_105, %c0_106] : memref<16x16x32xbf16, #tpu.memory_space<vmem>>, vector<1x16x32xbf16>
      %120 = vector.shape_cast %119 : vector<1x16x32xbf16> to vector<16x32xbf16>
      %cst_107 = arith.constant dense<0.000000e+00> : vector<4x32xf32>
      %121 = tpu.matmul %118, %120, %cst_107 {dimension_numbers = #tpu.dot_dimension_numbers<[1], [0], [0], [1], [0, 0, 1, 1], [], []>} : vector<4x16xbf16>, vector<16x32xbf16>, vector<4x32xf32> -> vector<4x32xf32>
      %122 = arith.addf %114, %121 : vector<4x32xf32>
      %c1_i32_108 = arith.constant 1 : i32
      %123 = arith.addi %arg9, %c1_i32_108 : i32
      %c0_109 = arith.constant 0 : index
      %124 = arith.index_cast %123 : i32 to index
      %c1_110 = arith.constant 1 : index
      %c0_111 = arith.constant 0 : index
      %125 = vector.load %arg3[%c0_109, %124, %c1_110, %c0_111] : memref<1x5x5x16xbf16, #tpu.memory_space<vmem>>, vector<1x1x4x16xbf16>
      %126 = vector.shape_cast %125 : vector<1x1x4x16xbf16> to vector<4x16xbf16>
      %c14 = arith.constant 14 : index
      %c0_112 = arith.constant 0 : index
      %c0_113 = arith.constant 0 : index
      %127 = vector.load %arg5[%c14, %c0_112, %c0_113] : memref<16x16x32xbf16, #tpu.memory_space<vmem>>, vector<1x16x32xbf16>
      %128 = vector.shape_cast %127 : vector<1x16x32xbf16> to vector<16x32xbf16>
      %cst_114 = arith.constant dense<0.000000e+00> : vector<4x32xf32>
      %129 = tpu.matmul %126, %128, %cst_114 {dimension_numbers = #tpu.dot_dimension_numbers<[1], [0], [0], [1], [0, 0, 1, 1], [], []>} : vector<4x16xbf16>, vector<16x32xbf16>, vector<4x32xf32> -> vector<4x32xf32>
      %130 = arith.addf %122, %129 : vector<4x32xf32>
      %c1_i32_115 = arith.constant 1 : i32
      %131 = arith.addi %arg9, %c1_i32_115 : i32
      %c0_116 = arith.constant 0 : index
      %132 = arith.index_cast %131 : i32 to index
      %c1_117 = arith.constant 1 : index
      %c0_118 = arith.constant 0 : index
      %133 = vector.load %arg4[%c0_116, %132, %c1_117, %c0_118] : memref<1x5x5x16xbf16, #tpu.memory_space<vmem>>, vector<1x1x4x16xbf16>
      %134 = vector.shape_cast %133 : vector<1x1x4x16xbf16> to vector<4x16xbf16>
      %c15 = arith.constant 15 : index
      %c0_119 = arith.constant 0 : index
      %c0_120 = arith.constant 0 : index
      %135 = vector.load %arg5[%c15, %c0_119, %c0_120] : memref<16x16x32xbf16, #tpu.memory_space<vmem>>, vector<1x16x32xbf16>
      %136 = vector.shape_cast %135 : vector<1x16x32xbf16> to vector<16x32xbf16>
      %cst_121 = arith.constant dense<0.000000e+00> : vector<4x32xf32>
      %137 = tpu.matmul %134, %136, %cst_121 {dimension_numbers = #tpu.dot_dimension_numbers<[1], [0], [0], [1], [0, 0, 1, 1], [], []>} : vector<4x16xbf16>, vector<16x32xbf16>, vector<4x32xf32> -> vector<4x32xf32>
      %138 = arith.addf %130, %137 : vector<4x32xf32>
      %139 = vector.broadcast %0 : vector<1x32xf32> to vector<4x32xf32>
      %140 = arith.addf %138, %139 : vector<4x32xf32>
      %141 = arith.truncf %140 : vector<4x32xf32> to vector<4x32xbf16>
      %c0_122 = arith.constant 0 : index
      %142 = arith.index_cast %arg9 : i32 to index
      %c0_123 = arith.constant 0 : index
      %c0_124 = arith.constant 0 : index
      %143 = vector.load %arg7[%c0_122, %142, %c0_123, %c0_124] : memref<1x4x4x32xbf16, #tpu.memory_space<vmem>>, vector<1x1x4x32xbf16>
      %144 = vector.shape_cast %143 : vector<1x1x4x32xbf16> to vector<4x32xbf16>
      %145 = vector.shape_cast %141 : vector<4x32xbf16> to vector<1x1x4x32xbf16>
      tpu.vector_store %arg7[%c0_122, %142, %c0_123, %c0_124], %145 {strides = array<i32>} : memref<1x4x4x32xbf16, #tpu.memory_space<vmem>>, vector<1x1x4x32xbf16>,
      %cst_125 = arith.constant dense<0.000000e+00> : vector<32xf32>
      %146 = vector.multi_reduction <add>, %140, %cst_125 [0] : vector<4x32xf32> to vector<32xf32>
      %147 = vector.shape_cast %146 : vector<32xf32> to vector<1x32xf32>
      %148 = arith.addf %arg10, %147 : vector<1x32xf32>
      %149 = arith.mulf %140, %140 : vector<4x32xf32>
      %cst_126 = arith.constant dense<0.000000e+00> : vector<32xf32>
      %150 = vector.multi_reduction <add>, %149, %cst_126 [0] : vector<4x32xf32> to vector<32xf32>
      %151 = vector.shape_cast %150 : vector<32xf32> to vector<1x32xf32>
      %152 = arith.addf %arg11, %151 : vector<1x32xf32>
      scf.yield %148, %152 : vector<1x32xf32>, vector<1x32xf32>
    }
    %c4_i32_1 = arith.constant 4 : i32
    %c0_2 = arith.constant 0 : index
    %c0_3 = arith.constant 0 : index
    %c0_4 = arith.constant 0 : index
    %4 = vector.load %arg8[%c0_2, %c0_3, %c0_4] : memref<1x2x32xf32, #tpu.memory_space<vmem>>, vector<1x1x32xf32>
    %5 = vector.shape_cast %4 : vector<1x1x32xf32> to vector<1x32xf32>
    %6 = vector.shape_cast %3#0 : vector<1x32xf32> to vector<1x1x32xf32>
    tpu.vector_store %arg8[%c0_2, %c0_3, %c0_4], %6 {strides = array<i32>} : memref<1x2x32xf32, #tpu.memory_space<vmem>>, vector<1x1x32xf32>,
    %c0_5 = arith.constant 0 : index
    %c1 = arith.constant 1 : index
    %c0_6 = arith.constant 0 : index
    %7 = vector.load %arg8[%c0_5, %c1, %c0_6] : memref<1x2x32xf32, #tpu.memory_space<vmem>>, vector<1x1x32xf32>
    %8 = vector.shape_cast %7 : vector<1x1x32xf32> to vector<1x32xf32>
    %9 = vector.shape_cast %3#1 : vector<1x32xf32> to vector<1x1x32xf32>
    tpu.vector_store %arg8[%c0_5, %c1, %c0_6], %9 {strides = array<i32>} : memref<1x2x32xf32, #tpu.memory_space<vmem>>, vector<1x1x32xf32>,
    return
  }
  func.func @transform_0(%arg0: i32) -> (i32, i32, i32, i32) {
    %c0_i32 = arith.constant 0 : i32
    %c0_i32_0 = arith.constant 0 : i32
    %c0_i32_1 = arith.constant 0 : i32
    %c0_i32_2 = arith.constant 0 : i32
    return %arg0, %c0_i32, %c0_i32_0, %c0_i32_1 : i32, i32, i32, i32
  }
  func.func @transform_1(%arg0: i32) -> (i32, i32, i32, i32) {
    %c0_i32 = arith.constant 0 : i32
    %c0_i32_0 = arith.constant 0 : i32
    %c0_i32_1 = arith.constant 0 : i32
    %c0_i32_2 = arith.constant 0 : i32
    return %arg0, %c0_i32, %c0_i32_0, %c0_i32_1 : i32, i32, i32, i32
  }
  func.func @transform_2(%arg0: i32) -> (i32, i32, i32, i32) {
    %c0_i32 = arith.constant 0 : i32
    %c0_i32_0 = arith.constant 0 : i32
    %c0_i32_1 = arith.constant 0 : i32
    %c0_i32_2 = arith.constant 0 : i32
    return %arg0, %c0_i32, %c0_i32_0, %c0_i32_1 : i32, i32, i32, i32
  }
  func.func @transform_3(%arg0: i32) -> (i32, i32, i32, i32) {
    %c0_i32 = arith.constant 0 : i32
    %c0_i32_0 = arith.constant 0 : i32
    %c0_i32_1 = arith.constant 0 : i32
    %c0_i32_2 = arith.constant 0 : i32
    return %arg0, %c0_i32, %c0_i32_0, %c0_i32_1 : i32, i32, i32, i32
  }
  func.func @transform_4(%arg0: i32) -> (i32, i32, i32) {
    %c0_i32 = arith.constant 0 : i32
    %c0_i32_0 = arith.constant 0 : i32
    %c0_i32_1 = arith.constant 0 : i32
    %c0_i32_2 = arith.constant 0 : i32
    return %c0_i32, %c0_i32_0, %c0_i32_1 : i32, i32, i32
  }
  func.func @transform_5(%arg0: i32) -> (i32, i32) {
    %c0_i32 = arith.constant 0 : i32
    %c0_i32_0 = arith.constant 0 : i32
    %c0_i32_1 = arith.constant 0 : i32
    return %c0_i32, %c0_i32_0 : i32, i32
  }
  func.func @transform_6(%arg0: i32) -> (i32, i32, i32, i32) {
    %c0_i32 = arith.constant 0 : i32
    %c0_i32_0 = arith.constant 0 : i32
    %c0_i32_1 = arith.constant 0 : i32
    %c0_i32_2 = arith.constant 0 : i32
    return %arg0, %c0_i32, %c0_i32_0, %c0_i32_1 : i32, i32, i32, i32
  }
  func.func @transform_7(%arg0: i32) -> (i32, i32, i32) {
    %c0_i32 = arith.constant 0 : i32
    %c0_i32_0 = arith.constant 0 : i32
    %c0_i32_1 = arith.constant 0 : i32
    return %arg0, %c0_i32, %c0_i32_0 : i32, i32, i32
  }
}

module attributes {stable_mosaic.version = 11 : i64} {
  func.func @_conv4x4_kernel(%arg0: i32, %arg1: memref<1x6x6x32xbf16, #tpu.memory_space<vmem>>, %arg2: memref<16x32x64xbf16, #tpu.memory_space<vmem>>, %arg3: memref<1x64xf32, #tpu.memory_space<vmem>>, %arg4: memref<1x3x3x64xbf16, #tpu.memory_space<vmem>>, %arg5: memref<1x2x64xf32, #tpu.memory_space<vmem>>) attributes {dimension_semantics = [#tpu.dimension_semantics<parallel>], iteration_bounds = array<i64: 2>, scalar_prefetch = 0 : i64, scratch_operands = 0 : i64, tpu.core_type = #tpu.core_type<tc>, window_params = [{transform_indices = @transform_0, window_bounds = array<i64: 1, 6, 6, 32>}, {pipeline_mode = #tpu.pipeline_mode<synchronous>, transform_indices = @transform_1, window_bounds = array<i64: 16, 32, 64>}, {pipeline_mode = #tpu.pipeline_mode<synchronous>, transform_indices = @transform_2, window_bounds = array<i64: 1, 64>}, {transform_indices = @transform_3, window_bounds = array<i64: 1, 3, 3, 64>}, {transform_indices = @transform_4, window_bounds = array<i64: 1, 2, 64>}]} {
    %c0 = arith.constant 0 : index
    %c0_0 = arith.constant 0 : index
    %0 = vector.load %arg3[%c0, %c0_0] : memref<1x64xf32, #tpu.memory_space<vmem>>, vector<1x64xf32>
    %cst = arith.constant 0.000000e+00 : f32
    %1 = vector.broadcast %cst : f32 to vector<1x64xf32>
    %c0_i32 = arith.constant 0 : i32
    %c3_i32 = arith.constant 3 : i32
    %2 = arith.addi %c0_i32, %c3_i32 : i32
    %c1_i32 = arith.constant 1 : i32
    %3:2 = scf.for %arg6 = %c0_i32 to %2 step %c1_i32 iter_args(%arg7 = %1, %arg8 = %1) -> (vector<1x64xf32>, vector<1x64xf32>)  : i32 {
      %cst_7 = arith.constant 0.000000e+00 : f32
      %10 = vector.broadcast %cst_7 : f32 to vector<3x64xf32>
      %c0_i32_8 = arith.constant 0 : i32
      %11 = arith.addi %arg6, %c0_i32_8 : i32
      %c0_9 = arith.constant 0 : index
      %12 = arith.index_cast %11 : i32 to index
      %c0_10 = arith.constant 0 : index
      %c0_11 = arith.constant 0 : index
      %13 = vector.load %arg1[%c0_9, %12, %c0_10, %c0_11] : memref<1x6x6x32xbf16, #tpu.memory_space<vmem>>, vector<1x1x3x32xbf16>
      %14 = vector.shape_cast %13 : vector<1x1x3x32xbf16> to vector<3x32xbf16>
      %c0_12 = arith.constant 0 : index
      %c0_13 = arith.constant 0 : index
      %c0_14 = arith.constant 0 : index
      %15 = vector.load %arg2[%c0_12, %c0_13, %c0_14] : memref<16x32x64xbf16, #tpu.memory_space<vmem>>, vector<1x32x64xbf16>
      %16 = vector.shape_cast %15 : vector<1x32x64xbf16> to vector<32x64xbf16>
      %cst_15 = arith.constant dense<0.000000e+00> : vector<3x64xf32>
      %17 = tpu.matmul %14, %16, %cst_15 {dimension_numbers = #tpu.dot_dimension_numbers<[1], [0], [0], [1], [0, 0, 1, 1], [], []>} : vector<3x32xbf16>, vector<32x64xbf16>, vector<3x64xf32> -> vector<3x64xf32>
      %18 = arith.addf %10, %17 : vector<3x64xf32>
      %c0_i32_16 = arith.constant 0 : i32
      %19 = arith.addi %arg6, %c0_i32_16 : i32
      %c0_17 = arith.constant 0 : index
      %20 = arith.index_cast %19 : i32 to index
      %c1_18 = arith.constant 1 : index
      %c0_19 = arith.constant 0 : index
      %21 = vector.load %arg1[%c0_17, %20, %c1_18, %c0_19] : memref<1x6x6x32xbf16, #tpu.memory_space<vmem>>, vector<1x1x3x32xbf16>
      %22 = vector.shape_cast %21 : vector<1x1x3x32xbf16> to vector<3x32xbf16>
      %c1_20 = arith.constant 1 : index
      %c0_21 = arith.constant 0 : index
      %c0_22 = arith.constant 0 : index
      %23 = vector.load %arg2[%c1_20, %c0_21, %c0_22] : memref<16x32x64xbf16, #tpu.memory_space<vmem>>, vector<1x32x64xbf16>
      %24 = vector.shape_cast %23 : vector<1x32x64xbf16> to vector<32x64xbf16>
      %cst_23 = arith.constant dense<0.000000e+00> : vector<3x64xf32>
      %25 = tpu.matmul %22, %24, %cst_23 {dimension_numbers = #tpu.dot_dimension_numbers<[1], [0], [0], [1], [0, 0, 1, 1], [], []>} : vector<3x32xbf16>, vector<32x64xbf16>, vector<3x64xf32> -> vector<3x64xf32>
      %26 = arith.addf %18, %25 : vector<3x64xf32>
      %c0_i32_24 = arith.constant 0 : i32
      %27 = arith.addi %arg6, %c0_i32_24 : i32
      %c0_25 = arith.constant 0 : index
      %28 = arith.index_cast %27 : i32 to index
      %c2 = arith.constant 2 : index
      %c0_26 = arith.constant 0 : index
      %29 = vector.load %arg1[%c0_25, %28, %c2, %c0_26] : memref<1x6x6x32xbf16, #tpu.memory_space<vmem>>, vector<1x1x3x32xbf16>
      %30 = vector.shape_cast %29 : vector<1x1x3x32xbf16> to vector<3x32xbf16>
      %c2_27 = arith.constant 2 : index
      %c0_28 = arith.constant 0 : index
      %c0_29 = arith.constant 0 : index
      %31 = vector.load %arg2[%c2_27, %c0_28, %c0_29] : memref<16x32x64xbf16, #tpu.memory_space<vmem>>, vector<1x32x64xbf16>
      %32 = vector.shape_cast %31 : vector<1x32x64xbf16> to vector<32x64xbf16>
      %cst_30 = arith.constant dense<0.000000e+00> : vector<3x64xf32>
      %33 = tpu.matmul %30, %32, %cst_30 {dimension_numbers = #tpu.dot_dimension_numbers<[1], [0], [0], [1], [0, 0, 1, 1], [], []>} : vector<3x32xbf16>, vector<32x64xbf16>, vector<3x64xf32> -> vector<3x64xf32>
      %34 = arith.addf %26, %33 : vector<3x64xf32>
      %c0_i32_31 = arith.constant 0 : i32
      %35 = arith.addi %arg6, %c0_i32_31 : i32
      %c0_32 = arith.constant 0 : index
      %36 = arith.index_cast %35 : i32 to index
      %c3 = arith.constant 3 : index
      %c0_33 = arith.constant 0 : index
      %37 = vector.load %arg1[%c0_32, %36, %c3, %c0_33] : memref<1x6x6x32xbf16, #tpu.memory_space<vmem>>, vector<1x1x3x32xbf16>
      %38 = vector.shape_cast %37 : vector<1x1x3x32xbf16> to vector<3x32xbf16>
      %c3_34 = arith.constant 3 : index
      %c0_35 = arith.constant 0 : index
      %c0_36 = arith.constant 0 : index
      %39 = vector.load %arg2[%c3_34, %c0_35, %c0_36] : memref<16x32x64xbf16, #tpu.memory_space<vmem>>, vector<1x32x64xbf16>
      %40 = vector.shape_cast %39 : vector<1x32x64xbf16> to vector<32x64xbf16>
      %cst_37 = arith.constant dense<0.000000e+00> : vector<3x64xf32>
      %41 = tpu.matmul %38, %40, %cst_37 {dimension_numbers = #tpu.dot_dimension_numbers<[1], [0], [0], [1], [0, 0, 1, 1], [], []>} : vector<3x32xbf16>, vector<32x64xbf16>, vector<3x64xf32> -> vector<3x64xf32>
      %42 = arith.addf %34, %41 : vector<3x64xf32>
      %c1_i32_38 = arith.constant 1 : i32
      %43 = arith.addi %arg6, %c1_i32_38 : i32
      %c0_39 = arith.constant 0 : index
      %44 = arith.index_cast %43 : i32 to index
      %c0_40 = arith.constant 0 : index
      %c0_41 = arith.constant 0 : index
      %45 = vector.load %arg1[%c0_39, %44, %c0_40, %c0_41] : memref<1x6x6x32xbf16, #tpu.memory_space<vmem>>, vector<1x1x3x32xbf16>
      %46 = vector.shape_cast %45 : vector<1x1x3x32xbf16> to vector<3x32xbf16>
      %c4 = arith.constant 4 : index
      %c0_42 = arith.constant 0 : index
      %c0_43 = arith.constant 0 : index
      %47 = vector.load %arg2[%c4, %c0_42, %c0_43] : memref<16x32x64xbf16, #tpu.memory_space<vmem>>, vector<1x32x64xbf16>
      %48 = vector.shape_cast %47 : vector<1x32x64xbf16> to vector<32x64xbf16>
      %cst_44 = arith.constant dense<0.000000e+00> : vector<3x64xf32>
      %49 = tpu.matmul %46, %48, %cst_44 {dimension_numbers = #tpu.dot_dimension_numbers<[1], [0], [0], [1], [0, 0, 1, 1], [], []>} : vector<3x32xbf16>, vector<32x64xbf16>, vector<3x64xf32> -> vector<3x64xf32>
      %50 = arith.addf %42, %49 : vector<3x64xf32>
      %c1_i32_45 = arith.constant 1 : i32
      %51 = arith.addi %arg6, %c1_i32_45 : i32
      %c0_46 = arith.constant 0 : index
      %52 = arith.index_cast %51 : i32 to index
      %c1_47 = arith.constant 1 : index
      %c0_48 = arith.constant 0 : index
      %53 = vector.load %arg1[%c0_46, %52, %c1_47, %c0_48] : memref<1x6x6x32xbf16, #tpu.memory_space<vmem>>, vector<1x1x3x32xbf16>
      %54 = vector.shape_cast %53 : vector<1x1x3x32xbf16> to vector<3x32xbf16>
      %c5 = arith.constant 5 : index
      %c0_49 = arith.constant 0 : index
      %c0_50 = arith.constant 0 : index
      %55 = vector.load %arg2[%c5, %c0_49, %c0_50] : memref<16x32x64xbf16, #tpu.memory_space<vmem>>, vector<1x32x64xbf16>
      %56 = vector.shape_cast %55 : vector<1x32x64xbf16> to vector<32x64xbf16>
      %cst_51 = arith.constant dense<0.000000e+00> : vector<3x64xf32>
      %57 = tpu.matmul %54, %56, %cst_51 {dimension_numbers = #tpu.dot_dimension_numbers<[1], [0], [0], [1], [0, 0, 1, 1], [], []>} : vector<3x32xbf16>, vector<32x64xbf16>, vector<3x64xf32> -> vector<3x64xf32>
      %58 = arith.addf %50, %57 : vector<3x64xf32>
      %c1_i32_52 = arith.constant 1 : i32
      %59 = arith.addi %arg6, %c1_i32_52 : i32
      %c0_53 = arith.constant 0 : index
      %60 = arith.index_cast %59 : i32 to index
      %c2_54 = arith.constant 2 : index
      %c0_55 = arith.constant 0 : index
      %61 = vector.load %arg1[%c0_53, %60, %c2_54, %c0_55] : memref<1x6x6x32xbf16, #tpu.memory_space<vmem>>, vector<1x1x3x32xbf16>
      %62 = vector.shape_cast %61 : vector<1x1x3x32xbf16> to vector<3x32xbf16>
      %c6 = arith.constant 6 : index
      %c0_56 = arith.constant 0 : index
      %c0_57 = arith.constant 0 : index
      %63 = vector.load %arg2[%c6, %c0_56, %c0_57] : memref<16x32x64xbf16, #tpu.memory_space<vmem>>, vector<1x32x64xbf16>
      %64 = vector.shape_cast %63 : vector<1x32x64xbf16> to vector<32x64xbf16>
      %cst_58 = arith.constant dense<0.000000e+00> : vector<3x64xf32>
      %65 = tpu.matmul %62, %64, %cst_58 {dimension_numbers = #tpu.dot_dimension_numbers<[1], [0], [0], [1], [0, 0, 1, 1], [], []>} : vector<3x32xbf16>, vector<32x64xbf16>, vector<3x64xf32> -> vector<3x64xf32>
      %66 = arith.addf %58, %65 : vector<3x64xf32>
      %c1_i32_59 = arith.constant 1 : i32
      %67 = arith.addi %arg6, %c1_i32_59 : i32
      %c0_60 = arith.constant 0 : index
      %68 = arith.index_cast %67 : i32 to index
      %c3_61 = arith.constant 3 : index
      %c0_62 = arith.constant 0 : index
      %69 = vector.load %arg1[%c0_60, %68, %c3_61, %c0_62] : memref<1x6x6x32xbf16, #tpu.memory_space<vmem>>, vector<1x1x3x32xbf16>
      %70 = vector.shape_cast %69 : vector<1x1x3x32xbf16> to vector<3x32xbf16>
      %c7 = arith.constant 7 : index
      %c0_63 = arith.constant 0 : index
      %c0_64 = arith.constant 0 : index
      %71 = vector.load %arg2[%c7, %c0_63, %c0_64] : memref<16x32x64xbf16, #tpu.memory_space<vmem>>, vector<1x32x64xbf16>
      %72 = vector.shape_cast %71 : vector<1x32x64xbf16> to vector<32x64xbf16>
      %cst_65 = arith.constant dense<0.000000e+00> : vector<3x64xf32>
      %73 = tpu.matmul %70, %72, %cst_65 {dimension_numbers = #tpu.dot_dimension_numbers<[1], [0], [0], [1], [0, 0, 1, 1], [], []>} : vector<3x32xbf16>, vector<32x64xbf16>, vector<3x64xf32> -> vector<3x64xf32>
      %74 = arith.addf %66, %73 : vector<3x64xf32>
      %c2_i32 = arith.constant 2 : i32
      %75 = arith.addi %arg6, %c2_i32 : i32
      %c0_66 = arith.constant 0 : index
      %76 = arith.index_cast %75 : i32 to index
      %c0_67 = arith.constant 0 : index
      %c0_68 = arith.constant 0 : index
      %77 = vector.load %arg1[%c0_66, %76, %c0_67, %c0_68] : memref<1x6x6x32xbf16, #tpu.memory_space<vmem>>, vector<1x1x3x32xbf16>
      %78 = vector.shape_cast %77 : vector<1x1x3x32xbf16> to vector<3x32xbf16>
      %c8 = arith.constant 8 : index
      %c0_69 = arith.constant 0 : index
      %c0_70 = arith.constant 0 : index
      %79 = vector.load %arg2[%c8, %c0_69, %c0_70] : memref<16x32x64xbf16, #tpu.memory_space<vmem>>, vector<1x32x64xbf16>
      %80 = vector.shape_cast %79 : vector<1x32x64xbf16> to vector<32x64xbf16>
      %cst_71 = arith.constant dense<0.000000e+00> : vector<3x64xf32>
      %81 = tpu.matmul %78, %80, %cst_71 {dimension_numbers = #tpu.dot_dimension_numbers<[1], [0], [0], [1], [0, 0, 1, 1], [], []>} : vector<3x32xbf16>, vector<32x64xbf16>, vector<3x64xf32> -> vector<3x64xf32>
      %82 = arith.addf %74, %81 : vector<3x64xf32>
      %c2_i32_72 = arith.constant 2 : i32
      %83 = arith.addi %arg6, %c2_i32_72 : i32
      %c0_73 = arith.constant 0 : index
      %84 = arith.index_cast %83 : i32 to index
      %c1_74 = arith.constant 1 : index
      %c0_75 = arith.constant 0 : index
      %85 = vector.load %arg1[%c0_73, %84, %c1_74, %c0_75] : memref<1x6x6x32xbf16, #tpu.memory_space<vmem>>, vector<1x1x3x32xbf16>
      %86 = vector.shape_cast %85 : vector<1x1x3x32xbf16> to vector<3x32xbf16>
      %c9 = arith.constant 9 : index
      %c0_76 = arith.constant 0 : index
      %c0_77 = arith.constant 0 : index
      %87 = vector.load %arg2[%c9, %c0_76, %c0_77] : memref<16x32x64xbf16, #tpu.memory_space<vmem>>, vector<1x32x64xbf16>
      %88 = vector.shape_cast %87 : vector<1x32x64xbf16> to vector<32x64xbf16>
      %cst_78 = arith.constant dense<0.000000e+00> : vector<3x64xf32>
      %89 = tpu.matmul %86, %88, %cst_78 {dimension_numbers = #tpu.dot_dimension_numbers<[1], [0], [0], [1], [0, 0, 1, 1], [], []>} : vector<3x32xbf16>, vector<32x64xbf16>, vector<3x64xf32> -> vector<3x64xf32>
      %90 = arith.addf %82, %89 : vector<3x64xf32>
      %c2_i32_79 = arith.constant 2 : i32
      %91 = arith.addi %arg6, %c2_i32_79 : i32
      %c0_80 = arith.constant 0 : index
      %92 = arith.index_cast %91 : i32 to index
      %c2_81 = arith.constant 2 : index
      %c0_82 = arith.constant 0 : index
      %93 = vector.load %arg1[%c0_80, %92, %c2_81, %c0_82] : memref<1x6x6x32xbf16, #tpu.memory_space<vmem>>, vector<1x1x3x32xbf16>
      %94 = vector.shape_cast %93 : vector<1x1x3x32xbf16> to vector<3x32xbf16>
      %c10 = arith.constant 10 : index
      %c0_83 = arith.constant 0 : index
      %c0_84 = arith.constant 0 : index
      %95 = vector.load %arg2[%c10, %c0_83, %c0_84] : memref<16x32x64xbf16, #tpu.memory_space<vmem>>, vector<1x32x64xbf16>
      %96 = vector.shape_cast %95 : vector<1x32x64xbf16> to vector<32x64xbf16>
      %cst_85 = arith.constant dense<0.000000e+00> : vector<3x64xf32>
      %97 = tpu.matmul %94, %96, %cst_85 {dimension_numbers = #tpu.dot_dimension_numbers<[1], [0], [0], [1], [0, 0, 1, 1], [], []>} : vector<3x32xbf16>, vector<32x64xbf16>, vector<3x64xf32> -> vector<3x64xf32>
      %98 = arith.addf %90, %97 : vector<3x64xf32>
      %c2_i32_86 = arith.constant 2 : i32
      %99 = arith.addi %arg6, %c2_i32_86 : i32
      %c0_87 = arith.constant 0 : index
      %100 = arith.index_cast %99 : i32 to index
      %c3_88 = arith.constant 3 : index
      %c0_89 = arith.constant 0 : index
      %101 = vector.load %arg1[%c0_87, %100, %c3_88, %c0_89] : memref<1x6x6x32xbf16, #tpu.memory_space<vmem>>, vector<1x1x3x32xbf16>
      %102 = vector.shape_cast %101 : vector<1x1x3x32xbf16> to vector<3x32xbf16>
      %c11 = arith.constant 11 : index
      %c0_90 = arith.constant 0 : index
      %c0_91 = arith.constant 0 : index
      %103 = vector.load %arg2[%c11, %c0_90, %c0_91] : memref<16x32x64xbf16, #tpu.memory_space<vmem>>, vector<1x32x64xbf16>
      %104 = vector.shape_cast %103 : vector<1x32x64xbf16> to vector<32x64xbf16>
      %cst_92 = arith.constant dense<0.000000e+00> : vector<3x64xf32>
      %105 = tpu.matmul %102, %104, %cst_92 {dimension_numbers = #tpu.dot_dimension_numbers<[1], [0], [0], [1], [0, 0, 1, 1], [], []>} : vector<3x32xbf16>, vector<32x64xbf16>, vector<3x64xf32> -> vector<3x64xf32>
      %106 = arith.addf %98, %105 : vector<3x64xf32>
      %c3_i32_93 = arith.constant 3 : i32
      %107 = arith.addi %arg6, %c3_i32_93 : i32
      %c0_94 = arith.constant 0 : index
      %108 = arith.index_cast %107 : i32 to index
      %c0_95 = arith.constant 0 : index
      %c0_96 = arith.constant 0 : index
      %109 = vector.load %arg1[%c0_94, %108, %c0_95, %c0_96] : memref<1x6x6x32xbf16, #tpu.memory_space<vmem>>, vector<1x1x3x32xbf16>
      %110 = vector.shape_cast %109 : vector<1x1x3x32xbf16> to vector<3x32xbf16>
      %c12 = arith.constant 12 : index
      %c0_97 = arith.constant 0 : index
      %c0_98 = arith.constant 0 : index
      %111 = vector.load %arg2[%c12, %c0_97, %c0_98] : memref<16x32x64xbf16, #tpu.memory_space<vmem>>, vector<1x32x64xbf16>
      %112 = vector.shape_cast %111 : vector<1x32x64xbf16> to vector<32x64xbf16>
      %cst_99 = arith.constant dense<0.000000e+00> : vector<3x64xf32>
      %113 = tpu.matmul %110, %112, %cst_99 {dimension_numbers = #tpu.dot_dimension_numbers<[1], [0], [0], [1], [0, 0, 1, 1], [], []>} : vector<3x32xbf16>, vector<32x64xbf16>, vector<3x64xf32> -> vector<3x64xf32>
      %114 = arith.addf %106, %113 : vector<3x64xf32>
      %c3_i32_100 = arith.constant 3 : i32
      %115 = arith.addi %arg6, %c3_i32_100 : i32
      %c0_101 = arith.constant 0 : index
      %116 = arith.index_cast %115 : i32 to index
      %c1_102 = arith.constant 1 : index
      %c0_103 = arith.constant 0 : index
      %117 = vector.load %arg1[%c0_101, %116, %c1_102, %c0_103] : memref<1x6x6x32xbf16, #tpu.memory_space<vmem>>, vector<1x1x3x32xbf16>
      %118 = vector.shape_cast %117 : vector<1x1x3x32xbf16> to vector<3x32xbf16>
      %c13 = arith.constant 13 : index
      %c0_104 = arith.constant 0 : index
      %c0_105 = arith.constant 0 : index
      %119 = vector.load %arg2[%c13, %c0_104, %c0_105] : memref<16x32x64xbf16, #tpu.memory_space<vmem>>, vector<1x32x64xbf16>
      %120 = vector.shape_cast %119 : vector<1x32x64xbf16> to vector<32x64xbf16>
      %cst_106 = arith.constant dense<0.000000e+00> : vector<3x64xf32>
      %121 = tpu.matmul %118, %120, %cst_106 {dimension_numbers = #tpu.dot_dimension_numbers<[1], [0], [0], [1], [0, 0, 1, 1], [], []>} : vector<3x32xbf16>, vector<32x64xbf16>, vector<3x64xf32> -> vector<3x64xf32>
      %122 = arith.addf %114, %121 : vector<3x64xf32>
      %c3_i32_107 = arith.constant 3 : i32
      %123 = arith.addi %arg6, %c3_i32_107 : i32
      %c0_108 = arith.constant 0 : index
      %124 = arith.index_cast %123 : i32 to index
      %c2_109 = arith.constant 2 : index
      %c0_110 = arith.constant 0 : index
      %125 = vector.load %arg1[%c0_108, %124, %c2_109, %c0_110] : memref<1x6x6x32xbf16, #tpu.memory_space<vmem>>, vector<1x1x3x32xbf16>
      %126 = vector.shape_cast %125 : vector<1x1x3x32xbf16> to vector<3x32xbf16>
      %c14 = arith.constant 14 : index
      %c0_111 = arith.constant 0 : index
      %c0_112 = arith.constant 0 : index
      %127 = vector.load %arg2[%c14, %c0_111, %c0_112] : memref<16x32x64xbf16, #tpu.memory_space<vmem>>, vector<1x32x64xbf16>
      %128 = vector.shape_cast %127 : vector<1x32x64xbf16> to vector<32x64xbf16>
      %cst_113 = arith.constant dense<0.000000e+00> : vector<3x64xf32>
      %129 = tpu.matmul %126, %128, %cst_113 {dimension_numbers = #tpu.dot_dimension_numbers<[1], [0], [0], [1], [0, 0, 1, 1], [], []>} : vector<3x32xbf16>, vector<32x64xbf16>, vector<3x64xf32> -> vector<3x64xf32>
      %130 = arith.addf %122, %129 : vector<3x64xf32>
      %c3_i32_114 = arith.constant 3 : i32
      %131 = arith.addi %arg6, %c3_i32_114 : i32
      %c0_115 = arith.constant 0 : index
      %132 = arith.index_cast %131 : i32 to index
      %c3_116 = arith.constant 3 : index
      %c0_117 = arith.constant 0 : index
      %133 = vector.load %arg1[%c0_115, %132, %c3_116, %c0_117] : memref<1x6x6x32xbf16, #tpu.memory_space<vmem>>, vector<1x1x3x32xbf16>
      %134 = vector.shape_cast %133 : vector<1x1x3x32xbf16> to vector<3x32xbf16>
      %c15 = arith.constant 15 : index
      %c0_118 = arith.constant 0 : index
      %c0_119 = arith.constant 0 : index
      %135 = vector.load %arg2[%c15, %c0_118, %c0_119] : memref<16x32x64xbf16, #tpu.memory_space<vmem>>, vector<1x32x64xbf16>
      %136 = vector.shape_cast %135 : vector<1x32x64xbf16> to vector<32x64xbf16>
      %cst_120 = arith.constant dense<0.000000e+00> : vector<3x64xf32>
      %137 = tpu.matmul %134, %136, %cst_120 {dimension_numbers = #tpu.dot_dimension_numbers<[1], [0], [0], [1], [0, 0, 1, 1], [], []>} : vector<3x32xbf16>, vector<32x64xbf16>, vector<3x64xf32> -> vector<3x64xf32>
      %138 = arith.addf %130, %137 : vector<3x64xf32>
      %139 = vector.broadcast %0 : vector<1x64xf32> to vector<3x64xf32>
      %140 = arith.addf %138, %139 : vector<3x64xf32>
      %141 = arith.truncf %140 : vector<3x64xf32> to vector<3x64xbf16>
      %c0_121 = arith.constant 0 : index
      %142 = arith.index_cast %arg6 : i32 to index
      %c0_122 = arith.constant 0 : index
      %c0_123 = arith.constant 0 : index
      %143 = vector.load %arg4[%c0_121, %142, %c0_122, %c0_123] : memref<1x3x3x64xbf16, #tpu.memory_space<vmem>>, vector<1x1x3x64xbf16>
      %144 = vector.shape_cast %143 : vector<1x1x3x64xbf16> to vector<3x64xbf16>
      %145 = vector.shape_cast %141 : vector<3x64xbf16> to vector<1x1x3x64xbf16>
      tpu.vector_store %arg4[%c0_121, %142, %c0_122, %c0_123], %145 {strides = array<i32>} : memref<1x3x3x64xbf16, #tpu.memory_space<vmem>>, vector<1x1x3x64xbf16>,
      %cst_124 = arith.constant dense<0.000000e+00> : vector<64xf32>
      %146 = vector.multi_reduction <add>, %140, %cst_124 [0] : vector<3x64xf32> to vector<64xf32>
      %147 = vector.shape_cast %146 : vector<64xf32> to vector<1x64xf32>
      %148 = arith.addf %arg7, %147 : vector<1x64xf32>
      %149 = arith.mulf %140, %140 : vector<3x64xf32>
      %cst_125 = arith.constant dense<0.000000e+00> : vector<64xf32>
      %150 = vector.multi_reduction <add>, %149, %cst_125 [0] : vector<3x64xf32> to vector<64xf32>
      %151 = vector.shape_cast %150 : vector<64xf32> to vector<1x64xf32>
      %152 = arith.addf %arg8, %151 : vector<1x64xf32>
      scf.yield %148, %152 : vector<1x64xf32>, vector<1x64xf32>
    }
    %c3_i32_1 = arith.constant 3 : i32
    %c0_2 = arith.constant 0 : index
    %c0_3 = arith.constant 0 : index
    %c0_4 = arith.constant 0 : index
    %4 = vector.load %arg5[%c0_2, %c0_3, %c0_4] : memref<1x2x64xf32, #tpu.memory_space<vmem>>, vector<1x1x64xf32>
    %5 = vector.shape_cast %4 : vector<1x1x64xf32> to vector<1x64xf32>
    %6 = vector.shape_cast %3#0 : vector<1x64xf32> to vector<1x1x64xf32>
    tpu.vector_store %arg5[%c0_2, %c0_3, %c0_4], %6 {strides = array<i32>} : memref<1x2x64xf32, #tpu.memory_space<vmem>>, vector<1x1x64xf32>,
    %c0_5 = arith.constant 0 : index
    %c1 = arith.constant 1 : index
    %c0_6 = arith.constant 0 : index
    %7 = vector.load %arg5[%c0_5, %c1, %c0_6] : memref<1x2x64xf32, #tpu.memory_space<vmem>>, vector<1x1x64xf32>
    %8 = vector.shape_cast %7 : vector<1x1x64xf32> to vector<1x64xf32>
    %9 = vector.shape_cast %3#1 : vector<1x64xf32> to vector<1x1x64xf32>
    tpu.vector_store %arg5[%c0_5, %c1, %c0_6], %9 {strides = array<i32>} : memref<1x2x64xf32, #tpu.memory_space<vmem>>, vector<1x1x64xf32>,
    return
  }
  func.func @transform_0(%arg0: i32) -> (i32, i32, i32, i32) {
    %c0_i32 = arith.constant 0 : i32
    %c0_i32_0 = arith.constant 0 : i32
    %c0_i32_1 = arith.constant 0 : i32
    %c0_i32_2 = arith.constant 0 : i32
    return %arg0, %c0_i32, %c0_i32_0, %c0_i32_1 : i32, i32, i32, i32
  }
  func.func @transform_1(%arg0: i32) -> (i32, i32, i32) {
    %c0_i32 = arith.constant 0 : i32
    %c0_i32_0 = arith.constant 0 : i32
    %c0_i32_1 = arith.constant 0 : i32
    %c0_i32_2 = arith.constant 0 : i32
    return %c0_i32, %c0_i32_0, %c0_i32_1 : i32, i32, i32
  }
  func.func @transform_2(%arg0: i32) -> (i32, i32) {
    %c0_i32 = arith.constant 0 : i32
    %c0_i32_0 = arith.constant 0 : i32
    %c0_i32_1 = arith.constant 0 : i32
    return %c0_i32, %c0_i32_0 : i32, i32
  }
  func.func @transform_3(%arg0: i32) -> (i32, i32, i32, i32) {
    %c0_i32 = arith.constant 0 : i32
    %c0_i32_0 = arith.constant 0 : i32
    %c0_i32_1 = arith.constant 0 : i32
    %c0_i32_2 = arith.constant 0 : i32
    return %arg0, %c0_i32, %c0_i32_0, %c0_i32_1 : i32, i32, i32, i32
  }
  func.func @transform_4(%arg0: i32) -> (i32, i32, i32) {
    %c0_i32 = arith.constant 0 : i32
    %c0_i32_0 = arith.constant 0 : i32
    %c0_i32_1 = arith.constant 0 : i32
    return %arg0, %c0_i32, %c0_i32_0 : i32, i32, i32
  }
}

module attributes {stable_mosaic.version = 11 : i64} {
  func.func @_conv4x4_kernel(%arg0: i32, %arg1: memref<1x5x5x64xbf16, #tpu.memory_space<vmem>>, %arg2: memref<16x64x1xbf16, #tpu.memory_space<vmem>>, %arg3: memref<1x1xf32, #tpu.memory_space<vmem>>, %arg4: memref<1x2x2x1xf32, #tpu.memory_space<vmem>>) attributes {dimension_semantics = [#tpu.dimension_semantics<parallel>], iteration_bounds = array<i64: 2>, scalar_prefetch = 0 : i64, scratch_operands = 0 : i64, tpu.core_type = #tpu.core_type<tc>, window_params = [{transform_indices = @transform_0, window_bounds = array<i64: 1, 5, 5, 64>}, {pipeline_mode = #tpu.pipeline_mode<synchronous>, transform_indices = @transform_1, window_bounds = array<i64: 16, 64, 1>}, {pipeline_mode = #tpu.pipeline_mode<synchronous>, transform_indices = @transform_2, window_bounds = array<i64: 1, 1>}, {transform_indices = @transform_3, window_bounds = array<i64: 1, 2, 2, 1>}]} {
    %c0 = arith.constant 0 : index
    %c0_0 = arith.constant 0 : index
    %0 = vector.load %arg3[%c0, %c0_0] : memref<1x1xf32, #tpu.memory_space<vmem>>, vector<1x1xf32>
    %c0_i32 = arith.constant 0 : i32
    %c2_i32 = arith.constant 2 : i32
    %1 = arith.addi %c0_i32, %c2_i32 : i32
    %c1_i32 = arith.constant 1 : i32
    scf.for %arg5 = %c0_i32 to %1 step %c1_i32  : i32 {
      %cst = arith.constant 0.000000e+00 : f32
      %2 = vector.broadcast %cst : f32 to vector<2x1xf32>
      %c0_i32_2 = arith.constant 0 : i32
      %3 = arith.addi %arg5, %c0_i32_2 : i32
      %c0_3 = arith.constant 0 : index
      %4 = arith.index_cast %3 : i32 to index
      %c0_4 = arith.constant 0 : index
      %c0_5 = arith.constant 0 : index
      %5 = vector.load %arg1[%c0_3, %4, %c0_4, %c0_5] : memref<1x5x5x64xbf16, #tpu.memory_space<vmem>>, vector<1x1x2x64xbf16>
      %6 = vector.shape_cast %5 : vector<1x1x2x64xbf16> to vector<2x64xbf16>
      %c0_6 = arith.constant 0 : index
      %c0_7 = arith.constant 0 : index
      %c0_8 = arith.constant 0 : index
      %7 = vector.load %arg2[%c0_6, %c0_7, %c0_8] : memref<16x64x1xbf16, #tpu.memory_space<vmem>>, vector<1x64x1xbf16>
      %8 = vector.shape_cast %7 : vector<1x64x1xbf16> to vector<64x1xbf16>
      %cst_9 = arith.constant dense<0.000000e+00> : vector<2x1xf32>
      %9 = tpu.matmul %6, %8, %cst_9 {dimension_numbers = #tpu.dot_dimension_numbers<[1], [0], [0], [1], [0, 0, 1, 1], [], []>} : vector<2x64xbf16>, vector<64x1xbf16>, vector<2x1xf32> -> vector<2x1xf32>
      %10 = arith.addf %2, %9 : vector<2x1xf32>
      %c0_i32_10 = arith.constant 0 : i32
      %11 = arith.addi %arg5, %c0_i32_10 : i32
      %c0_11 = arith.constant 0 : index
      %12 = arith.index_cast %11 : i32 to index
      %c1 = arith.constant 1 : index
      %c0_12 = arith.constant 0 : index
      %13 = vector.load %arg1[%c0_11, %12, %c1, %c0_12] : memref<1x5x5x64xbf16, #tpu.memory_space<vmem>>, vector<1x1x2x64xbf16>
      %14 = vector.shape_cast %13 : vector<1x1x2x64xbf16> to vector<2x64xbf16>
      %c1_13 = arith.constant 1 : index
      %c0_14 = arith.constant 0 : index
      %c0_15 = arith.constant 0 : index
      %15 = vector.load %arg2[%c1_13, %c0_14, %c0_15] : memref<16x64x1xbf16, #tpu.memory_space<vmem>>, vector<1x64x1xbf16>
      %16 = vector.shape_cast %15 : vector<1x64x1xbf16> to vector<64x1xbf16>
      %cst_16 = arith.constant dense<0.000000e+00> : vector<2x1xf32>
      %17 = tpu.matmul %14, %16, %cst_16 {dimension_numbers = #tpu.dot_dimension_numbers<[1], [0], [0], [1], [0, 0, 1, 1], [], []>} : vector<2x64xbf16>, vector<64x1xbf16>, vector<2x1xf32> -> vector<2x1xf32>
      %18 = arith.addf %10, %17 : vector<2x1xf32>
      %c0_i32_17 = arith.constant 0 : i32
      %19 = arith.addi %arg5, %c0_i32_17 : i32
      %c0_18 = arith.constant 0 : index
      %20 = arith.index_cast %19 : i32 to index
      %c2 = arith.constant 2 : index
      %c0_19 = arith.constant 0 : index
      %21 = vector.load %arg1[%c0_18, %20, %c2, %c0_19] : memref<1x5x5x64xbf16, #tpu.memory_space<vmem>>, vector<1x1x2x64xbf16>
      %22 = vector.shape_cast %21 : vector<1x1x2x64xbf16> to vector<2x64xbf16>
      %c2_20 = arith.constant 2 : index
      %c0_21 = arith.constant 0 : index
      %c0_22 = arith.constant 0 : index
      %23 = vector.load %arg2[%c2_20, %c0_21, %c0_22] : memref<16x64x1xbf16, #tpu.memory_space<vmem>>, vector<1x64x1xbf16>
      %24 = vector.shape_cast %23 : vector<1x64x1xbf16> to vector<64x1xbf16>
      %cst_23 = arith.constant dense<0.000000e+00> : vector<2x1xf32>
      %25 = tpu.matmul %22, %24, %cst_23 {dimension_numbers = #tpu.dot_dimension_numbers<[1], [0], [0], [1], [0, 0, 1, 1], [], []>} : vector<2x64xbf16>, vector<64x1xbf16>, vector<2x1xf32> -> vector<2x1xf32>
      %26 = arith.addf %18, %25 : vector<2x1xf32>
      %c0_i32_24 = arith.constant 0 : i32
      %27 = arith.addi %arg5, %c0_i32_24 : i32
      %c0_25 = arith.constant 0 : index
      %28 = arith.index_cast %27 : i32 to index
      %c3 = arith.constant 3 : index
      %c0_26 = arith.constant 0 : index
      %29 = vector.load %arg1[%c0_25, %28, %c3, %c0_26] : memref<1x5x5x64xbf16, #tpu.memory_space<vmem>>, vector<1x1x2x64xbf16>
      %30 = vector.shape_cast %29 : vector<1x1x2x64xbf16> to vector<2x64xbf16>
      %c3_27 = arith.constant 3 : index
      %c0_28 = arith.constant 0 : index
      %c0_29 = arith.constant 0 : index
      %31 = vector.load %arg2[%c3_27, %c0_28, %c0_29] : memref<16x64x1xbf16, #tpu.memory_space<vmem>>, vector<1x64x1xbf16>
      %32 = vector.shape_cast %31 : vector<1x64x1xbf16> to vector<64x1xbf16>
      %cst_30 = arith.constant dense<0.000000e+00> : vector<2x1xf32>
      %33 = tpu.matmul %30, %32, %cst_30 {dimension_numbers = #tpu.dot_dimension_numbers<[1], [0], [0], [1], [0, 0, 1, 1], [], []>} : vector<2x64xbf16>, vector<64x1xbf16>, vector<2x1xf32> -> vector<2x1xf32>
      %34 = arith.addf %26, %33 : vector<2x1xf32>
      %c1_i32_31 = arith.constant 1 : i32
      %35 = arith.addi %arg5, %c1_i32_31 : i32
      %c0_32 = arith.constant 0 : index
      %36 = arith.index_cast %35 : i32 to index
      %c0_33 = arith.constant 0 : index
      %c0_34 = arith.constant 0 : index
      %37 = vector.load %arg1[%c0_32, %36, %c0_33, %c0_34] : memref<1x5x5x64xbf16, #tpu.memory_space<vmem>>, vector<1x1x2x64xbf16>
      %38 = vector.shape_cast %37 : vector<1x1x2x64xbf16> to vector<2x64xbf16>
      %c4 = arith.constant 4 : index
      %c0_35 = arith.constant 0 : index
      %c0_36 = arith.constant 0 : index
      %39 = vector.load %arg2[%c4, %c0_35, %c0_36] : memref<16x64x1xbf16, #tpu.memory_space<vmem>>, vector<1x64x1xbf16>
      %40 = vector.shape_cast %39 : vector<1x64x1xbf16> to vector<64x1xbf16>
      %cst_37 = arith.constant dense<0.000000e+00> : vector<2x1xf32>
      %41 = tpu.matmul %38, %40, %cst_37 {dimension_numbers = #tpu.dot_dimension_numbers<[1], [0], [0], [1], [0, 0, 1, 1], [], []>} : vector<2x64xbf16>, vector<64x1xbf16>, vector<2x1xf32> -> vector<2x1xf32>
      %42 = arith.addf %34, %41 : vector<2x1xf32>
      %c1_i32_38 = arith.constant 1 : i32
      %43 = arith.addi %arg5, %c1_i32_38 : i32
      %c0_39 = arith.constant 0 : index
      %44 = arith.index_cast %43 : i32 to index
      %c1_40 = arith.constant 1 : index
      %c0_41 = arith.constant 0 : index
      %45 = vector.load %arg1[%c0_39, %44, %c1_40, %c0_41] : memref<1x5x5x64xbf16, #tpu.memory_space<vmem>>, vector<1x1x2x64xbf16>
      %46 = vector.shape_cast %45 : vector<1x1x2x64xbf16> to vector<2x64xbf16>
      %c5 = arith.constant 5 : index
      %c0_42 = arith.constant 0 : index
      %c0_43 = arith.constant 0 : index
      %47 = vector.load %arg2[%c5, %c0_42, %c0_43] : memref<16x64x1xbf16, #tpu.memory_space<vmem>>, vector<1x64x1xbf16>
      %48 = vector.shape_cast %47 : vector<1x64x1xbf16> to vector<64x1xbf16>
      %cst_44 = arith.constant dense<0.000000e+00> : vector<2x1xf32>
      %49 = tpu.matmul %46, %48, %cst_44 {dimension_numbers = #tpu.dot_dimension_numbers<[1], [0], [0], [1], [0, 0, 1, 1], [], []>} : vector<2x64xbf16>, vector<64x1xbf16>, vector<2x1xf32> -> vector<2x1xf32>
      %50 = arith.addf %42, %49 : vector<2x1xf32>
      %c1_i32_45 = arith.constant 1 : i32
      %51 = arith.addi %arg5, %c1_i32_45 : i32
      %c0_46 = arith.constant 0 : index
      %52 = arith.index_cast %51 : i32 to index
      %c2_47 = arith.constant 2 : index
      %c0_48 = arith.constant 0 : index
      %53 = vector.load %arg1[%c0_46, %52, %c2_47, %c0_48] : memref<1x5x5x64xbf16, #tpu.memory_space<vmem>>, vector<1x1x2x64xbf16>
      %54 = vector.shape_cast %53 : vector<1x1x2x64xbf16> to vector<2x64xbf16>
      %c6 = arith.constant 6 : index
      %c0_49 = arith.constant 0 : index
      %c0_50 = arith.constant 0 : index
      %55 = vector.load %arg2[%c6, %c0_49, %c0_50] : memref<16x64x1xbf16, #tpu.memory_space<vmem>>, vector<1x64x1xbf16>
      %56 = vector.shape_cast %55 : vector<1x64x1xbf16> to vector<64x1xbf16>
      %cst_51 = arith.constant dense<0.000000e+00> : vector<2x1xf32>
      %57 = tpu.matmul %54, %56, %cst_51 {dimension_numbers = #tpu.dot_dimension_numbers<[1], [0], [0], [1], [0, 0, 1, 1], [], []>} : vector<2x64xbf16>, vector<64x1xbf16>, vector<2x1xf32> -> vector<2x1xf32>
      %58 = arith.addf %50, %57 : vector<2x1xf32>
      %c1_i32_52 = arith.constant 1 : i32
      %59 = arith.addi %arg5, %c1_i32_52 : i32
      %c0_53 = arith.constant 0 : index
      %60 = arith.index_cast %59 : i32 to index
      %c3_54 = arith.constant 3 : index
      %c0_55 = arith.constant 0 : index
      %61 = vector.load %arg1[%c0_53, %60, %c3_54, %c0_55] : memref<1x5x5x64xbf16, #tpu.memory_space<vmem>>, vector<1x1x2x64xbf16>
      %62 = vector.shape_cast %61 : vector<1x1x2x64xbf16> to vector<2x64xbf16>
      %c7 = arith.constant 7 : index
      %c0_56 = arith.constant 0 : index
      %c0_57 = arith.constant 0 : index
      %63 = vector.load %arg2[%c7, %c0_56, %c0_57] : memref<16x64x1xbf16, #tpu.memory_space<vmem>>, vector<1x64x1xbf16>
      %64 = vector.shape_cast %63 : vector<1x64x1xbf16> to vector<64x1xbf16>
      %cst_58 = arith.constant dense<0.000000e+00> : vector<2x1xf32>
      %65 = tpu.matmul %62, %64, %cst_58 {dimension_numbers = #tpu.dot_dimension_numbers<[1], [0], [0], [1], [0, 0, 1, 1], [], []>} : vector<2x64xbf16>, vector<64x1xbf16>, vector<2x1xf32> -> vector<2x1xf32>
      %66 = arith.addf %58, %65 : vector<2x1xf32>
      %c2_i32_59 = arith.constant 2 : i32
      %67 = arith.addi %arg5, %c2_i32_59 : i32
      %c0_60 = arith.constant 0 : index
      %68 = arith.index_cast %67 : i32 to index
      %c0_61 = arith.constant 0 : index
      %c0_62 = arith.constant 0 : index
      %69 = vector.load %arg1[%c0_60, %68, %c0_61, %c0_62] : memref<1x5x5x64xbf16, #tpu.memory_space<vmem>>, vector<1x1x2x64xbf16>
      %70 = vector.shape_cast %69 : vector<1x1x2x64xbf16> to vector<2x64xbf16>
      %c8 = arith.constant 8 : index
      %c0_63 = arith.constant 0 : index
      %c0_64 = arith.constant 0 : index
      %71 = vector.load %arg2[%c8, %c0_63, %c0_64] : memref<16x64x1xbf16, #tpu.memory_space<vmem>>, vector<1x64x1xbf16>
      %72 = vector.shape_cast %71 : vector<1x64x1xbf16> to vector<64x1xbf16>
      %cst_65 = arith.constant dense<0.000000e+00> : vector<2x1xf32>
      %73 = tpu.matmul %70, %72, %cst_65 {dimension_numbers = #tpu.dot_dimension_numbers<[1], [0], [0], [1], [0, 0, 1, 1], [], []>} : vector<2x64xbf16>, vector<64x1xbf16>, vector<2x1xf32> -> vector<2x1xf32>
      %74 = arith.addf %66, %73 : vector<2x1xf32>
      %c2_i32_66 = arith.constant 2 : i32
      %75 = arith.addi %arg5, %c2_i32_66 : i32
      %c0_67 = arith.constant 0 : index
      %76 = arith.index_cast %75 : i32 to index
      %c1_68 = arith.constant 1 : index
      %c0_69 = arith.constant 0 : index
      %77 = vector.load %arg1[%c0_67, %76, %c1_68, %c0_69] : memref<1x5x5x64xbf16, #tpu.memory_space<vmem>>, vector<1x1x2x64xbf16>
      %78 = vector.shape_cast %77 : vector<1x1x2x64xbf16> to vector<2x64xbf16>
      %c9 = arith.constant 9 : index
      %c0_70 = arith.constant 0 : index
      %c0_71 = arith.constant 0 : index
      %79 = vector.load %arg2[%c9, %c0_70, %c0_71] : memref<16x64x1xbf16, #tpu.memory_space<vmem>>, vector<1x64x1xbf16>
      %80 = vector.shape_cast %79 : vector<1x64x1xbf16> to vector<64x1xbf16>
      %cst_72 = arith.constant dense<0.000000e+00> : vector<2x1xf32>
      %81 = tpu.matmul %78, %80, %cst_72 {dimension_numbers = #tpu.dot_dimension_numbers<[1], [0], [0], [1], [0, 0, 1, 1], [], []>} : vector<2x64xbf16>, vector<64x1xbf16>, vector<2x1xf32> -> vector<2x1xf32>
      %82 = arith.addf %74, %81 : vector<2x1xf32>
      %c2_i32_73 = arith.constant 2 : i32
      %83 = arith.addi %arg5, %c2_i32_73 : i32
      %c0_74 = arith.constant 0 : index
      %84 = arith.index_cast %83 : i32 to index
      %c2_75 = arith.constant 2 : index
      %c0_76 = arith.constant 0 : index
      %85 = vector.load %arg1[%c0_74, %84, %c2_75, %c0_76] : memref<1x5x5x64xbf16, #tpu.memory_space<vmem>>, vector<1x1x2x64xbf16>
      %86 = vector.shape_cast %85 : vector<1x1x2x64xbf16> to vector<2x64xbf16>
      %c10 = arith.constant 10 : index
      %c0_77 = arith.constant 0 : index
      %c0_78 = arith.constant 0 : index
      %87 = vector.load %arg2[%c10, %c0_77, %c0_78] : memref<16x64x1xbf16, #tpu.memory_space<vmem>>, vector<1x64x1xbf16>
      %88 = vector.shape_cast %87 : vector<1x64x1xbf16> to vector<64x1xbf16>
      %cst_79 = arith.constant dense<0.000000e+00> : vector<2x1xf32>
      %89 = tpu.matmul %86, %88, %cst_79 {dimension_numbers = #tpu.dot_dimension_numbers<[1], [0], [0], [1], [0, 0, 1, 1], [], []>} : vector<2x64xbf16>, vector<64x1xbf16>, vector<2x1xf32> -> vector<2x1xf32>
      %90 = arith.addf %82, %89 : vector<2x1xf32>
      %c2_i32_80 = arith.constant 2 : i32
      %91 = arith.addi %arg5, %c2_i32_80 : i32
      %c0_81 = arith.constant 0 : index
      %92 = arith.index_cast %91 : i32 to index
      %c3_82 = arith.constant 3 : index
      %c0_83 = arith.constant 0 : index
      %93 = vector.load %arg1[%c0_81, %92, %c3_82, %c0_83] : memref<1x5x5x64xbf16, #tpu.memory_space<vmem>>, vector<1x1x2x64xbf16>
      %94 = vector.shape_cast %93 : vector<1x1x2x64xbf16> to vector<2x64xbf16>
      %c11 = arith.constant 11 : index
      %c0_84 = arith.constant 0 : index
      %c0_85 = arith.constant 0 : index
      %95 = vector.load %arg2[%c11, %c0_84, %c0_85] : memref<16x64x1xbf16, #tpu.memory_space<vmem>>, vector<1x64x1xbf16>
      %96 = vector.shape_cast %95 : vector<1x64x1xbf16> to vector<64x1xbf16>
      %cst_86 = arith.constant dense<0.000000e+00> : vector<2x1xf32>
      %97 = tpu.matmul %94, %96, %cst_86 {dimension_numbers = #tpu.dot_dimension_numbers<[1], [0], [0], [1], [0, 0, 1, 1], [], []>} : vector<2x64xbf16>, vector<64x1xbf16>, vector<2x1xf32> -> vector<2x1xf32>
      %98 = arith.addf %90, %97 : vector<2x1xf32>
      %c3_i32 = arith.constant 3 : i32
      %99 = arith.addi %arg5, %c3_i32 : i32
      %c0_87 = arith.constant 0 : index
      %100 = arith.index_cast %99 : i32 to index
      %c0_88 = arith.constant 0 : index
      %c0_89 = arith.constant 0 : index
      %101 = vector.load %arg1[%c0_87, %100, %c0_88, %c0_89] : memref<1x5x5x64xbf16, #tpu.memory_space<vmem>>, vector<1x1x2x64xbf16>
      %102 = vector.shape_cast %101 : vector<1x1x2x64xbf16> to vector<2x64xbf16>
      %c12 = arith.constant 12 : index
      %c0_90 = arith.constant 0 : index
      %c0_91 = arith.constant 0 : index
      %103 = vector.load %arg2[%c12, %c0_90, %c0_91] : memref<16x64x1xbf16, #tpu.memory_space<vmem>>, vector<1x64x1xbf16>
      %104 = vector.shape_cast %103 : vector<1x64x1xbf16> to vector<64x1xbf16>
      %cst_92 = arith.constant dense<0.000000e+00> : vector<2x1xf32>
      %105 = tpu.matmul %102, %104, %cst_92 {dimension_numbers = #tpu.dot_dimension_numbers<[1], [0], [0], [1], [0, 0, 1, 1], [], []>} : vector<2x64xbf16>, vector<64x1xbf16>, vector<2x1xf32> -> vector<2x1xf32>
      %106 = arith.addf %98, %105 : vector<2x1xf32>
      %c3_i32_93 = arith.constant 3 : i32
      %107 = arith.addi %arg5, %c3_i32_93 : i32
      %c0_94 = arith.constant 0 : index
      %108 = arith.index_cast %107 : i32 to index
      %c1_95 = arith.constant 1 : index
      %c0_96 = arith.constant 0 : index
      %109 = vector.load %arg1[%c0_94, %108, %c1_95, %c0_96] : memref<1x5x5x64xbf16, #tpu.memory_space<vmem>>, vector<1x1x2x64xbf16>
      %110 = vector.shape_cast %109 : vector<1x1x2x64xbf16> to vector<2x64xbf16>
      %c13 = arith.constant 13 : index
      %c0_97 = arith.constant 0 : index
      %c0_98 = arith.constant 0 : index
      %111 = vector.load %arg2[%c13, %c0_97, %c0_98] : memref<16x64x1xbf16, #tpu.memory_space<vmem>>, vector<1x64x1xbf16>
      %112 = vector.shape_cast %111 : vector<1x64x1xbf16> to vector<64x1xbf16>
      %cst_99 = arith.constant dense<0.000000e+00> : vector<2x1xf32>
      %113 = tpu.matmul %110, %112, %cst_99 {dimension_numbers = #tpu.dot_dimension_numbers<[1], [0], [0], [1], [0, 0, 1, 1], [], []>} : vector<2x64xbf16>, vector<64x1xbf16>, vector<2x1xf32> -> vector<2x1xf32>
      %114 = arith.addf %106, %113 : vector<2x1xf32>
      %c3_i32_100 = arith.constant 3 : i32
      %115 = arith.addi %arg5, %c3_i32_100 : i32
      %c0_101 = arith.constant 0 : index
      %116 = arith.index_cast %115 : i32 to index
      %c2_102 = arith.constant 2 : index
      %c0_103 = arith.constant 0 : index
      %117 = vector.load %arg1[%c0_101, %116, %c2_102, %c0_103] : memref<1x5x5x64xbf16, #tpu.memory_space<vmem>>, vector<1x1x2x64xbf16>
      %118 = vector.shape_cast %117 : vector<1x1x2x64xbf16> to vector<2x64xbf16>
      %c14 = arith.constant 14 : index
      %c0_104 = arith.constant 0 : index
      %c0_105 = arith.constant 0 : index
      %119 = vector.load %arg2[%c14, %c0_104, %c0_105] : memref<16x64x1xbf16, #tpu.memory_space<vmem>>, vector<1x64x1xbf16>
      %120 = vector.shape_cast %119 : vector<1x64x1xbf16> to vector<64x1xbf16>
      %cst_106 = arith.constant dense<0.000000e+00> : vector<2x1xf32>
      %121 = tpu.matmul %118, %120, %cst_106 {dimension_numbers = #tpu.dot_dimension_numbers<[1], [0], [0], [1], [0, 0, 1, 1], [], []>} : vector<2x64xbf16>, vector<64x1xbf16>, vector<2x1xf32> -> vector<2x1xf32>
      %122 = arith.addf %114, %121 : vector<2x1xf32>
      %c3_i32_107 = arith.constant 3 : i32
      %123 = arith.addi %arg5, %c3_i32_107 : i32
      %c0_108 = arith.constant 0 : index
      %124 = arith.index_cast %123 : i32 to index
      %c3_109 = arith.constant 3 : index
      %c0_110 = arith.constant 0 : index
      %125 = vector.load %arg1[%c0_108, %124, %c3_109, %c0_110] : memref<1x5x5x64xbf16, #tpu.memory_space<vmem>>, vector<1x1x2x64xbf16>
      %126 = vector.shape_cast %125 : vector<1x1x2x64xbf16> to vector<2x64xbf16>
      %c15 = arith.constant 15 : index
      %c0_111 = arith.constant 0 : index
      %c0_112 = arith.constant 0 : index
      %127 = vector.load %arg2[%c15, %c0_111, %c0_112] : memref<16x64x1xbf16, #tpu.memory_space<vmem>>, vector<1x64x1xbf16>
      %128 = vector.shape_cast %127 : vector<1x64x1xbf16> to vector<64x1xbf16>
      %cst_113 = arith.constant dense<0.000000e+00> : vector<2x1xf32>
      %129 = tpu.matmul %126, %128, %cst_113 {dimension_numbers = #tpu.dot_dimension_numbers<[1], [0], [0], [1], [0, 0, 1, 1], [], []>} : vector<2x64xbf16>, vector<64x1xbf16>, vector<2x1xf32> -> vector<2x1xf32>
      %130 = arith.addf %122, %129 : vector<2x1xf32>
      %131 = vector.broadcast %0 : vector<1x1xf32> to vector<2x1xf32>
      %132 = arith.addf %130, %131 : vector<2x1xf32>
      %133 = arith.negf %132 : vector<2x1xf32>
      %134 = math.exp %133 : vector<2x1xf32>
      %cst_114 = arith.constant 1.000000e+00 : f32
      %135 = vector.broadcast %cst_114 : f32 to vector<2x1xf32>
      %136 = arith.addf %135, %134 : vector<2x1xf32>
      %137 = arith.divf %135, %136 : vector<2x1xf32>
      %c0_115 = arith.constant 0 : index
      %138 = arith.index_cast %arg5 : i32 to index
      %c0_116 = arith.constant 0 : index
      %c0_117 = arith.constant 0 : index
      %139 = vector.load %arg4[%c0_115, %138, %c0_116, %c0_117] : memref<1x2x2x1xf32, #tpu.memory_space<vmem>>, vector<1x1x2x1xf32>
      %140 = vector.shape_cast %139 : vector<1x1x2x1xf32> to vector<2x1xf32>
      %141 = vector.shape_cast %137 : vector<2x1xf32> to vector<1x1x2x1xf32>
      tpu.vector_store %arg4[%c0_115, %138, %c0_116, %c0_117], %141 {strides = array<i32>} : memref<1x2x2x1xf32, #tpu.memory_space<vmem>>, vector<1x1x2x1xf32>,
    }
    %c2_i32_1 = arith.constant 2 : i32
    return
  }
  func.func @transform_0(%arg0: i32) -> (i32, i32, i32, i32) {
    %c0_i32 = arith.constant 0 : i32
    %c0_i32_0 = arith.constant 0 : i32
    %c0_i32_1 = arith.constant 0 : i32
    %c0_i32_2 = arith.constant 0 : i32
    return %arg0, %c0_i32, %c0_i32_0, %c0_i32_1 : i32, i32, i32, i32
  }
  func.func @transform_1(%arg0: i32) -> (i32, i32, i32) {
    %c0_i32 = arith.constant 0 : i32
    %c0_i32_0 = arith.constant 0 : i32
    %c0_i32_1 = arith.constant 0 : i32
    %c0_i32_2 = arith.constant 0 : i32
    return %c0_i32, %c0_i32_0, %c0_i32_1 : i32, i32, i32
  }
  func.func @transform_2(%arg0: i32) -> (i32, i32) {
    %c0_i32 = arith.constant 0 : i32
    %c0_i32_0 = arith.constant 0 : i32
    %c0_i32_1 = arith.constant 0 : i32
    return %c0_i32, %c0_i32_0 : i32, i32
  }
  func.func @transform_3(%arg0: i32) -> (i32, i32, i32, i32) {
    %c0_i32 = arith.constant 0 : i32
    %c0_i32_0 = arith.constant 0 : i32
    %c0_i32_1 = arith.constant 0 : i32
    %c0_i32_2 = arith.constant 0 : i32
    return %arg0, %c0_i32, %c0_i32_0, %c0_i32_1 : i32, i32, i32, i32
  }
}

</mosaic_0001>

<bundles_post_ra>
// kernel: d_forward.5
= control target key start
LH: loop header
LB: loop body
LE: loop exit
PB: predicated region body
PF: predicated region fallthrough
CT: control target
= control target key end

     0   :  { %s1873_s21 = smov 0   ;;  %s2121_s0 = inlined_call_operand.vmem [shape: bf16[2,17,17,3], index: 0, kind: input, shape index: {}]   ;;  %s2122_s1 = inlined_call_operand.vmem [shape: bf16[2,17,17,3], index: 1, kind: input, shape index: {}]   ;;  %s2123_s2 = inlined_call_operand.vmem [shape: bf16[2,17,17,3], index: 2, kind: input, shape index: {}]   ;;  %s2124_s3 = inlined_call_operand.vmem [shape: bf16[2,17,17,3], index: 3, kind: input, shape index: {}]   ;;  %s2125_s4 = inlined_call_operand.vmem [shape: bf16[16,3,8], index: 4, kind: input, shape index: {}]   ;;  %s2126_s5 = inlined_call_operand.vmem [shape: f32[1,8], index: 5, kind: input, shape index: {}]   ;;  %s2127_s6 = inlined_call_operand.vmem [shape: bf16[2,16,16,8], index: 6, kind: output, shape index: {}]  }
   0x1 LB: > { %s1542_s22 = sadd.s32 4294967295, %s1829_s21   ;;  %p1546_p0 = scmp.ge.s32.totalorder %s1829_s21, 1  ;;  %s1829_s21 = sphi %s1873_s21, %s16_s21  }
   0x2   : > { %p242_p1 = scmp.lt.s32.totalorder %s1829_s21, 3 }
   0x4   : > { %p243_p2 = pnand %p1546_p0, %p242_p1 }
   0x5   : > { %p287_p3 = scmp.lt.s32.totalorder (!%p243_p2), %s1542_s22, 1  ;;  %v1884_v0 = vld [vmem:[%s2126_s5] ss:$0 sm:$0xff] (!%p243_p2)  ;;  %s1909_s18 = smov (!%p243_p2), 0  }
   0x6   : > { %246 = sbr.rel (%p243_p2) target bundleno = 308 (0x134), region = 44 }
   0xd   : > { %s2129_s22 = smov (!%p287_p3, %s1542_s22), 1 }
   0xe   : > { %s1886_s25 = smul.u32 204, %s2129_s22  ;;  %s1639_s26 = sshll.u32 %s2129_s22, 7 }
   0xf   : > { %s1891_s29 = scalar_lea.vmem %s2127_s6, %s1639_s26 }
  0x10   : > { %s291_s8 = scalar_lea.vmem %s2121_s0, %s1886_s25  ;;  %s296_s11 = scalar_lea.vmem %s2122_s1, %s1886_s25 }
  0x11   : > { %s301_s14 = scalar_lea.vmem %s2123_s2, %s1886_s25  ;;  %s306_s17 = scalar_lea.vmem %s2124_s3, %s1886_s25 }
  0x12 LB: >> { %v1555_v1 = vld [vmem:[%s2125_s4 + $0x2] sm:$0x3]  ;;  %vm341_vm0 = vcmask 1040384   ;;  %vm342_vm1 = vcmask 1041408   ;;  %v1835_v2 = vmov 0.0   ;;  %v1836_v3 = vmov 65535   ;;  %s1833_s18 = sphi %s1909_s18, %s319_s18  }
  0x13   : >> { %1679 = vmatprep.subr.bf16.mxu0 %v1835_v2  ;;  %1685 = vmatprep.subr.bf16.mxu1 %v1835_v2  ;;  %v343_v4 = vsel %vm341_vm0, 4294967295, %v1836_v3  ;;  %v325_v5 = vld [vmem:[%s2125_s4] sm:$0x3]  ;;  %vm1837_vm2 = vmmov 0   ;;  %s1929_s24 = smul.u32 12, %s1833_s18  ;;  %vm337_vm3 = vcmask 23552  }
  0x14   : >> { %v1922_v6 = vsel %vm342_vm1, %v343_v4, 0  ;;  %1681 = vmatprep.mubr.msk.bf16.mxu0 %vm1837_vm2, %v1835_v2  ;;  %1687 = vmatprep.mubr.msk.bf16.mxu1 %vm1837_vm2, %v1835_v2  ;;  %v1560_v7 = vld [vmem:[%s2125_s4 + $0x4] sm:$0x3]  ;;  %v1564_v8 = vld [vmem:[%s2125_s4 + $0x6] sm:$0x3]  ;;  %vm1421_vm6 = vcmask 60416  }
  0x15   : >> { %v346_v9 = vand.u32 %v1555_v1, %v1922_v6  ;;  %v398_v10 = vand.u32 %v1922_v6, %v325_v5  ;;  %s1945_s10 = scalar_lea.vmem %s296_s11, %s1929_s24  ;;  %s1953_s15 = scalar_lea.vmem %s291_s8, %s1929_s24  ;;  %v471_v12 = vand.u32 %v1560_v7, %v1922_v6  ;;  %v545_v13 = vand.u32 %v1564_v8, %v1922_v6  ;;  %v1569_v18 = vld [vmem:[%s2125_s4 + $0x8] sm:$0x3]  ;;  %v1573_v23 = vld [vmem:[%s2125_s4 + $0xa] sm:$0x3]  ;;  %v1576_v41 = vld [vmem:[%s2125_s4 + $0xc] sm:$0x3] }
  0x16   : >> { %v1795_v11 = vld [vmem:[%s1945_s10] sm:$0xff]   ;;  %vm454_vm4 = vsmask.f32 7424  ;;  %v1798_v16 = vld [vmem:[%s1953_s15 + $0x8] ss:$0 sps:$4 sm:$0x11]   ;;  %s1983_s27 = scalar_lea.vmem %s301_s14, %s1929_s24  ;;  %s1993_s7 = scalar_lea.vmem %s306_s17, %s1929_s24  ;;  %v605_v32 = vand.u32 %v1569_v18, %v1922_v6  ;;  %v665_v35 = vand.u32 %v1573_v23, %v1922_v6  ;;  %v739_v50 = vand.u32 %v1576_v41, %v1922_v6 }
  0x17   : >> { %1680 = vmatpush3.bf16.msra.mxu0 %v346_v9  ;;  %1686 = vmatpush3.bf16.msra.mxu1 %v398_v10  ;;  %v1796_v14 = vld [vmem:[%s1953_s15] sm:$0xff]   ;;  %v463_v21 = vshll.u32 %v1798_v16, 16  ;;  %v1800_v22 = vld [vmem:[%s1945_s10 + $0x8] ss:$0 sps:$4 sm:$0x11]   ;;  %v1809_v61 = vld [vmem:[%s1953_s15 + $0xc] sm:$0xff]  }
  0x18   : >> { %1691 = vmatprep.subr.bf16.mxu0 %v1835_v2  ;;  %1697 = vmatprep.subr.bf16.mxu1 %v1835_v2  ;;  %v1797_v15 = vld [vmem:[%s1953_s15] sm:$0xff]   ;;  %v537_v28 = vshll.u32 %v1800_v22, 16  ;;  %v1804_v39 = vld [vmem:[%s1983_s27 + $0x8] ss:$0 sps:$4 sm:$0x11]   ;;  %v1811_v4 = vld [vmem:[%s1945_s10 + $0xc] sm:$0xff]  }
  0x19   : >> { %v1799_v17 = vld [vmem:[%s1945_s10] sm:$0xff]   ;;  %v456_v19 = vshrl.u32 %v1797_v15, 16  ;;  %v458_v20 = vshll.u32 %v1797_v15, 16  ;;  %v465_v27 = vrot.slane %v463_v21, 1  ;;  %v1580_v42 = vld [vmem:[%s2125_s4 + $0xe] sm:$0x3] }
  0x1a   : >> { %1682 = vmatmul.mubr.msk.bf16.vlgmr.msra.gmra.mrb[0].mxu0 %vm337_vm3, %v1795_v11  ;;  %1688 = vmatmul.mubr.msk.bf16.vlgmr.msra.gmra.mrb[0].mxu1 %vm337_vm3, %v1796_v14  ;;  %v530_v24 = vshrl.u32 %v1799_v17, 16  ;;  %v532_v25 = vshll.u32 %v1799_v17, 16  ;;  %v539_v31 = vrot.slane %v537_v28, 1  ;;  %v1803_v33 = vld [vmem:[%s1983_s27] sm:$0xff]   ;;  %v731_v49 = vshll.u32 %v1804_v39, 16  ;;  %v1814_v41 = vld [vmem:[%s1993_s7 + $0xc] sm:$0xff]  }
  0x1b   : >> { %1692 = vmatpush3.bf16.msra.mxu0 %v471_v12  ;;  %1698 = vmatpush3.bf16.msra.mxu1 %v545_v13  ;;  %v460_v26 = vrot.slane %v458_v20, 1  ;;  %v1805_v36 = vld [vmem:[%s1993_s7] sm:$0xff]   ;;  %v726_v40 = vshll.u32 %v1803_v33, 16  ;;  %v1806_v43 = vld [vmem:[%s1993_s7 + $0x8] ss:$0 sps:$4 sm:$0x11]   ;;  %v813_v51 = vand.u32 %v1580_v42, %v1922_v6 }
  0x1c   : >> { %1693 = vmatprep.mubr.msk.bf16.mxu0 %vm1837_vm2, %v1835_v2  ;;  %1699 = vmatprep.mubr.msk.bf16.mxu1 %vm1837_vm2, %v1835_v2  ;;  %v534_v29 = vrot.slane %v532_v25, 1  ;;  %v800_v44 = vshll.u32 %v1805_v36, 16  ;;  %v1801_v45 = vld [vmem:[%s1983_s27] sm:$0xff]   ;;  %v724_v47 = vshrl.u32 %v1803_v33, 16  ;;  %v798_v52 = vshrl.u32 %v1805_v36, 16  ;;  %v1807_v12 = vld [vmem:[%s1953_s15 + $0xc] sm:$0xff]  }
  0x1d   : >> { %1703 = vmatprep.subr.bf16.mxu0 %v1835_v2  ;;  %1709 = vmatprep.subr.bf16.mxu1 %v1835_v2  ;;  %v461_v30 = vor.u32 %v460_v26, %v456_v19  ;;  %v1802_v46 = vld [vmem:[%s1993_s7] sm:$0xff]   ;;  %v728_v48 = vrot.slane %v726_v40, 1  ;;  %v805_v54 = vshll.u32 %v1806_v43, 16  ;;  %v733_v56 = vrot.slane %v731_v49, 1  ;;  %v1586_v57 = vld [vmem:[%s2125_s4 + $0x10] sm:$0x3] }
  0x1e   : >> { %v535_v34 = vor.u32 %v534_v29, %v530_v24  ;;  %v802_v53 = vrot.slane %v800_v44, 1  ;;  %v1591_v60 = vld [vmem:[%s2125_s4 + $0x12] sm:$0x3]  ;;  %v875_v63 = vand.u32 %v1586_v57, %v1922_v6  ;;  %v1810_v5 = vld [vmem:[%s1953_s15 + $0x14] ss:$0 sps:$4 sm:$0x11]  }
  0x1f   : >> { %v466_v37 = vsel %vm454_vm4, %v461_v30, %v465_v27  ;;  %v729_v55 = vor.u32 %v728_v48, %v724_v47  ;;  %v807_v59 = vrot.slane %v805_v54, 1  ;;  %v935_v3 = vand.u32 %v1591_v60, %v1922_v6  ;;  %v1597_v8 = vld [vmem:[%s2125_s4 + $0x14] sm:$0x3]  ;;  %v1604_v11 = vld [vmem:[%s2125_s4 + $0x16] sm:$0x3]  ;;  %v1808_v13 = vld [vmem:[%s1945_s10 + $0xc] sm:$0xff]  }
  0x20   : >> { %v540_v38 = vsel %vm454_vm4, %v535_v34, %v539_v31  ;;  %v803_v58 = vor.u32 %v802_v53, %v798_v52  ;;  %v996_v7 = vshll.u32 %v1809_v61, 16  ;;  %v1812_v9 = vld [vmem:[%s1945_s10 + $0x14] ss:$0 sps:$4 sm:$0x11]   ;;  %v1070_v10 = vshll.u32 %v1811_v4, 16  ;;  %v1815_v30 = vld [vmem:[%s1983_s27 + $0xc] sm:$0xff]  }
  0x21   : >> { %v734_v62 = vsel %vm454_vm4, %v729_v55, %v733_v56  ;;  %v1009_v14 = vand.u32 %v1597_v8, %v1922_v6  ;;  %v994_v15 = vshrl.u32 %v1809_v61, 16  ;;  %v1001_v17 = vshll.u32 %v1810_v5, 16  ;;  %v1610_v26 = vld [vmem:[%s2125_s4 + $0x18] sm:$0x3]  ;;  %v1615_v27 = vld [vmem:[%s2125_s4 + $0x1a] sm:$0x3] }
  0x22   : >> { %1694 = vmatmul.mubr.msk.bf16.vlgmr.msra.gmra.mrb[4].mxu0 %vm337_vm3, %v466_v37  ;;  %1700 = vmatmul.mubr.msk.bf16.vlgmr.msra.gmra.mrb[4].mxu1 %vm337_vm3, %v540_v38  ;;  %v808_v1 = vsel %vm454_vm4, %v803_v58, %v807_v59  ;;  %v998_v16 = vrot.slane %v996_v7, 1  ;;  %v1083_v18 = vand.u32 %v1604_v11, %v1922_v6  ;;  %v1068_v19 = vshrl.u32 %v1811_v4, 16  ;;  %v1817_v33 = vld [vmem:[%s1993_s7 + $0xc] sm:$0xff]   ;;  %v1816_v34 = vld [vmem:[%s1983_s27 + $0x14] ss:$0 sps:$4 sm:$0x11]  }
  0x23   : >> { %1704 = vmatpush3.bf16.msra.mxu0 %v605_v32  ;;  %1710 = vmatpush3.bf16.msra.mxu1 %v665_v35  ;;  %v1072_v20 = vrot.slane %v1070_v10, 1  ;;  %v1075_v21 = vshll.u32 %v1812_v9, 16  ;;  %v1003_v23 = vrot.slane %v1001_v17, 1  ;;  %v1143_v29 = vand.u32 %v1610_v26, %v1922_v6  ;;  %v1621_v36 = vld [vmem:[%s2125_s4 + $0x1c] sm:$0x3]  ;;  %v1813_v40 = vld [vmem:[%s1983_s27 + $0xc] sm:$0xff]  }
  0x24   : >> { %1705 = vmatprep.mubr.msk.bf16.mxu0 %vm1837_vm2, %v1835_v2  ;;  %1711 = vmatprep.mubr.msk.bf16.mxu1 %vm1837_vm2, %v1835_v2  ;;  %v999_v22 = vor.u32 %v998_v16, %v994_v15  ;;  %v1203_v32 = vand.u32 %v1615_v27, %v1922_v6  ;;  %v1264_v35 = vshll.u32 %v1815_v30, 16  ;;  %v1818_v37 = vld [vmem:[%s1993_s7 + $0x14] ss:$0 sps:$4 sm:$0x11]   ;;  %v1338_v38 = vshll.u32 %v1817_v33, 16  ;;  %s1646_s27 = sshll.u32 %s1833_s18, 3 }
  0x25   : >> { %1715 = vmatprep.subr.bf16.mxu0 %v1835_v2  ;;  %1721 = vmatprep.subr.bf16.mxu1 %v1835_v2  ;;  %v1073_v24 = vor.u32 %v1072_v20, %v1068_v19  ;;  %v1077_v25 = vrot.slane %v1075_v21, 1  ;;  %v1628_v39 = vld [vmem:[%s2125_s4 + $0x1e] sm:$0x3]  ;;  %v1277_v42 = vand.u32 %v1621_v36, %v1922_v6  ;;  %v1262_v43 = vshrl.u32 %v1815_v30, 16  ;;  %s1420_s7 = scalar_lea.vmem %s1891_s29, %s1646_s27  ;;  %s319_s18 = sadd.s32 1, %s1833_s18  }
  0x26   : >> { %v1004_v28 = vsel %vm454_vm4, %v999_v22, %v1003_v23  ;;  %v1266_v44 = vrot.slane %v1264_v35, 1  ;;  %v1336_v47 = vshrl.u32 %v1817_v33, 16  ;;  %v1340_v48 = vrot.slane %v1338_v38, 1  ;;  %p316_p4 = scmp.ge.s32.totalorder %s319_s18, 16  }
  0x27   : >> { %v1078_v31 = vsel %vm454_vm4, %v1073_v24, %v1077_v25  ;;  %v1343_v49 = vshll.u32 %v1818_v37, 16 }
  0x28   : >> { %v1341_v52 = vor.u32 %v1340_v48, %v1336_v47 }
  0x29   : >> { %v1345_v53 = vrot.slane %v1343_v49, 1 }
  0x2a   : >> { %1706 = vmatmul.mubr.msk.bf16.vlgmr.msra.gmra.mrb[8].mxu0 %vm337_vm3, %v1801_v45  ;;  %1712 = vmatmul.mubr.msk.bf16.vlgmr.msra.gmra.mrb[8].mxu1 %vm337_vm3, %v1802_v46  ;;  %v1269_v45 = vshll.u32 %v1816_v34, 16  ;;  %v1351_v46 = vand.u32 %v1628_v39, %v1922_v6 }
  0x2b   : >> { %1716 = vmatpush3.bf16.msra.mxu0 %v739_v50  ;;  %1722 = vmatpush3.bf16.msra.mxu1 %v813_v51  ;;  %v1267_v50 = vor.u32 %v1266_v44, %v1262_v43  ;;  %v1346_v54 = vsel %vm454_vm4, %v1341_v52, %v1345_v53 }
  0x2c   : >> { %1717 = vmatprep.mubr.msk.bf16.mxu0 %vm1837_vm2, %v1835_v2  ;;  %1723 = vmatprep.mubr.msk.bf16.mxu1 %vm1837_vm2, %v1835_v2  ;;  %v1271_v51 = vrot.slane %v1269_v45, 1 }
  0x2d   : >> { %1727 = vmatprep.subr.bf16.mxu0 %v1835_v2  ;;  %1733 = vmatprep.subr.bf16.mxu1 %v1835_v2 }
  0x2e   : >> { %v1272_v6 = vsel %vm454_vm4, %v1267_v50, %v1271_v51 }
  0x32   : >> { %1718 = vmatmul.mubr.msk.bf16.vlgmr.msra.gmra.mrb[12].mxu0 %vm337_vm3, %v734_v62  ;;  %1724 = vmatmul.mubr.msk.bf16.vlgmr.msra.gmra.mrb[12].mxu1 %vm337_vm3, %v808_v1 }
  0x33   : >> { %1728 = vmatpush3.bf16.msra.mxu0 %v875_v63  ;;  %1734 = vmatpush3.bf16.msra.mxu1 %v935_v3 }
  0x34   : >> { %1729 = vmatprep.mubr.msk.bf16.mxu0 %vm1837_vm2, %v1835_v2  ;;  %1735 = vmatprep.mubr.msk.bf16.mxu1 %vm1837_vm2, %v1835_v2 }
  0x35   : >> { %1739 = vmatprep.subr.bf16.mxu0 %v1835_v2  ;;  %1745 = vmatprep.subr.bf16.mxu1 %v1835_v2 }
  0x3a   : >> { %1730 = vmatmul.mubr.msk.bf16.vlgmr.msra.gmra.mrb[16].mxu0 %vm337_vm3, %v1807_v12  ;;  %1736 = vmatmul.mubr.msk.bf16.vlgmr.msra.gmra.mrb[16].mxu1 %vm337_vm3, %v1808_v13 }
  0x3b   : >> { %1740 = vmatpush3.bf16.msra.mxu0 %v1009_v14  ;;  %1746 = vmatpush3.bf16.msra.mxu1 %v1083_v18 }
  0x3c   : >> { %1741 = vmatprep.mubr.msk.bf16.mxu0 %vm1837_vm2, %v1835_v2  ;;  %1747 = vmatprep.mubr.msk.bf16.mxu1 %vm1837_vm2, %v1835_v2 }
  0x3d   : >> { %1751 = vmatprep.subr.bf16.mxu0 %v1835_v2  ;;  %1757 = vmatprep.subr.bf16.mxu1 %v1835_v2 }
  0x42   : >> { %1742 = vmatmul.mubr.msk.bf16.vlgmr.msra.gmra.mrb[20].mxu0 %vm337_vm3, %v1004_v28  ;;  %1748 = vmatmul.mubr.msk.bf16.vlgmr.msra.gmra.mrb[20].mxu1 %vm337_vm3, %v1078_v31 }
  0x43   : >> { %1752 = vmatpush3.bf16.msra.mxu0 %v1143_v29  ;;  %1758 = vmatpush3.bf16.msra.mxu1 %v1203_v32 }
  0x44   : >> { %1753 = vmatprep.mubr.msk.bf16.mxu0 %vm1837_vm2, %v1835_v2  ;;  %1759 = vmatprep.mubr.msk.bf16.mxu1 %vm1837_vm2, %v1835_v2 }
  0x45   : >> { %1763 = vmatprep.subr.bf16.mxu0 %v1835_v2  ;;  %1769 = vmatprep.subr.bf16.mxu1 %v1835_v2 }
  0x4a   : >> { %1754 = vmatmul.mubr.msk.bf16.vlgmr.msra.gmra.mrb[24].mxu0 %vm337_vm3, %v1813_v40  ;;  %1760 = vmatmul.mubr.msk.bf16.vlgmr.msra.gmra.mrb[24].mxu1 %vm337_vm3, %v1814_v41 }
  0x4b   : >> { %1764 = vmatpush3.bf16.msra.mxu0 %v1277_v42  ;;  %1770 = vmatpush3.bf16.msra.mxu1 %v1351_v46 }
  0x4c   : >> { %1765 = vmatprep.mubr.msk.bf16.mxu0 %vm1837_vm2, %v1835_v2  ;;  %1771 = vmatprep.mubr.msk.bf16.mxu1 %vm1837_vm2, %v1835_v2 }
  0x52   : >> { %1766 = vmatmul.mubr.msk.bf16.vlgmr.msra.gmra.mrb[28].mxu0 %vm337_vm3, %v1272_v6  ;;  %1772 = vmatmul.mubr.msk.bf16.vlgmr.msra.gmra.mrb[28].mxu1 %vm337_vm3, %v1346_v54 }
  0xed   : >> { %v382_v55 = vpop.f32.mrb[0].mxu0  ;;  %v434_v56 = vpop.f32.mrb[0].mxu1 }
  0xee   : >> { %v435_v57 = vadd.f32 %v434_v56, %v382_v55  ;;  %v1683_v58 = vpop.f32.mrb[1].mxu0  ;;  %v1689_v59 = vpop.f32.mrb[1].mxu1 }
  0xef   : >> { %v385_v60 = vpop.f32.mrb[2].mxu0  ;;  %v437_v61 = vpop.f32.mrb[2].mxu1 }
  0xf0   : >> { %v438_v62 = vadd.f32 %v437_v61, %v385_v60  ;;  %v1684_v63 = vpop.f32.mrb[3].mxu0  ;;  %v1690_v1 = vpop.f32.mrb[3].mxu1 }
  0xf5   : >> { %v507_v3 = vpop.f32.mrb[4].mxu0  ;;  %v581_v4 = vpop.f32.mrb[4].mxu1 }
  0xf6   : >> { %v514_v2 = vadd.f32 %v507_v3, %v435_v57  ;;  %v1695_v5 = vpop.f32.mrb[5].mxu0  ;;  %v1701_v7 = vpop.f32.mrb[5].mxu1 }
  0xf7   : >> { %v510_v8 = vpop.f32.mrb[6].mxu0  ;;  %v584_v11 = vpop.f32.mrb[6].mxu1 }
  0xf8   : >> { %v588_v9 = vadd.f32 %v581_v4, %v514_v2  ;;  %v515_v10 = vadd.f32 %v510_v8, %v438_v62  ;;  %v1696_v12 = vpop.f32.mrb[7].mxu0  ;;  %v1702_v13 = vpop.f32.mrb[7].mxu1 }
  0xfa   : >> { %v589_v14 = vadd.f32 %v584_v11, %v515_v10 }
  0xfd   : >> { %v641_v15 = vpop.f32.mrb[8].mxu0  ;;  %v701_v17 = vpop.f32.mrb[8].mxu1 }
  0xfe   : >> { %v648_v16 = vadd.f32 %v641_v15, %v588_v9  ;;  %v1707_v18 = vpop.f32.mrb[9].mxu0  ;;  %v1713_v19 = vpop.f32.mrb[9].mxu1 }
  0xff   : >> { %v644_v20 = vpop.f32.mrb[10].mxu0  ;;  %v704_v23 = vpop.f32.mrb[10].mxu1 }
 0x100   : >> { %v708_v21 = vadd.f32 %v701_v17, %v648_v16  ;;  %v649_v22 = vadd.f32 %v644_v20, %v589_v14  ;;  %v1708_v24 = vpop.f32.mrb[11].mxu0  ;;  %v1714_v25 = vpop.f32.mrb[11].mxu1 }
 0x102   : >> { %v709_v26 = vadd.f32 %v704_v23, %v649_v22 }
 0x105   : >> { %v775_v27 = vpop.f32.mrb[12].mxu0  ;;  %v849_v29 = vpop.f32.mrb[12].mxu1 }
 0x106   : >> { %v782_v28 = vadd.f32 %v775_v27, %v708_v21  ;;  %v1719_v30 = vpop.f32.mrb[13].mxu0  ;;  %v1725_v31 = vpop.f32.mrb[13].mxu1 }
 0x107   : >> { %v778_v32 = vpop.f32.mrb[14].mxu0  ;;  %v852_v35 = vpop.f32.mrb[14].mxu1 }
 0x108   : >> { %v856_v33 = vadd.f32 %v849_v29, %v782_v28  ;;  %v783_v34 = vadd.f32 %v778_v32, %v709_v26  ;;  %v1720_v36 = vpop.f32.mrb[15].mxu0  ;;  %v1726_v37 = vpop.f32.mrb[15].mxu1 }
 0x10a   : >> { %v857_v38 = vadd.f32 %v852_v35, %v783_v34 }
 0x10d   : >> { %v911_v39 = vpop.f32.mrb[16].mxu0  ;;  %v971_v41 = vpop.f32.mrb[16].mxu1 }
 0x10e   : >> { %v918_v40 = vadd.f32 %v911_v39, %v856_v33  ;;  %v1731_v42 = vpop.f32.mrb[17].mxu0  ;;  %v1737_v43 = vpop.f32.mrb[17].mxu1 }
 0x10f   : >> { %v914_v44 = vpop.f32.mrb[18].mxu0  ;;  %v974_v47 = vpop.f32.mrb[18].mxu1 }
 0x110   : >> { %v978_v45 = vadd.f32 %v971_v41, %v918_v40  ;;  %v919_v46 = vadd.f32 %v914_v44, %v857_v38  ;;  %v1732_v48 = vpop.f32.mrb[19].mxu0  ;;  %v1738_v49 = vpop.f32.mrb[19].mxu1 }
 0x112   : >> { %v979_v50 = vadd.f32 %v974_v47, %v919_v46 }
 0x115   : >> { %v1045_v51 = vpop.f32.mrb[20].mxu0  ;;  %v1119_v53 = vpop.f32.mrb[20].mxu1 }
 0x116   : >> { %v1052_v52 = vadd.f32 %v1045_v51, %v978_v45  ;;  %v1743_v6 = vpop.f32.mrb[21].mxu0  ;;  %v1749_v54 = vpop.f32.mrb[21].mxu1 }
 0x117   : >> { %v1048_v55 = vpop.f32.mrb[22].mxu0  ;;  %v1122_v58 = vpop.f32.mrb[22].mxu1 }
 0x118   : >> { %v1126_v56 = vadd.f32 %v1119_v53, %v1052_v52  ;;  %v1053_v57 = vadd.f32 %v1048_v55, %v979_v50  ;;  %v1744_v59 = vpop.f32.mrb[23].mxu0  ;;  %v1750_v60 = vpop.f32.mrb[23].mxu1 }
 0x11a   : >> { %v1127_v61 = vadd.f32 %v1122_v58, %v1053_v57 }
 0x11d   : >> { %v1179_v62 = vpop.f32.mrb[24].mxu0  ;;  %v1239_v1 = vpop.f32.mrb[24].mxu1 }
 0x11e   : >> { %v1186_v63 = vadd.f32 %v1179_v62, %v1126_v56  ;;  %v1755_v3 = vpop.f32.mrb[25].mxu0  ;;  %v1761_v2 = vpop.f32.mrb[25].mxu1 }
 0x11f   : >> { %v1182_v4 = vpop.f32.mrb[26].mxu0  ;;  %v1242_v8 = vpop.f32.mrb[26].mxu1 }
 0x120   : >> { %v1246_v5 = vadd.f32 %v1239_v1, %v1186_v63  ;;  %v1187_v7 = vadd.f32 %v1182_v4, %v1127_v61  ;;  %v1756_v9 = vpop.f32.mrb[27].mxu0  ;;  %v1762_v10 = vpop.f32.mrb[27].mxu1 }
 0x122   : >> { %v1247_v11 = vadd.f32 %v1242_v8, %v1187_v7 }
 0x125   : >> { %v1313_v12 = vpop.f32.mrb[28].mxu0  ;;  %v1387_v14 = vpop.f32.mrb[28].mxu1 }
 0x126   : >> { %v1320_v13 = vadd.f32 %v1313_v12, %v1246_v5  ;;  %v1767_v15 = vpop.f32.mrb[29].mxu0  ;;  %v1773_v16 = vpop.f32.mrb[29].mxu1 }
 0x127   : >> { %v1316_v17 = vpop.f32.mrb[30].mxu0  ;;  %v1390_v20 = vpop.f32.mrb[30].mxu1 }
 0x128   : >> { %v1394_v18 = vadd.f32 %v1387_v14, %v1320_v13  ;;  %v1321_v19 = vadd.f32 %v1316_v17, %v1247_v11  ;;  %v1768_v21 = vpop.f32.mrb[31].mxu0  ;;  %v1774_v22 = vpop.f32.mrb[31].mxu1 }
 0x12a   : >> { %v1402_v23 = vadd.f32 %v1884_v0, %v1394_v18  ;;  %v1395_v24 = vadd.f32 %v1390_v20, %v1321_v19 }
 0x12c   : >> { %vm1404_vm5 = vcmp.ge.f32.partialorder %v1402_v23, 0.0  ;;  %v1406_v25 = vmul.f32 0.2, %v1402_v23  ;;  %v1403_v26 = vadd.f32 %v1884_v0, %v1395_v24 }
 0x12d   : > { %318 = sbr.rel (!%p316_p4) target bundleno = 18 (0x12), region = 114 }
 0x12e   : >> { %v1408_v27 = vsel %vm1404_vm5, %v1402_v23, %v1406_v25  ;;  %vm1405_vm7 = vcmp.ge.f32.partialorder %v1403_v26, 0.0  ;;  %v1407_v28 = vmul.f32 0.2, %v1403_v26 }
 0x12f   : >> { %v1644_v29 = vpack.c.bf16 %v1408_v27, %v1408_v27 }
 0x130   : >> { %v1409_v30 = vsel %vm1405_vm7, %v1403_v26, %v1407_v28 }
 0x131   : >> { %1422 = vst.msk [vmem:[%s1420_s7] sm:$0xf] %vm1421_vm6, %v1644_v29  ;;  %v1645_v31 = vpack.c.bf16 %v1409_v30, %v1409_v30 }
 0x133   : >> { %1423 = vst.msk [vmem:[%s1420_s7 + $0x4] sm:$0xf] %vm1421_vm6, %v1645_v31 }
 0x134 PF: > { %s16_s21 = sadd.s32 1, %s1829_s21  }
 0x135   : > { %p13_p5 = scmp.ge.s32.totalorder %s16_s21, 4  }
 0x137   :  { %15 = sbr.rel (!%p13_p5) target bundleno = 1 (0x1), region = 125 }

// kernel: d_forward.6
= control target key start
LH: loop header
LB: loop body
LE: loop exit
PB: predicated region body
PF: predicated region fallthrough
CT: control target
= control target key end

     0   :  { %s1796_s24 = smov 0   ;;  %s2048_s0 = inlined_call_operand.vmem [shape: bf16[2,9,9,8], index: 0, kind: input, shape index: {}]   ;;  %s2049_s1 = inlined_call_operand.vmem [shape: bf16[2,9,9,8], index: 1, kind: input, shape index: {}]   ;;  %s2050_s2 = inlined_call_operand.vmem [shape: bf16[2,9,9,8], index: 2, kind: input, shape index: {}]   ;;  %s2051_s3 = inlined_call_operand.vmem [shape: bf16[2,9,9,8], index: 3, kind: input, shape index: {}]   ;;  %s2052_s4 = inlined_call_operand.vmem [shape: bf16[16,8,16], index: 4, kind: input, shape index: {}]   ;;  %s2053_s5 = inlined_call_operand.vmem [shape: f32[1,16], index: 5, kind: input, shape index: {}]   ;;  %s2054_s6 = inlined_call_operand.vmem [shape: bf16[2,8,8,16], index: 6, kind: output, shape index: {0}]   ;;  %s2055_s7 = inlined_call_operand.vmem [shape: f32[2,2,16], index: 7, kind: output, shape index: {1}]  }
   0x1 LB: > { %s1470_s25 = sadd.s32 4294967295, %s1740_s24   ;;  %p1474_p0 = scmp.ge.s32.totalorder %s1740_s24, 1  ;;  %s1740_s24 = sphi %s1796_s24, %s18_s24  }
   0x2   : > { %p270_p1 = scmp.lt.s32.totalorder %s1740_s24, 3 }
   0x4   : > { %p271_p2 = pnand %p1474_p0, %p270_p1 }
   0x5   : > { %p321_p3 = scmp.lt.s32.totalorder (!%p271_p2), %s1470_s25, 1  ;;  %v1807_v0 = vld [vmem:[%s2053_s5] ss:$0 sm:$0xff] (!%p271_p2)  ;;  %v1837_v1 = vmov (!%p271_p2), 0.0   ;;  %v1839_v2 = vmov (!%p271_p2), 0.0   ;;  %s1841_s27 = smov (!%p271_p2), 0  }
   0x6   : > { %274 = sbr.rel (%p271_p2) target bundleno = 316 (0x13c), region = 44 }
   0xd   : > { %s2059_s25 = smov (!%p321_p3, %s1470_s25), 1 }
   0xe   : > { %s1809_s28 = smul.u32 72, %s2059_s25  ;;  %s1546_s29 = sshll.u32 %s2059_s25, 5 }
   0xf   : > { %s1814_s9 = scalar_lea.vmem %s2054_s6, %s1546_s29  ;;  %s1481_s10 = sshll.u32 %s2059_s25, 1 }
  0x10   : > { %s325_s13 = scalar_lea.vmem %s2048_s0, %s1809_s28  ;;  %s330_s16 = scalar_lea.vmem %s2049_s1, %s1809_s28 }
  0x11   : > { %s335_s19 = scalar_lea.vmem %s2050_s2, %s1809_s28  ;;  %s340_s22 = scalar_lea.vmem %s2051_s3, %s1809_s28 }
  0x12   : > { %s1835_s25 = scalar_lea.vmem %s2055_s7, %s1481_s10 }
  0x13 LB: >> { %v1485_v3 = vld [vmem:[%s2052_s4 + $0x4] sm:$0xf]  ;;  %vm374_vm0 = vcmask 1043456   ;;  %v364_v4 = vld [vmem:[%s2052_s4] sm:$0xf]  ;;  %v1754_v5 = vmov 0.0   ;;  %s1752_s27 = sphi %s1841_s27, %s357_s27   ;;  %v1748_v2 = vphi %v1839_v2, %v2057_v2   ;;  %v1744_v1 = vphi %v1837_v1, %v2056_v1  }
  0x14   : >> { %1583 = vmatprep.subr.bf16.mxu0 %v1754_v5  ;;  %1589 = vmatprep.subr.bf16.mxu1 %v1754_v5  ;;  %v376_v6 = vsel %vm374_vm0, %v1485_v3, 0  ;;  %v422_v7 = vsel %vm374_vm0, %v364_v4, 0  ;;  %v1488_v8 = vld [vmem:[%s2052_s4 + $0x8] sm:$0xf]  ;;  %s1866_s14 = sshll.u32 %s1752_s27, 3  ;;  %vm370_vm1 = vcmask 64512  }
  0x15   : >> { %1584 = vmatpush3.bf16.msra.mxu0 %v376_v6  ;;  %1590 = vmatpush3.bf16.msra.mxu1 %v422_v7  ;;  %v1491_v9 = vld [vmem:[%s2052_s4 + $0xc] sm:$0xf]  ;;  %vm1755_vm2 = vmmov 0   ;;  %s1881_s21 = scalar_lea.vmem %s330_s16, %s1866_s14  ;;  %s1889_s29 = scalar_lea.vmem %s325_s13, %s1866_s14  ;;  %v484_v10 = vsel %vm374_vm0, %v1488_v8, 0  ;;  %v1495_v20 = vld [vmem:[%s2052_s4 + $0x10] sm:$0xf] }
  0x16   : >> { %1585 = vmatprep.mubr.msk.bf16.mxu0 %vm1755_vm2, %v1754_v5  ;;  %1591 = vmatprep.mubr.msk.bf16.mxu1 %vm1755_vm2, %v1754_v5  ;;  %v547_v11 = vsel %vm374_vm0, %v1491_v9, 0  ;;  %v367_v12 = vld [vmem:[%s1881_s21] sm:$0xf]  ;;  %s1911_s10 = scalar_lea.vmem %s335_s19, %s1866_s14  ;;  %v1498_v22 = vld [vmem:[%s2052_s4 + $0x14] sm:$0xf]  ;;  %s1927_s23 = scalar_lea.vmem %s340_s22, %s1866_s14  ;;  %v599_v25 = vsel %vm374_vm0, %v1495_v20, 0 }
  0x17   : >> { %v363_v13 = vld [vmem:[%s1889_s29] sm:$0xf]  ;;  %1595 = vmatprep.subr.bf16.mxu0 %v1754_v5  ;;  %1601 = vmatprep.subr.bf16.mxu1 %v1754_v5  ;;  %v651_v27 = vsel %vm374_vm0, %v1498_v22, 0  ;;  %v1500_v30 = vld [vmem:[%s2052_s4 + $0x18] sm:$0xf]  ;;  %vm1294_vm3 = vcmask 130048  }
  0x18   : >> { %1586 = vmatmul.mubr.msk.bf16.vlgmr.msra.gmra.mrb[0].mxu0 %vm370_vm1, %v367_v12  ;;  %1592 = vmatmul.mubr.msk.bf16.vlgmr.msra.gmra.mrb[0].mxu1 %vm370_vm1, %v363_v13  ;;  %v1714_v14 = vld [vmem:[%s1889_s29] sm:$0x1f]   ;;  %v1503_v31 = vld [vmem:[%s2052_s4 + $0x1c] sm:$0xf]  ;;  %v714_v36 = vsel %vm374_vm0, %v1500_v30, 0  ;;  %vm1292_vm4 = vcmask 125952  }
  0x19   : >> { %1596 = vmatpush3.bf16.msra.mxu0 %v484_v10  ;;  %1602 = vmatpush3.bf16.msra.mxu1 %v547_v11  ;;  %v1715_v15 = vld [vmem:[%s1881_s21] sm:$0x1f]   ;;  %v474_v16 = vshrl.u32 %v1714_v14, 16  ;;  %v476_v17 = vshll.u32 %v1714_v14, 16  ;;  %v777_v37 = vsel %vm374_vm0, %v1503_v31, 0 }
  0x1a   : >> { %1597 = vmatprep.mubr.msk.bf16.mxu0 %vm1755_vm2, %v1754_v5  ;;  %1603 = vmatprep.mubr.msk.bf16.mxu1 %vm1755_vm2, %v1754_v5  ;;  %v537_v18 = vshrl.u32 %v1715_v15, 16  ;;  %v539_v19 = vshll.u32 %v1715_v15, 16  ;;  %v1716_v28 = vld [vmem:[%s1911_s10] sm:$0x1f]   ;;  %v1718_v48 = vld [vmem:[%s1889_s29 + $0x8] sm:$0x1f]  }
  0x1b   : >> { %1607 = vmatprep.subr.bf16.mxu0 %v1754_v5  ;;  %1613 = vmatprep.subr.bf16.mxu1 %v1754_v5  ;;  %v478_v21 = vrot.slane %v476_v17, 1  ;;  %v1717_v29 = vld [vmem:[%s1927_s23] sm:$0x1f]   ;;  %v706_v32 = vshll.u32 %v1716_v28, 16  ;;  %v704_v38 = vshrl.u32 %v1716_v28, 16  ;;  %v938_v52 = vshll.u32 %v1718_v48, 16 }
  0x1c   : >> { %v541_v23 = vrot.slane %v539_v19, 1  ;;  %v592_v33 = vld [vmem:[%s1911_s10] sm:$0xf]  ;;  %v769_v34 = vshll.u32 %v1717_v29, 16  ;;  %v767_v40 = vshrl.u32 %v1717_v29, 16  ;;  %v936_v58 = vshrl.u32 %v1718_v48, 16 }
  0x1d   : >> { %v479_v24 = vor.u32 %v478_v21, %v474_v16  ;;  %v644_v35 = vld [vmem:[%s1927_s23] sm:$0xf]  ;;  %v708_v39 = vrot.slane %v706_v32, 1  ;;  %v1512_v44 = vld [vmem:[%s2052_s4 + $0x24] sm:$0xf]  ;;  %v940_v59 = vrot.slane %v938_v52, 1 }
  0x1e   : >> { %v542_v26 = vor.u32 %v541_v23, %v537_v18  ;;  %v771_v41 = vrot.slane %v769_v34, 1  ;;  %v1508_v42 = vld [vmem:[%s2052_s4 + $0x20] sm:$0xf]  ;;  %v883_v47 = vsel %vm374_vm0, %v1512_v44, 0  ;;  %v1719_v49 = vld [vmem:[%s1881_s21 + $0x8] sm:$0x1f]  }
  0x1f   : >> { %v709_v43 = vor.u32 %v708_v39, %v704_v38  ;;  %v831_v46 = vsel %vm374_vm0, %v1508_v42, 0  ;;  %v1516_v50 = vld [vmem:[%s2052_s4 + $0x28] sm:$0xf]  ;;  %v1521_v51 = vld [vmem:[%s2052_s4 + $0x2c] sm:$0xf]  ;;  %v1001_v54 = vshll.u32 %v1719_v49, 16  ;;  %v941_v63 = vor.u32 %v940_v59, %v936_v58 }
  0x20   : >> { %1598 = vmatmul.mubr.msk.bf16.vlgmr.msra.gmra.mrb[4].mxu0 %vm370_vm1, %v479_v24  ;;  %1604 = vmatmul.mubr.msk.bf16.vlgmr.msra.gmra.mrb[4].mxu1 %vm370_vm1, %v542_v26  ;;  %v772_v45 = vor.u32 %v771_v41, %v767_v40  ;;  %v1507_v53 = vld [vmem:[%s1889_s29 + $0x8] sm:$0xf]  ;;  %v946_v56 = vsel %vm374_vm0, %v1516_v50, 0  ;;  %v1009_v57 = vsel %vm374_vm0, %v1521_v51, 0  ;;  %v999_v60 = vshrl.u32 %v1719_v49, 16 }
  0x21   : >> { %1608 = vmatpush3.bf16.msra.mxu0 %v599_v25  ;;  %1614 = vmatpush3.bf16.msra.mxu1 %v651_v27  ;;  %v1511_v55 = vld [vmem:[%s1881_s21 + $0x8] sm:$0xf]  ;;  %v1003_v61 = vrot.slane %v1001_v54, 1  ;;  %v1526_v62 = vld [vmem:[%s2052_s4 + $0x30] sm:$0xf] }
  0x22   : >> { %1609 = vmatprep.mubr.msk.bf16.mxu0 %vm1755_vm2, %v1754_v5  ;;  %1615 = vmatprep.mubr.msk.bf16.mxu1 %vm1755_vm2, %v1754_v5  ;;  %v1530_v3 = vld [vmem:[%s2052_s4 + $0x34] sm:$0xf]  ;;  %v1061_v6 = vsel %vm374_vm0, %v1526_v62, 0  ;;  %v1720_v8 = vld [vmem:[%s1911_s10 + $0x8] sm:$0x1f]  }
  0x23   : >> { %1619 = vmatprep.subr.bf16.mxu0 %v1754_v5  ;;  %1625 = vmatprep.subr.bf16.mxu1 %v1754_v5  ;;  %v1004_v4 = vor.u32 %v1003_v61, %v999_v60  ;;  %v1113_v7 = vsel %vm374_vm0, %v1530_v3, 0  ;;  %v1721_v9 = vld [vmem:[%s1927_s23 + $0x8] sm:$0x1f]   ;;  %v1534_v10 = vld [vmem:[%s2052_s4 + $0x38] sm:$0xf]  ;;  %v1168_v12 = vshll.u32 %v1720_v8, 16 }
  0x24   : >> { %v1539_v11 = vld [vmem:[%s2052_s4 + $0x3c] sm:$0xf]  ;;  %v1525_v13 = vld [vmem:[%s1911_s10 + $0x8] sm:$0xf]  ;;  %v1231_v14 = vshll.u32 %v1721_v9, 16  ;;  %v1176_v16 = vsel %vm374_vm0, %v1534_v10, 0 }
  0x25   : >> { %v1529_v15 = vld [vmem:[%s1927_s23 + $0x8] sm:$0xf]  ;;  %v1239_v17 = vsel %vm374_vm0, %v1539_v11, 0  ;;  %v1166_v18 = vshrl.u32 %v1720_v8, 16  ;;  %v1170_v19 = vrot.slane %v1168_v12, 1  ;;  %v1229_v20 = vshrl.u32 %v1721_v9, 16 }
  0x26   : >> { %v1233_v21 = vrot.slane %v1231_v14, 1  ;;  %s1543_s10 = sshll.u32 %s1752_s27, 2  ;;  %s357_s27 = sadd.s32 1, %s1752_s27  }
  0x27   : >> { %v1171_v22 = vor.u32 %v1170_v19, %v1166_v18  ;;  %s1291_s23 = scalar_lea.vmem %s1814_s9, %s1543_s10  ;;  %p354_p4 = scmp.ge.s32.totalorder %s357_s27, 8  }
  0x28   : >> { %1610 = vmatmul.mubr.msk.bf16.vlgmr.msra.gmra.mrb[8].mxu0 %vm370_vm1, %v592_v33  ;;  %1616 = vmatmul.mubr.msk.bf16.vlgmr.msra.gmra.mrb[8].mxu1 %vm370_vm1, %v644_v35  ;;  %v1234_v23 = vor.u32 %v1233_v21, %v1229_v20  ;;  %vm1312_vm5 = vcmask (%p354_p4), 122880  }
  0x29   : >> { %1620 = vmatpush3.bf16.msra.mxu0 %v714_v36  ;;  %1626 = vmatpush3.bf16.msra.mxu1 %v777_v37 }
  0x2a   : >> { %1621 = vmatprep.mubr.msk.bf16.mxu0 %vm1755_vm2, %v1754_v5  ;;  %1627 = vmatprep.mubr.msk.bf16.mxu1 %vm1755_vm2, %v1754_v5 }
  0x2b   : >> { %1631 = vmatprep.subr.bf16.mxu0 %v1754_v5  ;;  %1637 = vmatprep.subr.bf16.mxu1 %v1754_v5 }
  0x30   : >> { %1622 = vmatmul.mubr.msk.bf16.vlgmr.msra.gmra.mrb[12].mxu0 %vm370_vm1, %v709_v43  ;;  %1628 = vmatmul.mubr.msk.bf16.vlgmr.msra.gmra.mrb[12].mxu1 %vm370_vm1, %v772_v45 }
  0x31   : >> { %1632 = vmatpush3.bf16.msra.mxu0 %v831_v46  ;;  %1638 = vmatpush3.bf16.msra.mxu1 %v883_v47 }
  0x32   : >> { %1633 = vmatprep.mubr.msk.bf16.mxu0 %vm1755_vm2, %v1754_v5  ;;  %1639 = vmatprep.mubr.msk.bf16.mxu1 %vm1755_vm2, %v1754_v5 }
  0x33   : >> { %1643 = vmatprep.subr.bf16.mxu0 %v1754_v5  ;;  %1649 = vmatprep.subr.bf16.mxu1 %v1754_v5 }
  0x38   : >> { %1634 = vmatmul.mubr.msk.bf16.vlgmr.msra.gmra.mrb[16].mxu0 %vm370_vm1, %v1507_v53  ;;  %1640 = vmatmul.mubr.msk.bf16.vlgmr.msra.gmra.mrb[16].mxu1 %vm370_vm1, %v1511_v55 }
  0x39   : >> { %1644 = vmatpush3.bf16.msra.mxu0 %v946_v56  ;;  %1650 = vmatpush3.bf16.msra.mxu1 %v1009_v57 }
  0x3a   : >> { %1645 = vmatprep.mubr.msk.bf16.mxu0 %vm1755_vm2, %v1754_v5  ;;  %1651 = vmatprep.mubr.msk.bf16.mxu1 %vm1755_vm2, %v1754_v5 }
  0x3b   : >> { %1655 = vmatprep.subr.bf16.mxu0 %v1754_v5  ;;  %1661 = vmatprep.subr.bf16.mxu1 %v1754_v5 }
  0x40   : >> { %1646 = vmatmul.mubr.msk.bf16.vlgmr.msra.gmra.mrb[20].mxu0 %vm370_vm1, %v941_v63  ;;  %1652 = vmatmul.mubr.msk.bf16.vlgmr.msra.gmra.mrb[20].mxu1 %vm370_vm1, %v1004_v4 }
  0x41   : >> { %1656 = vmatpush3.bf16.msra.mxu0 %v1061_v6  ;;  %1662 = vmatpush3.bf16.msra.mxu1 %v1113_v7 }
  0x42   : >> { %1657 = vmatprep.mubr.msk.bf16.mxu0 %vm1755_vm2, %v1754_v5  ;;  %1663 = vmatprep.mubr.msk.bf16.mxu1 %vm1755_vm2, %v1754_v5 }
  0x43   : >> { %1667 = vmatprep.subr.bf16.mxu0 %v1754_v5  ;;  %1673 = vmatprep.subr.bf16.mxu1 %v1754_v5 }
  0x48   : >> { %1658 = vmatmul.mubr.msk.bf16.vlgmr.msra.gmra.mrb[24].mxu0 %vm370_vm1, %v1525_v13  ;;  %1664 = vmatmul.mubr.msk.bf16.vlgmr.msra.gmra.mrb[24].mxu1 %vm370_vm1, %v1529_v15 }
  0x49   : >> { %1668 = vmatpush3.bf16.msra.mxu0 %v1176_v16  ;;  %1674 = vmatpush3.bf16.msra.mxu1 %v1239_v17 }
  0x4a   : >> { %1669 = vmatprep.mubr.msk.bf16.mxu0 %vm1755_vm2, %v1754_v5  ;;  %1675 = vmatprep.mubr.msk.bf16.mxu1 %vm1755_vm2, %v1754_v5 }
  0x50   : >> { %1670 = vmatmul.mubr.msk.bf16.vlgmr.msra.gmra.mrb[28].mxu0 %vm370_vm1, %v1171_v22  ;;  %1676 = vmatmul.mubr.msk.bf16.vlgmr.msra.gmra.mrb[28].mxu1 %vm370_vm1, %v1234_v23 }
  0xeb   : >> { %v412_v24 = vpop.f32.mrb[0].mxu0  ;;  %v458_v25 = vpop.f32.mrb[0].mxu1 }
  0xec   : >> { %v459_v26 = vadd.f32 %v458_v25, %v412_v24  ;;  %v1587_v27 = vpop.f32.mrb[1].mxu0  ;;  %v1593_v28 = vpop.f32.mrb[1].mxu1 }
  0xed   : >> { %v415_v29 = vpop.f32.mrb[2].mxu0  ;;  %v461_v30 = vpop.f32.mrb[2].mxu1 }
  0xee   : >> { %v1588_v31 = vpop.f32.mrb[3].mxu0  ;;  %v1594_v32 = vpop.f32.mrb[3].mxu1 }
  0xf3   : >> { %v520_v33 = vpop.f32.mrb[4].mxu0  ;;  %v583_v35 = vpop.f32.mrb[4].mxu1 }
  0xf4   : >> { %v526_v34 = vadd.f32 %v520_v33, %v459_v26  ;;  %v1599_v36 = vpop.f32.mrb[5].mxu0  ;;  %v1605_v5 = vpop.f32.mrb[5].mxu1 }
  0xf5   : >> { %v523_v37 = vpop.f32.mrb[6].mxu0  ;;  %v586_v39 = vpop.f32.mrb[6].mxu1 }
  0xf6   : >> { %v589_v38 = vadd.f32 %v583_v35, %v526_v34  ;;  %v1600_v40 = vpop.f32.mrb[7].mxu0  ;;  %v1606_v41 = vpop.f32.mrb[7].mxu1 }
  0xfb   : >> { %v635_v42 = vpop.f32.mrb[8].mxu0  ;;  %v687_v44 = vpop.f32.mrb[8].mxu1 }
  0xfc   : >> { %v641_v43 = vadd.f32 %v635_v42, %v589_v38  ;;  %v1611_v45 = vpop.f32.mrb[9].mxu0  ;;  %v1617_v46 = vpop.f32.mrb[9].mxu1 }
  0xfd   : >> { %v638_v47 = vpop.f32.mrb[10].mxu0  ;;  %v690_v49 = vpop.f32.mrb[10].mxu1 }
  0xfe   : >> { %v693_v48 = vadd.f32 %v687_v44, %v641_v43  ;;  %v1612_v50 = vpop.f32.mrb[11].mxu0  ;;  %v1618_v51 = vpop.f32.mrb[11].mxu1 }
 0x103   : >> { %v750_v52 = vpop.f32.mrb[12].mxu0  ;;  %v813_v54 = vpop.f32.mrb[12].mxu1 }
 0x104   : >> { %v756_v53 = vadd.f32 %v750_v52, %v693_v48  ;;  %v1623_v55 = vpop.f32.mrb[13].mxu0  ;;  %v1629_v56 = vpop.f32.mrb[13].mxu1 }
 0x105   : >> { %v753_v57 = vpop.f32.mrb[14].mxu0  ;;  %v816_v59 = vpop.f32.mrb[14].mxu1 }
 0x106   : >> { %v819_v58 = vadd.f32 %v813_v54, %v756_v53  ;;  %v1624_v60 = vpop.f32.mrb[15].mxu0  ;;  %v1630_v61 = vpop.f32.mrb[15].mxu1 }
 0x10b   : >> { %v867_v62 = vpop.f32.mrb[16].mxu0  ;;  %v919_v3 = vpop.f32.mrb[16].mxu1 }
 0x10c   : >> { %v873_v63 = vadd.f32 %v867_v62, %v819_v58  ;;  %v1635_v4 = vpop.f32.mrb[17].mxu0  ;;  %v1641_v6 = vpop.f32.mrb[17].mxu1 }
 0x10d   : >> { %v870_v7 = vpop.f32.mrb[18].mxu0  ;;  %v922_v9 = vpop.f32.mrb[18].mxu1 }
 0x10e   : >> { %v925_v8 = vadd.f32 %v919_v3, %v873_v63  ;;  %v1636_v10 = vpop.f32.mrb[19].mxu0  ;;  %v1642_v11 = vpop.f32.mrb[19].mxu1 }
 0x113   : >> { %v982_v12 = vpop.f32.mrb[20].mxu0  ;;  %v1045_v14 = vpop.f32.mrb[20].mxu1 }
 0x114   : >> { %v988_v13 = vadd.f32 %v982_v12, %v925_v8  ;;  %v1647_v15 = vpop.f32.mrb[21].mxu0  ;;  %v1653_v16 = vpop.f32.mrb[21].mxu1 }
 0x115   : >> { %v985_v17 = vpop.f32.mrb[22].mxu0  ;;  %v1048_v19 = vpop.f32.mrb[22].mxu1 }
 0x116   : >> { %v1051_v18 = vadd.f32 %v1045_v14, %v988_v13  ;;  %v1648_v20 = vpop.f32.mrb[23].mxu0  ;;  %v1654_v21 = vpop.f32.mrb[23].mxu1 }
 0x11b   : >> { %v1097_v22 = vpop.f32.mrb[24].mxu0  ;;  %v1149_v24 = vpop.f32.mrb[24].mxu1 }
 0x11c   : >> { %v1103_v23 = vadd.f32 %v1097_v22, %v1051_v18  ;;  %v1659_v25 = vpop.f32.mrb[25].mxu0  ;;  %v1665_v26 = vpop.f32.mrb[25].mxu1 }
 0x11d   : >> { %v1100_v27 = vpop.f32.mrb[26].mxu0  ;;  %v1152_v29 = vpop.f32.mrb[26].mxu1 }
 0x11e   : >> { %v1155_v28 = vadd.f32 %v1149_v24, %v1103_v23  ;;  %v1660_v30 = vpop.f32.mrb[27].mxu0  ;;  %v1666_v31 = vpop.f32.mrb[27].mxu1 }
 0x123   : >> { %v1212_v32 = vpop.f32.mrb[28].mxu0  ;;  %v1275_v34 = vpop.f32.mrb[28].mxu1 }
 0x124   : >> { %v1218_v33 = vadd.f32 %v1212_v32, %v1155_v28  ;;  %v1671_v35 = vpop.f32.mrb[29].mxu0  ;;  %v1677_v36 = vpop.f32.mrb[29].mxu1 }
 0x125   : >> { %v1215_v5 = vpop.f32.mrb[30].mxu0  ;;  %v1278_v38 = vpop.f32.mrb[30].mxu1 }
 0x126   : >> { %v1281_v37 = vadd.f32 %v1275_v34, %v1218_v33  ;;  %v1672_v39 = vpop.f32.mrb[31].mxu0  ;;  %v1678_v40 = vpop.f32.mrb[31].mxu1 }
 0x128   : >> { %v1288_v41 = vadd.f32 %v1807_v0, %v1281_v37 }
 0x12a   : >> { %v1289_v42 = vpack.c.bf16 %v1288_v41, %v1288_v41  ;;  %v1295_v43 = vsel %vm1294_vm3, %v1288_v41, 0.0  ;;  %v1303_v44 = vmul.f32 %v1288_v41, %v1288_v41 }
 0x12b   : >> { %v1296_v45 = vrot.slane %v1295_v43, 4 }
 0x12c   : >> { %1293 = vst.msk [vmem:[%s1291_s23] sm:$0xf] %vm1292_vm4, %v1289_v42  ;;  %v1304_v46 = vsel %vm1294_vm3, %v1303_v44, 0.0 }
 0x12d   : >> { %v1297_v47 = vadd.f32 %v1296_v45, %v1295_v43  ;;  %v1305_v48 = vrot.slane %v1304_v46, 4 }
 0x12f   : >> { %v1298_v49 = vrot.slane %v1297_v47, 2  ;;  %v1306_v50 = vadd.f32 %v1305_v48, %v1304_v46 }
 0x131   : >> { %v1299_v51 = vadd.f32 %v1298_v49, %v1297_v47  ;;  %v1307_v52 = vrot.slane %v1306_v50, 2 }
 0x133   : >> { %v1300_v53 = vrot.slane %v1299_v51, 1  ;;  %v1308_v54 = vadd.f32 %v1307_v52, %v1306_v50 }
 0x135   : >> { %v1301_v55 = vadd.f32 %v1300_v53, %v1299_v51  ;;  %v1309_v56 = vrot.slane %v1308_v54, 1  ;;  %356 = sbr.rel (!%p354_p4) target bundleno = 19 (0x13), region = 126 }
 0x137   : >> { %v1302_v57 = vadd.f32 %v1748_v2, %v1301_v55   ;;  %v1310_v58 = vadd.f32 %v1309_v56, %v1308_v54 }
 0x139   : >> { %v1311_v59 = vadd.f32 %v1744_v1, %v1310_v58   ;;  %v2057_v2 = vmov %v1302_v57  ;;  %1313 = vst.msk [vmem:[%s1835_s25] sm:$0x1] (%p354_p4), %vm1312_vm5, %v1302_v57 }
 0x13b   : >> { %v2056_v1 = vmov %v1311_v59  ;;  %1314 = vst.msk [vmem:[%s1835_s25 + $0x1] sm:$0x1] (%p354_p4), %vm1312_vm5, %v1311_v59 }
 0x13c PF: > { %s18_s24 = sadd.s32 1, %s1740_s24  }
 0x13d   : > { %p15_p5 = scmp.ge.s32.totalorder %s18_s24, 4  }
 0x13f   :  { %17 = sbr.rel (!%p15_p5) target bundleno = 1 (0x1), region = 137 }

// kernel: d_forward.7
= control target key start
LH: loop header
LB: loop body
LE: loop exit
PB: predicated region body
PF: predicated region fallthrough
CT: control target
= control target key end

     0   :  { %s1871_s24 = smov 0   ;;  %s2107_s0 = inlined_call_operand.vmem [shape: bf16[2,5,5,16], index: 0, kind: input, shape index: {}]   ;;  %s2108_s1 = inlined_call_operand.vmem [shape: bf16[2,5,5,16], index: 1, kind: input, shape index: {}]   ;;  %s2109_s2 = inlined_call_operand.vmem [shape: bf16[2,5,5,16], index: 2, kind: input, shape index: {}]   ;;  %s2110_s3 = inlined_call_operand.vmem [shape: bf16[2,5,5,16], index: 3, kind: input, shape index: {}]   ;;  %s2111_s4 = inlined_call_operand.vmem [shape: bf16[16,16,32], index: 4, kind: input, shape index: {}]   ;;  %s2112_s5 = inlined_call_operand.vmem [shape: f32[1,32], index: 5, kind: input, shape index: {}]   ;;  %s2113_s6 = inlined_call_operand.vmem [shape: bf16[2,4,4,32], index: 6, kind: output, shape index: {0}]   ;;  %s2114_s7 = inlined_call_operand.vmem [shape: f32[2,2,32], index: 7, kind: output, shape index: {1}]  }
   0x1 LB: > { %s1507_s25 = sadd.s32 4294967295, %s1815_s24   ;;  %p1511_p0 = scmp.ge.s32.totalorder %s1815_s24, 1  ;;  %s1815_s24 = sphi %s1871_s24, %s18_s24  }
   0x2   : > { %p270_p1 = scmp.lt.s32.totalorder %s1815_s24, 3 }
   0x4   : > { %p271_p2 = pnand %p1511_p0, %p270_p1 }
   0x5   : > { %p321_p3 = scmp.lt.s32.totalorder (!%p271_p2), %s1507_s25, 1  ;;  %v1882_v0 = vld [vmem:[%s2112_s5] ss:$0 sm:$0xff] (!%p271_p2)  ;;  %v1912_v1 = vmov (!%p271_p2), 0.0   ;;  %v1914_v2 = vmov (!%p271_p2), 0.0   ;;  %s1916_s27 = smov (!%p271_p2), 0  }
   0x6   : > { %274 = sbr.rel (%p271_p2) target bundleno = 316 (0x13c), region = 44 }
   0xd   : > { %s2118_s25 = smov (!%p321_p3, %s1507_s25), 1 }
   0xe   : > { %s1884_s28 = smul.u32 20, %s2118_s25  ;;  %s1609_s29 = sshll.u32 %s2118_s25, 3 }
   0xf   : > { %s1889_s9 = scalar_lea.vmem %s2113_s6, %s1609_s29  ;;  %s1518_s10 = sshll.u32 %s2118_s25, 1 }
  0x10   : > { %s325_s13 = scalar_lea.vmem %s2107_s0, %s1884_s28  ;;  %s330_s16 = scalar_lea.vmem %s2108_s1, %s1884_s28 }
  0x11   : > { %s335_s19 = scalar_lea.vmem %s2109_s2, %s1884_s28  ;;  %s340_s22 = scalar_lea.vmem %s2110_s3, %s1884_s28 }
  0x12   : > { %s1910_s25 = scalar_lea.vmem %s2114_s7, %s1518_s10 }
  0x13 LB: >> { %v1773_v3 = vld [vmem:[%s2111_s4 + $0x8] sm:$0xff]   ;;  %v1829_v4 = vmov 0.0   ;;  %v1774_v5 = vld [vmem:[%s2111_s4] sm:$0xff]   ;;  %vm1830_vm0 = vmmov 0   ;;  %s1938_s11 = sshll.u32 %s1827_s27, 2  ;;  %vm377_vm1 = vcmask 130048   ;;  %s1827_s27 = sphi %s1916_s27, %s357_s27   ;;  %v1823_v2 = vphi %v1914_v2, %v2116_v2   ;;  %v1819_v1 = vphi %v1912_v1, %v2115_v1  }
  0x14   : >> { %1642 = vmatprep.subr.bf16.mxu0 %v1829_v4  ;;  %1648 = vmatprep.subr.bf16.mxu1 %v1829_v4  ;;  %s1948_s15 = scalar_lea.vmem %s330_s16, %s1938_s11  ;;  %s1956_s20 = scalar_lea.vmem %s325_s13, %s1938_s11  ;;  %v1779_v6 = vld [vmem:[%s2111_s4 + $0x10] sm:$0xff]   ;;  %v1780_v12 = vld [vmem:[%s2111_s4 + $0x18] sm:$0xff]   ;;  %v1782_v19 = vld [vmem:[%s2111_s4 + $0x28] sm:$0xff]   ;;  %vm1331_vm2 = vcmask 257024   ;;  %vm1329_vm3 = vcmask 254976  }
  0x15   : >> { %1643 = vmatpush3.bf16.msra.mxu0 %v1773_v3  ;;  %1644 = vmatprep.mubr.msk.bf16.mxu0 %vm1830_vm0, %v1829_v4  ;;  %v367_v7 = vld [vmem:[%s1948_s15] sm:$0x3]  ;;  %s1984_s10 = scalar_lea.vmem %s335_s19, %s1938_s11  ;;  %s1992_s17 = scalar_lea.vmem %s340_s22, %s1938_s11  ;;  %v1787_v27 = vld [vmem:[%s2111_s4 + $0x30] sm:$0xff]   ;;  %v1788_v28 = vld [vmem:[%s2111_s4 + $0x38] sm:$0xff]  }
  0x16   : >> { %1649 = vmatpush3.bf16.msra.mxu1 %v1774_v5  ;;  %1650 = vmatprep.mubr.msk.bf16.mxu1 %vm1830_vm0, %v1829_v4  ;;  %v1775_v8 = vld [vmem:[%s1948_s15] ss:$0 sps:$4 sm:$0x77]   ;;  %v1790_v36 = vld [vmem:[%s2111_s4 + $0x48] sm:$0xff]   ;;  %v1564_v42 = vld [vmem:[%s1948_s15 + $0x4] sm:$0x3] }
  0x17   : >> { %1654 = vmatprep.subr.bf16.mxu0 %v1829_v4  ;;  %1660 = vmatprep.subr.bf16.mxu1 %v1829_v4  ;;  %v362_v9 = vld [vmem:[%s1956_s20] sm:$0x3]  ;;  %v542_v10 = vshrl.u32 %v1775_v8, 16  ;;  %v544_v11 = vshll.u32 %v1775_v8, 16  ;;  %v1792_v43 = vld [vmem:[%s2111_s4 + $0x58] sm:$0xff]   ;;  %v1791_v45 = vld [vmem:[%s2111_s4 + $0x50] sm:$0xff]  }
  0x18   : >> { %1645 = vmatmul.mubr.msk.bf16.vlgmr.msra.gmra.mrb[0].mxu0 %vm377_vm1, %v367_v7  ;;  %v1777_v13 = vld [vmem:[%s1956_s20] ss:$0 sps:$4 sm:$0x77]   ;;  %v1776_v38 = vld [vmem:[%s1948_s15 + $0x4] ss:$0 sps:$4 sm:$0x77]  }
  0x19   : >> { %1655 = vmatpush3.bf16.msra.mxu0 %v1779_v6  ;;  %1656 = vmatprep.mubr.msk.bf16.mxu0 %vm1830_vm0, %v1829_v4  ;;  %v546_v14 = vrot.slane %v544_v11, 1  ;;  %v478_v15 = vshrl.u32 %v1777_v13, 16  ;;  %v480_v16 = vshll.u32 %v1777_v13, 16  ;;  %v1781_v20 = vld [vmem:[%s2111_s4 + $0x20] sm:$0xff]   ;;  %v1025_v40 = vshll.u32 %v1776_v38, 16  ;;  %v1794_v52 = vld [vmem:[%s2111_s4 + $0x68] sm:$0xff]  }
  0x1a   : >> { %1651 = vmatmul.mubr.msk.bf16.vlgmr.msra.gmra.mrb[0].mxu1 %vm377_vm1, %v362_v9  ;;  %1666 = vmatprep.subr.bf16.mxu0 %v1829_v4  ;;  %v1785_v22 = vld [vmem:[%s1992_s17] ss:$0 sps:$4 sm:$0x77]   ;;  %v1778_v39 = vld [vmem:[%s1956_s20 + $0x4] ss:$0 sps:$4 sm:$0x77]  }
  0x1b   : >> { %1662 = vmatprep.mubr.msk.bf16.mxu1 %vm1830_vm0, %v1829_v4  ;;  %1661 = vmatpush3.bf16.msra.mxu1 %v1780_v12  ;;  %v547_v17 = vor.u32 %v546_v14, %v542_v10  ;;  %v482_v18 = vrot.slane %v480_v16, 1  ;;  %v1783_v23 = vld [vmem:[%s1984_s10] ss:$0 sps:$4 sm:$0x77]   ;;  %v784_v24 = vshll.u32 %v1785_v22, 16  ;;  %v782_v30 = vshrl.u32 %v1785_v22, 16 }
  0x1c   : >> { %1672 = vmatprep.subr.bf16.mxu1 %v1829_v4  ;;  %v600_v25 = vld [vmem:[%s1984_s10] sm:$0x3]  ;;  %v720_v29 = vshll.u32 %v1783_v23, 16  ;;  %v718_v32 = vshrl.u32 %v1783_v23, 16  ;;  %v961_v41 = vshll.u32 %v1778_v39, 16  ;;  %v1023_v46 = vshrl.u32 %v1776_v38, 16 }
  0x1d   : >> { %v483_v21 = vor.u32 %v482_v18, %v478_v15  ;;  %v656_v26 = vld [vmem:[%s1992_s17] sm:$0x3]  ;;  %v786_v31 = vrot.slane %v784_v24, 1  ;;  %v1558_v44 = vld [vmem:[%s1956_s20 + $0x4] sm:$0x3]  ;;  %v1027_v47 = vrot.slane %v1025_v40, 1 }
  0x1e   : >> { %v722_v33 = vrot.slane %v720_v29, 1  ;;  %v1789_v37 = vld [vmem:[%s2111_s4 + $0x40] sm:$0xff]   ;;  %v959_v48 = vshrl.u32 %v1778_v39, 16  ;;  %v963_v49 = vrot.slane %v961_v41, 1  ;;  %v1796_v58 = vld [vmem:[%s2111_s4 + $0x78] sm:$0xff]   ;;  %v1795_v61 = vld [vmem:[%s2111_s4 + $0x70] sm:$0xff]  }
  0x1f   : >> { %v787_v34 = vor.u32 %v786_v31, %v782_v30  ;;  %v1028_v50 = vor.u32 %v1027_v47, %v1023_v46  ;;  %v1793_v53 = vld [vmem:[%s2111_s4 + $0x60] sm:$0xff]  }
  0x20   : >> { %1657 = vmatmul.mubr.msk.bf16.vlgmr.msra.gmra.mrb[4].mxu0 %vm377_vm1, %v483_v21  ;;  %v723_v35 = vor.u32 %v722_v33, %v718_v32  ;;  %v964_v51 = vor.u32 %v963_v49, %v959_v48  ;;  %v1786_v54 = vld [vmem:[%s1992_s17 + $0x4] ss:$0 sps:$4 sm:$0x77]  }
  0x21   : >> { %1667 = vmatpush3.bf16.msra.mxu0 %v1781_v20  ;;  %1668 = vmatprep.mubr.msk.bf16.mxu0 %vm1830_vm0, %v1829_v4  ;;  %v1784_v55 = vld [vmem:[%s1984_s10 + $0x4] ss:$0 sps:$4 sm:$0x77]   ;;  %v1265_v56 = vshll.u32 %v1786_v54, 16  ;;  %v1263_v62 = vshrl.u32 %v1786_v54, 16 }
  0x22   : >> { %1663 = vmatmul.mubr.msk.bf16.vlgmr.msra.gmra.mrb[4].mxu1 %vm377_vm1, %v547_v17  ;;  %1678 = vmatprep.subr.bf16.mxu0 %v1829_v4  ;;  %v1588_v57 = vld [vmem:[%s1992_s17 + $0x4] sm:$0x3]  ;;  %v1201_v59 = vshll.u32 %v1784_v55, 16  ;;  %v1199_v3 = vshrl.u32 %v1784_v55, 16 }
  0x23   : >> { %1673 = vmatpush3.bf16.msra.mxu1 %v1782_v19  ;;  %1674 = vmatprep.mubr.msk.bf16.mxu1 %vm1830_vm0, %v1829_v4  ;;  %v1582_v60 = vld [vmem:[%s1984_s10 + $0x4] sm:$0x3]  ;;  %v1267_v63 = vrot.slane %v1265_v56, 1  ;;  %s1606_s10 = sshll.u32 %s1827_s27, 1  ;;  %s357_s27 = sadd.s32 1, %s1827_s27  }
  0x24   : >> { %1684 = vmatprep.subr.bf16.mxu1 %v1829_v4  ;;  %v1203_v5 = vrot.slane %v1201_v59, 1  ;;  %s1328_s17 = scalar_lea.vmem %s1889_s9, %s1606_s10  ;;  %p354_p4 = scmp.ge.s32.totalorder %s357_s27, 4  }
  0x25   : >> { %v1268_v6 = vor.u32 %v1267_v63, %v1263_v62  ;;  %vm1349_vm4 = vcmask (%p354_p4), 253952  }
  0x26   : >> { %v1204_v7 = vor.u32 %v1203_v5, %v1199_v3 }
  0x28   : >> { %1669 = vmatmul.mubr.msk.bf16.vlgmr.msra.gmra.mrb[8].mxu0 %vm377_vm1, %v600_v25 }
  0x29   : >> { %1679 = vmatpush3.bf16.msra.mxu0 %v1787_v27  ;;  %1680 = vmatprep.mubr.msk.bf16.mxu0 %vm1830_vm0, %v1829_v4 }
  0x2a   : >> { %1675 = vmatmul.mubr.msk.bf16.vlgmr.msra.gmra.mrb[8].mxu1 %vm377_vm1, %v656_v26  ;;  %1690 = vmatprep.subr.bf16.mxu0 %v1829_v4 }
  0x2b   : >> { %1685 = vmatpush3.bf16.msra.mxu1 %v1788_v28  ;;  %1686 = vmatprep.mubr.msk.bf16.mxu1 %vm1830_vm0, %v1829_v4 }
  0x2c   : >> { %1696 = vmatprep.subr.bf16.mxu1 %v1829_v4 }
  0x30   : >> { %1681 = vmatmul.mubr.msk.bf16.vlgmr.msra.gmra.mrb[12].mxu0 %vm377_vm1, %v723_v35 }
  0x31   : >> { %1691 = vmatpush3.bf16.msra.mxu0 %v1789_v37  ;;  %1692 = vmatprep.mubr.msk.bf16.mxu0 %vm1830_vm0, %v1829_v4 }
  0x32   : >> { %1687 = vmatmul.mubr.msk.bf16.vlgmr.msra.gmra.mrb[12].mxu1 %vm377_vm1, %v787_v34  ;;  %1702 = vmatprep.subr.bf16.mxu0 %v1829_v4 }
  0x33   : >> { %1697 = vmatpush3.bf16.msra.mxu1 %v1790_v36  ;;  %1698 = vmatprep.mubr.msk.bf16.mxu1 %vm1830_vm0, %v1829_v4 }
  0x34   : >> { %1708 = vmatprep.subr.bf16.mxu1 %v1829_v4 }
  0x38   : >> { %1693 = vmatmul.mubr.msk.bf16.vlgmr.msra.gmra.mrb[16].mxu0 %vm377_vm1, %v1558_v44 }
  0x39   : >> { %1703 = vmatpush3.bf16.msra.mxu0 %v1791_v45  ;;  %1704 = vmatprep.mubr.msk.bf16.mxu0 %vm1830_vm0, %v1829_v4 }
  0x3a   : >> { %1699 = vmatmul.mubr.msk.bf16.vlgmr.msra.gmra.mrb[16].mxu1 %vm377_vm1, %v1564_v42  ;;  %1714 = vmatprep.subr.bf16.mxu0 %v1829_v4 }
  0x3b   : >> { %1709 = vmatpush3.bf16.msra.mxu1 %v1792_v43  ;;  %1710 = vmatprep.mubr.msk.bf16.mxu1 %vm1830_vm0, %v1829_v4 }
  0x3c   : >> { %1720 = vmatprep.subr.bf16.mxu1 %v1829_v4 }
  0x40   : >> { %1705 = vmatmul.mubr.msk.bf16.vlgmr.msra.gmra.mrb[20].mxu0 %vm377_vm1, %v964_v51 }
  0x41   : >> { %1715 = vmatpush3.bf16.msra.mxu0 %v1793_v53  ;;  %1716 = vmatprep.mubr.msk.bf16.mxu0 %vm1830_vm0, %v1829_v4 }
  0x42   : >> { %1711 = vmatmul.mubr.msk.bf16.vlgmr.msra.gmra.mrb[20].mxu1 %vm377_vm1, %v1028_v50  ;;  %1726 = vmatprep.subr.bf16.mxu0 %v1829_v4 }
  0x43   : >> { %1721 = vmatpush3.bf16.msra.mxu1 %v1794_v52  ;;  %1722 = vmatprep.mubr.msk.bf16.mxu1 %vm1830_vm0, %v1829_v4 }
  0x44   : >> { %1732 = vmatprep.subr.bf16.mxu1 %v1829_v4 }
  0x48   : >> { %1717 = vmatmul.mubr.msk.bf16.vlgmr.msra.gmra.mrb[24].mxu0 %vm377_vm1, %v1582_v60 }
  0x49   : >> { %1727 = vmatpush3.bf16.msra.mxu0 %v1795_v61  ;;  %1728 = vmatprep.mubr.msk.bf16.mxu0 %vm1830_vm0, %v1829_v4 }
  0x4a   : >> { %1723 = vmatmul.mubr.msk.bf16.vlgmr.msra.gmra.mrb[24].mxu1 %vm377_vm1, %v1588_v57 }
  0x4b   : >> { %1733 = vmatpush3.bf16.msra.mxu1 %v1796_v58  ;;  %1734 = vmatprep.mubr.msk.bf16.mxu1 %vm1830_vm0, %v1829_v4 }
  0x50   : >> { %1729 = vmatmul.mubr.msk.bf16.vlgmr.msra.gmra.mrb[28].mxu0 %vm377_vm1, %v1204_v7 }
  0x52   : >> { %1735 = vmatmul.mubr.msk.bf16.vlgmr.msra.gmra.mrb[28].mxu1 %vm377_vm1, %v1268_v6 }
  0xeb   : >> { %v415_v8 = vpop.f32.mrb[0].mxu0 }
  0xec   : >> { %v1646_v9 = vpop.f32.mrb[1].mxu0 }
  0xed   : >> { %v464_v10 = vpop.f32.mrb[0].mxu1  ;;  %v418_v11 = vpop.f32.mrb[2].mxu0 }
  0xee   : >> { %v465_v12 = vadd.f32 %v464_v10, %v415_v8  ;;  %v1652_v13 = vpop.f32.mrb[1].mxu1  ;;  %v1647_v14 = vpop.f32.mrb[3].mxu0 }
  0xef   : >> { %v467_v15 = vpop.f32.mrb[2].mxu1 }
  0xf0   : >> { %v1653_v16 = vpop.f32.mrb[3].mxu1 }
  0xf3   : >> { %v527_v18 = vpop.f32.mrb[4].mxu0 }
  0xf4   : >> { %v533_v20 = vadd.f32 %v527_v18, %v465_v12  ;;  %v1658_v4 = vpop.f32.mrb[5].mxu0 }
  0xf5   : >> { %v591_v17 = vpop.f32.mrb[4].mxu1  ;;  %v530_v22 = vpop.f32.mrb[6].mxu0 }
  0xf6   : >> { %v1664_v19 = vpop.f32.mrb[5].mxu1  ;;  %v597_v24 = vadd.f32 %v591_v17, %v533_v20  ;;  %v1659_v25 = vpop.f32.mrb[7].mxu0 }
  0xf7   : >> { %v594_v21 = vpop.f32.mrb[6].mxu1 }
  0xf8   : >> { %v1665_v23 = vpop.f32.mrb[7].mxu1 }
  0xfb   : >> { %v647_v27 = vpop.f32.mrb[8].mxu0 }
  0xfc   : >> { %v653_v29 = vadd.f32 %v647_v27, %v597_v24  ;;  %v1670_v30 = vpop.f32.mrb[9].mxu0 }
  0xfd   : >> { %v703_v26 = vpop.f32.mrb[8].mxu1  ;;  %v650_v32 = vpop.f32.mrb[10].mxu0 }
  0xfe   : >> { %v1676_v28 = vpop.f32.mrb[9].mxu1  ;;  %v709_v34 = vadd.f32 %v703_v26, %v653_v29  ;;  %v1671_v35 = vpop.f32.mrb[11].mxu0 }
  0xff   : >> { %v706_v31 = vpop.f32.mrb[10].mxu1 }
 0x100   : >> { %v1677_v33 = vpop.f32.mrb[11].mxu1 }
 0x103   : >> { %v767_v37 = vpop.f32.mrb[12].mxu0 }
 0x104   : >> { %v773_v39 = vadd.f32 %v767_v37, %v709_v34  ;;  %v1682_v40 = vpop.f32.mrb[13].mxu0 }
 0x105   : >> { %v831_v36 = vpop.f32.mrb[12].mxu1  ;;  %v770_v42 = vpop.f32.mrb[14].mxu0 }
 0x106   : >> { %v1688_v38 = vpop.f32.mrb[13].mxu1  ;;  %v837_v44 = vadd.f32 %v831_v36, %v773_v39  ;;  %v1683_v45 = vpop.f32.mrb[15].mxu0 }
 0x107   : >> { %v834_v41 = vpop.f32.mrb[14].mxu1 }
 0x108   : >> { %v1689_v43 = vpop.f32.mrb[15].mxu1 }
 0x10b   : >> { %v888_v47 = vpop.f32.mrb[16].mxu0 }
 0x10c   : >> { %v894_v49 = vadd.f32 %v888_v47, %v837_v44  ;;  %v1694_v50 = vpop.f32.mrb[17].mxu0 }
 0x10d   : >> { %v944_v46 = vpop.f32.mrb[16].mxu1  ;;  %v891_v52 = vpop.f32.mrb[18].mxu0 }
 0x10e   : >> { %v1700_v48 = vpop.f32.mrb[17].mxu1  ;;  %v950_v54 = vadd.f32 %v944_v46, %v894_v49  ;;  %v1695_v55 = vpop.f32.mrb[19].mxu0 }
 0x10f   : >> { %v947_v51 = vpop.f32.mrb[18].mxu1 }
 0x110   : >> { %v1701_v53 = vpop.f32.mrb[19].mxu1 }
 0x113   : >> { %v1008_v57 = vpop.f32.mrb[20].mxu0 }
 0x114   : >> { %v1014_v59 = vadd.f32 %v1008_v57, %v950_v54  ;;  %v1706_v60 = vpop.f32.mrb[21].mxu0 }
 0x115   : >> { %v1072_v56 = vpop.f32.mrb[20].mxu1  ;;  %v1011_v62 = vpop.f32.mrb[22].mxu0 }
 0x116   : >> { %v1712_v58 = vpop.f32.mrb[21].mxu1  ;;  %v1078_v3 = vadd.f32 %v1072_v56, %v1014_v59  ;;  %v1707_v5 = vpop.f32.mrb[23].mxu0 }
 0x117   : >> { %v1075_v61 = vpop.f32.mrb[22].mxu1 }
 0x118   : >> { %v1713_v63 = vpop.f32.mrb[23].mxu1 }
 0x11b   : >> { %v1128_v7 = vpop.f32.mrb[24].mxu0 }
 0x11c   : >> { %v1134_v9 = vadd.f32 %v1128_v7, %v1078_v3  ;;  %v1718_v10 = vpop.f32.mrb[25].mxu0 }
 0x11d   : >> { %v1184_v6 = vpop.f32.mrb[24].mxu1  ;;  %v1131_v12 = vpop.f32.mrb[26].mxu0 }
 0x11e   : >> { %v1724_v8 = vpop.f32.mrb[25].mxu1  ;;  %v1190_v14 = vadd.f32 %v1184_v6, %v1134_v9  ;;  %v1719_v15 = vpop.f32.mrb[27].mxu0 }
 0x11f   : >> { %v1187_v11 = vpop.f32.mrb[26].mxu1 }
 0x120   : >> { %v1725_v13 = vpop.f32.mrb[27].mxu1 }
 0x123   : >> { %v1248_v17 = vpop.f32.mrb[28].mxu0 }
 0x124   : >> { %v1254_v19 = vadd.f32 %v1248_v17, %v1190_v14  ;;  %v1730_v20 = vpop.f32.mrb[29].mxu0 }
 0x125   : >> { %v1312_v16 = vpop.f32.mrb[28].mxu1  ;;  %v1251_v21 = vpop.f32.mrb[30].mxu0 }
 0x126   : >> { %v1736_v18 = vpop.f32.mrb[29].mxu1  ;;  %v1318_v23 = vadd.f32 %v1312_v16, %v1254_v19  ;;  %v1731_v24 = vpop.f32.mrb[31].mxu0 }
 0x127   : >> { %v1315_v4 = vpop.f32.mrb[30].mxu1 }
 0x128   : >> { %v1737_v22 = vpop.f32.mrb[31].mxu1  ;;  %v1325_v25 = vadd.f32 %v1882_v0, %v1318_v23 }
 0x12a   : >> { %v1326_v26 = vpack.c.bf16 %v1325_v25, %v1325_v25  ;;  %v1332_v27 = vsel %vm1331_vm2, %v1325_v25, 0.0  ;;  %v1340_v28 = vmul.f32 %v1325_v25, %v1325_v25 }
 0x12b   : >> { %v1333_v29 = vrot.slane %v1332_v27, 4 }
 0x12c   : >> { %1330 = vst.msk [vmem:[%s1328_s17] sm:$0x3] %vm1329_vm3, %v1326_v26  ;;  %v1341_v30 = vsel %vm1331_vm2, %v1340_v28, 0.0 }
 0x12d   : >> { %v1334_v31 = vadd.f32 %v1333_v29, %v1332_v27  ;;  %v1342_v32 = vrot.slane %v1341_v30, 4 }
 0x12f   : >> { %v1335_v33 = vrot.slane %v1334_v31, 2  ;;  %v1343_v34 = vadd.f32 %v1342_v32, %v1341_v30 }
 0x131   : >> { %v1336_v35 = vadd.f32 %v1335_v33, %v1334_v31  ;;  %v1344_v36 = vrot.slane %v1343_v34, 2 }
 0x133   : >> { %v1337_v37 = vrot.slane %v1336_v35, 1  ;;  %v1345_v38 = vadd.f32 %v1344_v36, %v1343_v34 }
 0x135   : >> { %v1338_v39 = vadd.f32 %v1337_v37, %v1336_v35  ;;  %v1346_v40 = vrot.slane %v1345_v38, 1  ;;  %356 = sbr.rel (!%p354_p4) target bundleno = 19 (0x13), region = 126 }
 0x137   : >> { %v1339_v41 = vadd.f32 %v1823_v2, %v1338_v39   ;;  %v1347_v42 = vadd.f32 %v1346_v40, %v1345_v38 }
 0x139   : >> { %v1348_v43 = vadd.f32 %v1819_v1, %v1347_v42   ;;  %v2116_v2 = vmov %v1339_v41  ;;  %1350 = vst.msk [vmem:[%s1910_s25] sm:$0x1] (%p354_p4), %vm1349_vm4, %v1339_v41 }
 0x13b   : >> { %v2115_v1 = vmov %v1348_v43  ;;  %1351 = vst.msk [vmem:[%s1910_s25 + $0x1] sm:$0x1] (%p354_p4), %vm1349_vm4, %v1348_v43 }
 0x13c PF: > { %s18_s24 = sadd.s32 1, %s1815_s24  }
 0x13d   : > { %p15_p5 = scmp.ge.s32.totalorder %s18_s24, 4  }
 0x13f   :  { %17 = sbr.rel (!%p15_p5) target bundleno = 1 (0x1), region = 137 }

// kernel: d_forward.8
= control target key start
LH: loop header
LB: loop body
LE: loop exit
PB: predicated region body
PF: predicated region fallthrough
CT: control target
= control target key end

     0   :  { %s1896_s15 = smov 0   ;;  %s2144_s0 = inlined_call_operand.vmem [shape: bf16[2,6,6,32], index: 0, kind: input, shape index: {}]   ;;  %s2145_s1 = inlined_call_operand.vmem [shape: bf16[16,32,64], index: 1, kind: input, shape index: {}]   ;;  %s2146_s2 = inlined_call_operand.vmem [shape: f32[1,64], index: 2, kind: input, shape index: {}]   ;;  %s2147_s3 = inlined_call_operand.vmem [shape: bf16[2,3,3,64], index: 3, kind: output, shape index: {0}]   ;;  %s2148_s4 = inlined_call_operand.vmem [shape: f32[2,2,64], index: 4, kind: output, shape index: {1}]  }
   0x1 LB: > { %s1447_s16 = sadd.s32 4294967295, %s1855_s15   ;;  %p1451_p0 = scmp.ge.s32.totalorder %s1855_s15, 1  ;;  %s1855_s15 = sphi %s1896_s15, %s15_s15  }
   0x2   : > { %p165_p1 = scmp.lt.s32.totalorder %s1855_s15, 3 }
   0x4   : > { %p166_p2 = pnand %p1451_p0, %p165_p1 }
   0x5   : > { %p195_p3 = scmp.lt.s32.totalorder (!%p166_p2), %s1447_s16, 1  ;;  %v1907_v0 = vld [vmem:[%s2146_s2] ss:$0 sm:$0xff] (!%p166_p2)  ;;  %v1924_v1 = vmov (!%p166_p2), 0.0   ;;  %v1926_v2 = vmov (!%p166_p2), 0.0   ;;  %s1928_s5 = smov (!%p166_p2), 0  }
   0x6   : > { %169 = sbr.rel (%p166_p2) target bundleno = 322 (0x142), region = 32 }
   0xd   : > { %s2152_s16 = smov (!%p195_p3, %s1447_s16), 1 }
   0xe   : > { %s1761_s19 = smul.u32 24, %s2152_s16  ;;  %s1454_s20 = sshll.u32 %s2152_s16, 1 }
   0xf   : > { %s1762_s21 = smul.u32 6, %s2152_s16  ;;  %s1912_s24 = scalar_lea.vmem %s2148_s4, %s1454_s20 }
  0x10   : > { %s1917_s27 = scalar_lea.vmem %s2144_s0, %s1761_s19 }
  0x11   : > { %s1922_s30 = scalar_lea.vmem %s2147_s3, %s1762_s21 }
  0x12 LB: >> { %v1797_v3 = vld [vmem:[%s2145_s1 + $0x10] sm:$0xff]   ;;  %v1869_v4 = vmov 0.0   ;;  %v1798_v5 = vld [vmem:[%s2145_s1] sm:$0xff]   ;;  %v1799_v6 = vld [vmem:[%s2145_s1 + $0x18] sm:$0xff]   ;;  %vm1870_vm0 = vmmov 0   ;;  %s1455_s12 = sshll.u32 %s1867_s5, 2  ;;  %s1867_s5 = sphi %s1928_s5, %s216_s5   ;;  %v1863_v2 = vphi %v1926_v2, %v2150_v2   ;;  %v1859_v1 = vphi %v1924_v1, %v2149_v1  }
  0x13   : >> { %1633 = vmatprep.subr.bf16.mxu0 %v1869_v4  ;;  %1641 = vmatprep.subr.bf16.mxu1 %v1869_v4  ;;  %v1800_v7 = vld [vmem:[%s2145_s1 + $0x8] sm:$0xff]   ;;  %s1958_s16 = scalar_lea.vmem %s1917_s27, %s1455_s12  ;;  %vm253_vm1 = vcmask 261120   ;;  %v1803_v12 = vld [vmem:[%s2145_s1 + $0x30] sm:$0xff]   ;;  %v1802_v15 = vld [vmem:[%s2145_s1 + $0x20] sm:$0xff]   ;;  %s1582_s10 = sshll.u32 %s1867_s5, 1  ;;  %vm1310_vm2 = vcmask 517120  }
  0x14   : >> { %1634 = vmatpush3.bf16.msra.mxu0 %v1797_v3  ;;  %1645 = vmatprep.mubr.msk.bf16.mxu1 %vm1870_vm0, %v1869_v4  ;;  %v221_v8 = vld [vmem:[%s1958_s16] sm:$0x3]  ;;  %v1805_v17 = vld [vmem:[%s2145_s1 + $0x38] sm:$0xff]   ;;  %v1804_v20 = vld [vmem:[%s2145_s1 + $0x28] sm:$0xff]   ;;  %s1309_s11 = scalar_lea.vmem %s1922_s30, %s1582_s10  ;;  %vm1311_vm3 = vsmask.f32 1280 }
  0x15   : >> { %1642 = vmatpush3.bf16.msra.mxu1 %v1798_v5  ;;  %1635 = vmatprep.subr.bf16.mxu0 %v1869_v4  ;;  %v1460_v9 = vcombine.low %v221_v8, %v221_v8  ;;  %v1806_v14 = vld [vmem:[%s1958_s16] ss:$0 sps:$4 sm:$0x66]   ;;  %v1483_v23 = vld [vmem:[%s1958_s16 + $0x4] sm:$0x3]  ;;  %v1808_v25 = vld [vmem:[%s2145_s1 + $0x50] sm:$0xff]  }
  0x16   : >> { %1643 = vmatprep.subr.bf16.mxu1 %v1869_v4  ;;  %1637 = vmatprep.mubr.msk.bf16.mxu0 %vm1870_vm0, %v1869_v4  ;;  %v424_v18 = vshrl.u32 %v1806_v14, 16  ;;  %v427_v19 = vshll.u32 %v1806_v14, 16  ;;  %v1495_v26 = vcombine.low %v1483_v23, %v1483_v23  ;;  %v1807_v27 = vld [vmem:[%s2145_s1 + $0x40] sm:$0xff]   ;;  %v361_v28 = vrot.slane %v1806_v14, 1  ;;  %v1810_v32 = vld [vmem:[%s2145_s1 + $0x58] sm:$0xff]   ;;  %v1809_v34 = vld [vmem:[%s2145_s1 + $0x48] sm:$0xff]  }
  0x17   : >> { %v235_v10 = vshrl.u32 %v1460_v9, 16  ;;  %v237_v11 = vshll.u32 %v1460_v9, 16  ;;  %v1816_v31 = vld [vmem:[%s1958_s16 + $0x4] ss:$0 sps:$4 sm:$0x66]   ;;  %v1813_v36 = vld [vmem:[%s2145_s1 + $0x70] sm:$0xff]   ;;  %vm1312_vm5 = vmand %vm1310_vm2, %vm1311_vm3 }
  0x18   : >> { %1636 = vmatpush3.bf16.msra.mxu0 %v1799_v6  ;;  %v426_v21 = vrot.slane %v424_v18, 1  ;;  %v429_v22 = vrot.slane %v427_v19, 2  ;;  %v563_v29 = vshll.u32 %v1495_v26, 16  ;;  %v561_v30 = vshrl.u32 %v1495_v26, 16  ;;  %v1516_v39 = vld [vmem:[%s1958_s16 + $0x8] sm:$0x3] }
  0x19   : >> { %1644 = vmatpush3.bf16.msra.mxu1 %v1800_v7  ;;  %1649 = vmatprep.subr.bf16.mxu0 %v1869_v4  ;;  %v239_v13 = vrot.slane %v237_v11, 1  ;;  %v695_v37 = vshrl.u32 %v1816_v31, 16  ;;  %v698_v38 = vshll.u32 %v1816_v31, 16  ;;  %v1812_v40 = vld [vmem:[%s2145_s1 + $0x60] sm:$0xff]   ;;  %v1815_v41 = vld [vmem:[%s2145_s1 + $0x78] sm:$0xff]   ;;  %v1528_v44 = vcombine.low %v1516_v39, %v1516_v39  ;;  %v1814_v45 = vld [vmem:[%s2145_s1 + $0x68] sm:$0xff]  }
  0x1a   : >> { %1657 = vmatprep.subr.bf16.mxu1 %v1869_v4  ;;  %v430_v24 = vor.u32 %v429_v22, %v426_v21  ;;  %v565_v33 = vrot.slane %v563_v29, 1  ;;  %v1818_v48 = vld [vmem:[%s2145_s1 + $0x90] sm:$0xff]   ;;  %v1817_v49 = vld [vmem:[%s2145_s1 + $0x80] sm:$0xff]   ;;  %v632_v50 = vrot.slane %v1816_v31, 1  ;;  %v1820_v54 = vld [vmem:[%s2145_s1 + $0x98] sm:$0xff]   ;;  %vm1316_vm4 = vcmask 518144  }
  0x1b   : >> { %v240_v16 = vor.u32 %v239_v13, %v235_v10  ;;  %v697_v42 = vrot.slane %v695_v37, 1  ;;  %v700_v43 = vrot.slane %v698_v38, 2  ;;  %v834_v47 = vshll.u32 %v1528_v44, 16  ;;  %v1826_v51 = vld [vmem:[%s1958_s16 + $0x8] ss:$0 sps:$4 sm:$0x66]  }
  0x1c   : >> { %1646 = vmatmul.mubr.msk.bf16.vlgmr.msra.gmra.mrb[0].mxu1 %vm253_vm1, %v221_v8  ;;  %v566_v35 = vor.u32 %v565_v33, %v561_v30  ;;  %v832_v52 = vshrl.u32 %v1528_v44, 16  ;;  %v1819_v55 = vld [vmem:[%s2145_s1 + $0x88] sm:$0xff]   ;;  %v966_v57 = vshrl.u32 %v1826_v51, 16  ;;  %v969_v58 = vshll.u32 %v1826_v51, 16  ;;  %v1823_v59 = vld [vmem:[%s2145_s1 + $0xb0] sm:$0xff]   ;;  %v1822_v61 = vld [vmem:[%s2145_s1 + $0xa0] sm:$0xff]  }
  0x1d   : >> { %1658 = vmatpush3.bf16.msra.mxu1 %v1803_v12  ;;  %1661 = vmatprep.mubr.msk.bf16.mxu1 %vm1870_vm0, %v1869_v4  ;;  %v701_v46 = vor.u32 %v700_v43, %v697_v42  ;;  %v836_v53 = vrot.slane %v834_v47, 1  ;;  %v1549_v60 = vld [vmem:[%s1958_s16 + $0xc] sm:$0x3]  ;;  %v1825_v5 = vld [vmem:[%s2145_s1 + $0xb8] sm:$0xff]   ;;  %v1828_v9 = vld [vmem:[%s2145_s1 + $0xd0] sm:$0xff]   ;;  %v903_v10 = vrot.slane %v1826_v51, 1 }
  0x1e   : >> { %1659 = vmatprep.subr.bf16.mxu1 %v1869_v4  ;;  %1638 = vmatmul.mubr.msk.bf16.vlgmr.msra.gmra.mrb[0].mxu0 %vm253_vm1, %v240_v16  ;;  %v968_v62 = vrot.slane %v966_v57, 1  ;;  %v971_v63 = vrot.slane %v969_v58, 2  ;;  %v1561_v3 = vcombine.low %v1549_v60, %v1549_v60  ;;  %v1824_v6 = vld [vmem:[%s2145_s1 + $0xa8] sm:$0xff]   ;;  %v1827_v11 = vld [vmem:[%s2145_s1 + $0xc0] sm:$0xff]   ;;  %s216_s5 = sadd.s32 1, %s1867_s5  }
  0x1f   : >> { %1650 = vmatpush3.bf16.msra.mxu0 %v1802_v15  ;;  %1653 = vmatprep.mubr.msk.bf16.mxu0 %vm1870_vm0, %v1869_v4  ;;  %v837_v56 = vor.u32 %v836_v53, %v832_v52  ;;  %v1836_v14 = vld [vmem:[%s1958_s16 + $0xc] ss:$0 sps:$4 sm:$0x66]   ;;  %v1830_v15 = vld [vmem:[%s2145_s1 + $0xd8] sm:$0xff]   ;;  %v1832_v21 = vld [vmem:[%s2145_s1 + $0xe0] sm:$0xff]   ;;  %p213_p4 = scmp.ge.s32.totalorder %s216_s5, 3  }
  0x20   : >> { %1651 = vmatprep.subr.bf16.mxu0 %v1869_v4  ;;  %v972_v7 = vor.u32 %v971_v63, %v968_v62  ;;  %v1105_v8 = vshll.u32 %v1561_v3, 16  ;;  %v1103_v12 = vshrl.u32 %v1561_v3, 16  ;;  %v1829_v16 = vld [vmem:[%s2145_s1 + $0xc8] sm:$0xff]   ;;  %v1237_v18 = vshrl.u32 %v1836_v14, 16 }
  0x21   : >> { %1660 = vmatpush3.bf16.msra.mxu1 %v1805_v17  ;;  %v1240_v19 = vshll.u32 %v1836_v14, 16  ;;  %vm1334_vm6 = vcmask (%p213_p4), 516096  }
  0x22   : >> { %1673 = vmatprep.subr.bf16.mxu1 %v1869_v4  ;;  %v1107_v13 = vrot.slane %v1105_v8, 1  ;;  %v1239_v22 = vrot.slane %v1237_v18, 1 }
  0x23   : >> { %1652 = vmatpush3.bf16.msra.mxu0 %v1804_v20  ;;  %v1833_v20 = vld [vmem:[%s2145_s1 + $0xf0] sm:$0xff]  }
  0x24   : >> { %1662 = vmatmul.mubr.msk.bf16.vlgmr.msra.gmra.mrb[4].mxu1 %vm253_vm1, %v430_v24  ;;  %1665 = vmatprep.subr.bf16.mxu0 %v1869_v4  ;;  %v1108_v17 = vor.u32 %v1107_v13, %v1103_v12  ;;  %v1835_v24 = vld [vmem:[%s2145_s1 + $0xf8] sm:$0xff]  }
  0x25   : >> { %1674 = vmatpush3.bf16.msra.mxu1 %v1808_v25  ;;  %1677 = vmatprep.mubr.msk.bf16.mxu1 %vm1870_vm0, %v1869_v4  ;;  %v1834_v25 = vld [vmem:[%s2145_s1 + $0xe8] sm:$0xff]  }
  0x26   : >> { %1675 = vmatprep.subr.bf16.mxu1 %v1869_v4  ;;  %1654 = vmatmul.mubr.msk.bf16.vlgmr.msra.gmra.mrb[4].mxu0 %vm253_vm1, %v361_v28 }
  0x27   : >> { %1666 = vmatpush3.bf16.msra.mxu0 %v1807_v27  ;;  %1669 = vmatprep.mubr.msk.bf16.mxu0 %vm1870_vm0, %v1869_v4  ;;  %v1174_v27 = vrot.slane %v1836_v14, 1 }
  0x28   : >> { %1667 = vmatprep.subr.bf16.mxu0 %v1869_v4 }
  0x29   : >> { %1676 = vmatpush3.bf16.msra.mxu1 %v1810_v32 }
  0x2a   : >> { %1689 = vmatprep.subr.bf16.mxu1 %v1869_v4 }
  0x2b   : >> { %1668 = vmatpush3.bf16.msra.mxu0 %v1809_v34 }
  0x2c   : >> { %1678 = vmatmul.mubr.msk.bf16.vlgmr.msra.gmra.mrb[8].mxu1 %vm253_vm1, %v566_v35  ;;  %1681 = vmatprep.subr.bf16.mxu0 %v1869_v4 }
  0x2d   : >> { %1690 = vmatpush3.bf16.msra.mxu1 %v1813_v36  ;;  %1693 = vmatprep.mubr.msk.bf16.mxu1 %vm1870_vm0, %v1869_v4 }
  0x2e   : >> { %1691 = vmatprep.subr.bf16.mxu1 %v1869_v4  ;;  %1670 = vmatmul.mubr.msk.bf16.vlgmr.msra.gmra.mrb[8].mxu0 %vm253_vm1, %v1483_v23  ;;  %v1242_v23 = vrot.slane %v1240_v19, 2 }
  0x2f   : >> { %1682 = vmatpush3.bf16.msra.mxu0 %v1812_v40  ;;  %1685 = vmatprep.mubr.msk.bf16.mxu0 %vm1870_vm0, %v1869_v4 }
  0x30   : >> { %1683 = vmatprep.subr.bf16.mxu0 %v1869_v4  ;;  %v1243_v26 = vor.u32 %v1242_v23, %v1239_v22 }
  0x31   : >> { %1692 = vmatpush3.bf16.msra.mxu1 %v1815_v41 }
  0x32   : >> { %1705 = vmatprep.subr.bf16.mxu1 %v1869_v4 }
  0x33   : >> { %1684 = vmatpush3.bf16.msra.mxu0 %v1814_v45 }
  0x34   : >> { %1694 = vmatmul.mubr.msk.bf16.vlgmr.msra.gmra.mrb[12].mxu1 %vm253_vm1, %v701_v46  ;;  %1697 = vmatprep.subr.bf16.mxu0 %v1869_v4 }
  0x35   : >> { %1706 = vmatpush3.bf16.msra.mxu1 %v1818_v48  ;;  %1709 = vmatprep.mubr.msk.bf16.mxu1 %vm1870_vm0, %v1869_v4 }
  0x36   : >> { %1707 = vmatprep.subr.bf16.mxu1 %v1869_v4  ;;  %1686 = vmatmul.mubr.msk.bf16.vlgmr.msra.gmra.mrb[12].mxu0 %vm253_vm1, %v632_v50 }
  0x37   : >> { %1698 = vmatpush3.bf16.msra.mxu0 %v1817_v49  ;;  %1701 = vmatprep.mubr.msk.bf16.mxu0 %vm1870_vm0, %v1869_v4 }
  0x38   : >> { %1699 = vmatprep.subr.bf16.mxu0 %v1869_v4 }
  0x39   : >> { %1708 = vmatpush3.bf16.msra.mxu1 %v1820_v54 }
  0x3a   : >> { %1721 = vmatprep.subr.bf16.mxu1 %v1869_v4 }
  0x3b   : >> { %1700 = vmatpush3.bf16.msra.mxu0 %v1819_v55 }
  0x3c   : >> { %1710 = vmatmul.mubr.msk.bf16.vlgmr.msra.gmra.mrb[16].mxu1 %vm253_vm1, %v837_v56  ;;  %1713 = vmatprep.subr.bf16.mxu0 %v1869_v4 }
  0x3d   : >> { %1722 = vmatpush3.bf16.msra.mxu1 %v1823_v59  ;;  %1725 = vmatprep.mubr.msk.bf16.mxu1 %vm1870_vm0, %v1869_v4 }
  0x3e   : >> { %1723 = vmatprep.subr.bf16.mxu1 %v1869_v4  ;;  %1702 = vmatmul.mubr.msk.bf16.vlgmr.msra.gmra.mrb[16].mxu0 %vm253_vm1, %v1516_v39 }
  0x3f   : >> { %1714 = vmatpush3.bf16.msra.mxu0 %v1822_v61  ;;  %1717 = vmatprep.mubr.msk.bf16.mxu0 %vm1870_vm0, %v1869_v4 }
  0x40   : >> { %1715 = vmatprep.subr.bf16.mxu0 %v1869_v4 }
  0x41   : >> { %1724 = vmatpush3.bf16.msra.mxu1 %v1825_v5 }
  0x42   : >> { %1737 = vmatprep.subr.bf16.mxu1 %v1869_v4 }
  0x43   : >> { %1716 = vmatpush3.bf16.msra.mxu0 %v1824_v6 }
  0x44   : >> { %1726 = vmatmul.mubr.msk.bf16.vlgmr.msra.gmra.mrb[20].mxu1 %vm253_vm1, %v972_v7  ;;  %1729 = vmatprep.subr.bf16.mxu0 %v1869_v4 }
  0x45   : >> { %1738 = vmatpush3.bf16.msra.mxu1 %v1828_v9  ;;  %1741 = vmatprep.mubr.msk.bf16.mxu1 %vm1870_vm0, %v1869_v4 }
  0x46   : >> { %1739 = vmatprep.subr.bf16.mxu1 %v1869_v4  ;;  %1718 = vmatmul.mubr.msk.bf16.vlgmr.msra.gmra.mrb[20].mxu0 %vm253_vm1, %v903_v10 }
  0x47   : >> { %1730 = vmatpush3.bf16.msra.mxu0 %v1827_v11  ;;  %1733 = vmatprep.mubr.msk.bf16.mxu0 %vm1870_vm0, %v1869_v4 }
  0x48   : >> { %1731 = vmatprep.subr.bf16.mxu0 %v1869_v4 }
  0x49   : >> { %1740 = vmatpush3.bf16.msra.mxu1 %v1830_v15 }
  0x4a   : >> { %1753 = vmatprep.subr.bf16.mxu1 %v1869_v4 }
  0x4b   : >> { %1732 = vmatpush3.bf16.msra.mxu0 %v1829_v16 }
  0x4c   : >> { %1742 = vmatmul.mubr.msk.bf16.vlgmr.msra.gmra.mrb[24].mxu1 %vm253_vm1, %v1108_v17  ;;  %1745 = vmatprep.subr.bf16.mxu0 %v1869_v4 }
  0x4d   : >> { %1754 = vmatpush3.bf16.msra.mxu1 %v1833_v20  ;;  %1757 = vmatprep.mubr.msk.bf16.mxu1 %vm1870_vm0, %v1869_v4 }
  0x4e   : >> { %1755 = vmatprep.subr.bf16.mxu1 %v1869_v4  ;;  %1734 = vmatmul.mubr.msk.bf16.vlgmr.msra.gmra.mrb[24].mxu0 %vm253_vm1, %v1549_v60 }
  0x4f   : >> { %1746 = vmatpush3.bf16.msra.mxu0 %v1832_v21  ;;  %1749 = vmatprep.mubr.msk.bf16.mxu0 %vm1870_vm0, %v1869_v4 }
  0x50   : >> { %1747 = vmatprep.subr.bf16.mxu0 %v1869_v4 }
  0x51   : >> { %1756 = vmatpush3.bf16.msra.mxu1 %v1835_v24 }
  0x53   : >> { %1748 = vmatpush3.bf16.msra.mxu0 %v1834_v25 }
  0x54   : >> { %1758 = vmatmul.mubr.msk.bf16.vlgmr.msra.gmra.mrb[28].mxu1 %vm253_vm1, %v1243_v26 }
  0x56   : >> { %1750 = vmatmul.mubr.msk.bf16.vlgmr.msra.gmra.mrb[28].mxu0 %vm253_vm1, %v1174_v27 }
  0xef   : >> { %v346_v28 = vpop.f32.mrb[0].mxu1 }
  0xf0   : >> { %v1647_v29 = vpop.f32.mrb[1].mxu1 }
  0xf1   : >> { %v349_v30 = vpop.f32.mrb[2].mxu1  ;;  %v291_v31 = vpop.f32.mrb[0].mxu0 }
  0xf2   : >> { %v1648_v32 = vpop.f32.mrb[3].mxu1  ;;  %v347_v33 = vadd.f32 %v346_v28, %v291_v31  ;;  %v1639_v34 = vpop.f32.mrb[1].mxu0 }
  0xf3   : >> { %v294_v35 = vpop.f32.mrb[2].mxu0 }
  0xf4   : >> { %v1640_v36 = vpop.f32.mrb[3].mxu0 }
  0xf7   : >> { %v480_v37 = vpop.f32.mrb[4].mxu1 }
  0xf8   : >> { %v1663_v38 = vpop.f32.mrb[5].mxu1 }
  0xf9   : >> { %v483_v39 = vpop.f32.mrb[6].mxu1  ;;  %v411_v4 = vpop.f32.mrb[4].mxu0 }
  0xfa   : >> { %v1664_v40 = vpop.f32.mrb[7].mxu1  ;;  %v417_v41 = vadd.f32 %v411_v4, %v347_v33  ;;  %v1655_v42 = vpop.f32.mrb[5].mxu0 }
  0xfb   : >> { %v414_v43 = vpop.f32.mrb[6].mxu0 }
  0xfc   : >> { %v1656_v44 = vpop.f32.mrb[7].mxu0  ;;  %v486_v45 = vadd.f32 %v480_v37, %v417_v41 }
  0xff   : >> { %v616_v46 = vpop.f32.mrb[8].mxu1 }
 0x100   : >> { %v1679_v47 = vpop.f32.mrb[9].mxu1 }
 0x101   : >> { %v619_v48 = vpop.f32.mrb[10].mxu1  ;;  %v545_v49 = vpop.f32.mrb[8].mxu0 }
 0x102   : >> { %v1680_v50 = vpop.f32.mrb[11].mxu1  ;;  %v551_v51 = vadd.f32 %v545_v49, %v486_v45  ;;  %v1671_v52 = vpop.f32.mrb[9].mxu0 }
 0x103   : >> { %v548_v53 = vpop.f32.mrb[10].mxu0 }
 0x104   : >> { %v1672_v54 = vpop.f32.mrb[11].mxu0  ;;  %v622_v55 = vadd.f32 %v616_v46, %v551_v51  ;;  %v1313_v46 = vld [vmem:[%s1309_s11] sm:$0x3] }
 0x107   : >> { %v751_v56 = vpop.f32.mrb[12].mxu1 }
 0x108   : >> { %v1695_v57 = vpop.f32.mrb[13].mxu1 }
 0x109   : >> { %v754_v58 = vpop.f32.mrb[14].mxu1  ;;  %v682_v59 = vpop.f32.mrb[12].mxu0 }
 0x10a   : >> { %v1696_v60 = vpop.f32.mrb[15].mxu1  ;;  %v688_v61 = vadd.f32 %v682_v59, %v622_v55  ;;  %v1687_v62 = vpop.f32.mrb[13].mxu0 }
 0x10b   : >> { %v685_v63 = vpop.f32.mrb[14].mxu0 }
 0x10c   : >> { %v1688_v3 = vpop.f32.mrb[15].mxu0  ;;  %v757_v5 = vadd.f32 %v751_v56, %v688_v61 }
 0x10f   : >> { %v887_v6 = vpop.f32.mrb[16].mxu1 }
 0x110   : >> { %v1711_v7 = vpop.f32.mrb[17].mxu1 }
 0x111   : >> { %v890_v8 = vpop.f32.mrb[18].mxu1  ;;  %v816_v9 = vpop.f32.mrb[16].mxu0 }
 0x112   : >> { %v1712_v10 = vpop.f32.mrb[19].mxu1  ;;  %v822_v11 = vadd.f32 %v816_v9, %v757_v5  ;;  %v1703_v12 = vpop.f32.mrb[17].mxu0 }
 0x113   : >> { %v819_v13 = vpop.f32.mrb[18].mxu0 }
 0x114   : >> { %v1704_v14 = vpop.f32.mrb[19].mxu0  ;;  %v893_v15 = vadd.f32 %v887_v6, %v822_v11 }
 0x117   : >> { %v1022_v16 = vpop.f32.mrb[20].mxu1 }
 0x118   : >> { %v1727_v17 = vpop.f32.mrb[21].mxu1 }
 0x119   : >> { %v1025_v18 = vpop.f32.mrb[22].mxu1  ;;  %v953_v19 = vpop.f32.mrb[20].mxu0 }
 0x11a   : >> { %v1728_v20 = vpop.f32.mrb[23].mxu1  ;;  %v959_v21 = vadd.f32 %v953_v19, %v893_v15  ;;  %v1719_v22 = vpop.f32.mrb[21].mxu0 }
 0x11b   : >> { %v956_v23 = vpop.f32.mrb[22].mxu0 }
 0x11c   : >> { %v1720_v24 = vpop.f32.mrb[23].mxu0  ;;  %v1028_v25 = vadd.f32 %v1022_v16, %v959_v21 }
 0x11f   : >> { %v1158_v26 = vpop.f32.mrb[24].mxu1 }
 0x120   : >> { %v1743_v27 = vpop.f32.mrb[25].mxu1 }
 0x121   : >> { %v1161_v28 = vpop.f32.mrb[26].mxu1  ;;  %v1087_v29 = vpop.f32.mrb[24].mxu0 }
 0x122   : >> { %v1744_v30 = vpop.f32.mrb[27].mxu1  ;;  %v1093_v31 = vadd.f32 %v1087_v29, %v1028_v25  ;;  %v1735_v32 = vpop.f32.mrb[25].mxu0 }
 0x123   : >> { %v1090_v33 = vpop.f32.mrb[26].mxu0 }
 0x124   : >> { %v1736_v34 = vpop.f32.mrb[27].mxu0  ;;  %v1164_v35 = vadd.f32 %v1158_v26, %v1093_v31 }
 0x127   : >> { %v1293_v36 = vpop.f32.mrb[28].mxu1 }
 0x128   : >> { %v1759_v37 = vpop.f32.mrb[29].mxu1 }
 0x129   : >> { %v1296_v38 = vpop.f32.mrb[30].mxu1  ;;  %v1224_v39 = vpop.f32.mrb[28].mxu0 }
 0x12a   : >> { %v1760_v4 = vpop.f32.mrb[31].mxu1  ;;  %v1230_v40 = vadd.f32 %v1224_v39, %v1164_v35  ;;  %v1751_v41 = vpop.f32.mrb[29].mxu0 }
 0x12b   : >> { %v1227_v42 = vpop.f32.mrb[30].mxu0 }
 0x12c   : >> { %v1299_v43 = vadd.f32 %v1293_v36, %v1230_v40  ;;  %v1752_v44 = vpop.f32.mrb[31].mxu0 }
 0x12e   : >> { %v1306_v45 = vadd.f32 %v1907_v0, %v1299_v43 }
 0x130   : >> { %v1307_v47 = vpack.c.bf16 %v1306_v45, %v1306_v45  ;;  %v1317_v48 = vsel %vm1316_vm4, %v1306_v45, 0.0  ;;  %v1325_v49 = vmul.f32 %v1306_v45, %v1306_v45 }
 0x131   : >> { %v1318_v50 = vrot.slane %v1317_v48, 4 }
 0x132   : >> { %v1314_v51 = vsel %vm1312_vm5, %v1307_v47, %v1313_v46  ;;  %v1326_v52 = vsel %vm1316_vm4, %v1325_v49, 0.0 }
 0x133   : >> { %1315 = vst [vmem:[%s1309_s11] sm:$0x3] %v1314_v51  ;;  %v1319_v53 = vadd.f32 %v1318_v50, %v1317_v48  ;;  %v1327_v54 = vrot.slane %v1326_v52, 4 }
 0x135   : >> { %v1320_v55 = vrot.slane %v1319_v53, 2  ;;  %v1328_v56 = vadd.f32 %v1327_v54, %v1326_v52 }
 0x137   : >> { %v1321_v57 = vadd.f32 %v1320_v55, %v1319_v53  ;;  %v1329_v58 = vrot.slane %v1328_v56, 2 }
 0x139   : >> { %v1322_v59 = vrot.slane %v1321_v57, 1  ;;  %v1330_v60 = vadd.f32 %v1329_v58, %v1328_v56 }
 0x13b   : >> { %v1323_v61 = vadd.f32 %v1322_v59, %v1321_v57  ;;  %v1331_v62 = vrot.slane %v1330_v60, 1  ;;  %215 = sbr.rel (!%p213_p4) target bundleno = 18 (0x12), region = 101 }
 0x13d   : >> { %v1324_v63 = vadd.f32 %v1863_v2, %v1323_v61   ;;  %v1332_v3 = vadd.f32 %v1331_v62, %v1330_v60 }
 0x13f   : >> { %v1333_v5 = vadd.f32 %v1859_v1, %v1332_v3   ;;  %v2150_v2 = vmov %v1324_v63  ;;  %1335 = vst.msk [vmem:[%s1912_s24] sm:$0x1] (%p213_p4), %vm1334_vm6, %v1324_v63 }
 0x141   : >> { %v2149_v1 = vmov %v1333_v5  ;;  %1336 = vst.msk [vmem:[%s1912_s24 + $0x1] sm:$0x1] (%p213_p4), %vm1334_vm6, %v1333_v5 }
 0x142 PF: > { %s15_s15 = sadd.s32 1, %s1855_s15  }
 0x143   : > { %p12_p5 = scmp.ge.s32.totalorder %s15_s15, 4  }
 0x145   :  { %14 = sbr.rel (!%p12_p5) target bundleno = 1 (0x1), region = 112 }

// kernel: d_forward.9
= control target key start
LH: loop header
LB: loop body
LE: loop exit
PB: predicated region body
PF: predicated region fallthrough
CT: control target
= control target key end

     0   :  { %s2282_s14 = smov 0   ;;  %s2640_s0 = inlined_call_operand.vmem [shape: bf16[2,5,5,64], index: 0, kind: input, shape index: {}]   ;;  %s2641_s1 = inlined_call_operand.vmem [shape: bf16[16,64,1], index: 1, kind: input, shape index: {}]   ;;  %s2642_s2 = inlined_call_operand.<no memory space> [shape: f32[1,1], index: 2, kind: input, shape index: {}]   ;;  %s2643_s3 = inlined_call_operand.vmem [shape: f32[2,2,2,1], index: 3, kind: output, shape index: {}]  }
   0x1   :  { %v8_v0 = vstv %s2642_s2 }
   0x2   :  { %9 = vst [vmem:[#allocation2] sm:$0x1] %v8_v0 }
   0x3 LB: > { %s1628_s15 = sadd.s32 4294967295, %s2251_s14   ;;  %p1632_p0 = scmp.ge.s32.totalorder %s2251_s14, 1  ;;  %s2251_s14 = sphi %s2282_s14, %s15_s14  }
   0x4   : > { %p139_p1 = scmp.lt.s32.totalorder %s2251_s14, 3 }
   0x6   : > { %p140_p2 = pnand %p1632_p0, %p139_p1 }
   0x7   : > { %p163_p3 = scmp.lt.s32.totalorder (!%p140_p2), %s1628_s15, 1  ;;  %s2302_s23 = smov (!%p140_p2), 0  }
   0x8   : > { %143 = sbr.rel (%p140_p2) target bundleno = 393 (0x189), region = 32 }
   0x9   : > { %v2290_v1 = vld [vmem:[#allocation2] ss:$0 sm:$0xff] (!%p140_p2) }
   0xf   : > { %s2645_s15 = smov (!%p163_p3, %s1628_s15), 1 }
  0x10   : > { %s2142_s2 = smul.u32 20, %s2645_s15  ;;  %s1869_s16 = sshll.u32 %s2645_s15, 2 }
  0x11   : > { %s2295_s19 = scalar_lea.vmem %s2643_s3, %s1869_s16 }
  0x12   : > { %s2300_s22 = scalar_lea.vmem %s2640_s0, %s2142_s2 }
  0x13 LB: >> { %v2161_v2 = vld [vmem:[%s2641_s1 + $0x20] sm:$0xff]   ;;  %v2257_v3 = vmov 0.0   ;;  %v2163_v5 = vld [vmem:[%s2641_s1 + $0x28] sm:$0xff]   ;;  %vm2258_vm0 = vmmov 0   ;;  %s1636_s30 = sshll.u32 %s2255_s23, 2  ;;  %v2165_v7 = vld [vmem:[%s2641_s1 + $0x30] sm:$0xff]   ;;  %s2255_s23 = sphi %s2302_s23, %s180_s23  }
  0x14   : >> { %1950 = vmatprep.subr.bf16.mxu0 %v2257_v3  ;;  %1962 = vmatprep.subr.bf16.mxu1 %v2257_v3  ;;  %v2162_v4 = vld [vmem:[%s2641_s1] sm:$0xff]   ;;  %v2164_v6 = vld [vmem:[%s2641_s1 + $0x8] sm:$0xff]   ;;  %s2329_s6 = scalar_lea.vmem %s2300_s22, %s1636_s30  ;;  %v2166_v8 = vld [vmem:[%s2641_s1 + $0x10] sm:$0xff]   ;;  %vm236_vm1 = vcmask 523264   ;;  %vm1553_vm2 = vcmask 1024  }
  0x15   : >> { %1951 = vmatpush3.bf16.msra.mxu0 %v2161_v2  ;;  %1958 = vmatprep.mubr.msk.bf16.mxu0 %vm2258_vm0, %v2257_v3  ;;  %v2169_v9 = vld [vmem:[%s2329_s6] ss:$0 sps:$4 sm:$0x33]   ;;  %v2167_v10 = vld [vmem:[%s2641_s1 + $0x38] sm:$0xff]   ;;  %v2172_v19 = vld [vmem:[%s2641_s1 + $0x48] sm:$0xff]  }
  0x16   : >> { %1963 = vmatpush3.bf16.msra.mxu1 %v2162_v4  ;;  %1952 = vmatprep.subr.bf16.mxu0 %v2257_v3  ;;  %v206_v11 = vshrl.u32 %v2169_v9, 16  ;;  %v208_v12 = vshll.u32 %v2169_v9, 16  ;;  %v2168_v13 = vld [vmem:[%s2641_s1 + $0x18] sm:$0xff]   ;;  %v2170_v15 = vld [vmem:[%s2641_s1 + $0x40] sm:$0xff]   ;;  %v2173_v21 = vld [vmem:[%s2641_s1 + $0x68] sm:$0xff]  }
  0x17   : >> { %1964 = vmatprep.subr.bf16.mxu1 %v2257_v3  ;;  %1970 = vmatprep.mubr.msk.bf16.mxu1 %vm2258_vm0, %v2257_v3  ;;  %v183_v17 = vld [vmem:[%s2329_s6] sm:$0x1]  ;;  %v2174_v22 = vld [vmem:[%s2641_s1 + $0x50] sm:$0xff]   ;;  %v2176_v27 = vld [vmem:[%s2641_s1 + $0x58] sm:$0xff]  }
  0x18   : >> { %v210_v14 = vrot.slane %v208_v12, 1  ;;  %v2171_v18 = vld [vmem:[%s2641_s1 + $0x60] sm:$0xff]   ;;  %v2175_v26 = vld [vmem:[%s2641_s1 + $0x70] sm:$0xff]   ;;  %v2177_v30 = vld [vmem:[%s2641_s1 + $0x78] sm:$0xff]  }
  0x19   : >> { %1953 = vmatpush3.bf16.msra.mxu0 %v2163_v5  ;;  %v2179_v20 = vld [vmem:[%s2329_s6] ss:$0 sps:$4 sm:$0x66]   ;;  %v2188_v35 = vld [vmem:[%s2329_s6 + $0x4] ss:$0 sps:$4 sm:$0x33]  }
  0x1a   : >> { %1965 = vmatpush3.bf16.msra.mxu1 %v2164_v6  ;;  %1954 = vmatprep.subr.bf16.mxu0 %v2257_v3  ;;  %v211_v16 = vor.u32 %v210_v14, %v206_v11  ;;  %v2178_v23 = vld [vmem:[%s2329_s6] ss:$0 sps:$4 sm:$0x22]   ;;  %v443_v24 = vshrl.u32 %v2179_v20, 16  ;;  %v446_v25 = vshll.u32 %v2179_v20, 16  ;;  %v2182_v36 = vld [vmem:[%s2641_s1 + $0x88] sm:$0xff]  }
  0x1b   : >> { %1966 = vmatprep.subr.bf16.mxu1 %v2257_v3  ;;  %v360_v31 = vrot.slane %v2178_v23, 1  ;;  %v2180_v33 = vld [vmem:[%s2641_s1 + $0x80] sm:$0xff]   ;;  %v2183_v37 = vld [vmem:[%s2641_s1 + $0xa8] sm:$0xff]   ;;  %v2184_v38 = vld [vmem:[%s2641_s1 + $0x90] sm:$0xff]   ;;  %v615_v39 = vshll.u32 %v2188_v35, 16  ;;  %v613_v42 = vshrl.u32 %v2188_v35, 16 }
  0x1c   : >> { %v445_v28 = vrot.slane %v443_v24, 1  ;;  %v448_v29 = vrot.slane %v446_v25, 2  ;;  %v2181_v34 = vld [vmem:[%s2641_s1 + $0xa0] sm:$0xff]   ;;  %v2185_v40 = vld [vmem:[%s2641_s1 + $0xb0] sm:$0xff]   ;;  %v2186_v41 = vld [vmem:[%s2641_s1 + $0x98] sm:$0xff]  }
  0x1d   : >> { %1955 = vmatpush3.bf16.msra.mxu0 %v2165_v7  ;;  %v617_v43 = vrot.slane %v615_v39, 1  ;;  %v2187_v44 = vld [vmem:[%s2641_s1 + $0xb8] sm:$0xff]   ;;  %v1685_v45 = vld [vmem:[%s2329_s6 + $0x4] sm:$0x1]  ;;  %v2191_v49 = vld [vmem:[%s2641_s1 + $0xc8] sm:$0xff]  }
  0x1e   : >> { %1967 = vmatpush3.bf16.msra.mxu1 %v2166_v8  ;;  %1956 = vmatprep.subr.bf16.mxu0 %v2257_v3  ;;  %v449_v32 = vor.u32 %v448_v29, %v445_v28  ;;  %v2189_v47 = vld [vmem:[%s2641_s1 + $0xc0] sm:$0xff]   ;;  %v2192_v51 = vld [vmem:[%s2641_s1 + $0xe8] sm:$0xff]   ;;  %v2193_v52 = vld [vmem:[%s2641_s1 + $0xd0] sm:$0xff]  }
  0x1f   : >> { %1968 = vmatprep.subr.bf16.mxu1 %v2257_v3  ;;  %v618_v46 = vor.u32 %v617_v43, %v613_v42  ;;  %v2190_v48 = vld [vmem:[%s2641_s1 + $0xe0] sm:$0xff]   ;;  %v2194_v55 = vld [vmem:[%s2641_s1 + $0xf0] sm:$0xff]   ;;  %v2195_v57 = vld [vmem:[%s2641_s1 + $0xd8] sm:$0xff]  }
  0x20   : >> { %v2198_v50 = vld [vmem:[%s2329_s6 + $0x4] ss:$0 sps:$4 sm:$0x66]   ;;  %v2196_v60 = vld [vmem:[%s2641_s1 + $0xf8] sm:$0xff]   ;;  %v2201_v2 = vld [vmem:[%s2641_s1 + $0x108] sm:$0xff]  }
  0x21   : >> { %1957 = vmatpush3.bf16.msra.mxu0 %v2167_v10  ;;  %v783_v53 = vshrl.u32 %v2198_v50, 16  ;;  %v786_v54 = vshll.u32 %v2198_v50, 16  ;;  %v2197_v56 = vld [vmem:[%s2329_s6 + $0x4] ss:$0 sps:$4 sm:$0x22]   ;;  %v2202_v4 = vld [vmem:[%s2641_s1 + $0x128] sm:$0xff]  }
  0x22   : >> { %1969 = vmatpush3.bf16.msra.mxu1 %v2168_v13  ;;  %1974 = vmatprep.subr.bf16.mxu0 %v2257_v3  ;;  %v700_v61 = vrot.slane %v2197_v56, 1  ;;  %v2199_v63 = vld [vmem:[%s2641_s1 + $0x100] sm:$0xff]   ;;  %v2207_v5 = vld [vmem:[%s2329_s6 + $0x8] ss:$0 sps:$4 sm:$0x33]   ;;  %v2203_v6 = vld [vmem:[%s2641_s1 + $0x110] sm:$0xff]  }
  0x23   : >> { %1986 = vmatprep.subr.bf16.mxu1 %v2257_v3  ;;  %v785_v58 = vrot.slane %v783_v53, 1  ;;  %v788_v59 = vrot.slane %v786_v54, 2  ;;  %v2200_v0 = vld [vmem:[%s2641_s1 + $0x120] sm:$0xff]   ;;  %v955_v7 = vshll.u32 %v2207_v5, 16  ;;  %v2204_v8 = vld [vmem:[%s2641_s1 + $0x130] sm:$0xff]   ;;  %v2205_v9 = vld [vmem:[%s2641_s1 + $0x118] sm:$0xff]  }
  0x24   : >> { %1959 = vmatmul.mubr.msk.bf16.vlgmr.msra.gmra.mrb[0].mxu0 %vm236_vm1, %v211_v16  ;;  %v953_v10 = vshrl.u32 %v2207_v5, 16  ;;  %v2206_v12 = vld [vmem:[%s2641_s1 + $0x138] sm:$0xff]   ;;  %v1745_v13 = vld [vmem:[%s2329_s6 + $0x8] sm:$0x1]  ;;  %v2209_v16 = vld [vmem:[%s2641_s1 + $0x160] sm:$0xff]  }
  0x25   : >> { %1971 = vmatmul.mubr.msk.bf16.vlgmr.msra.gmra.mrb[0].mxu1 %vm236_vm1, %v183_v17  ;;  %1975 = vmatpush3.bf16.msra.mxu0 %v2170_v15  ;;  %v789_v62 = vor.u32 %v788_v59, %v785_v58  ;;  %v957_v11 = vrot.slane %v955_v7, 1  ;;  %v2208_v15 = vld [vmem:[%s2641_s1 + $0x140] sm:$0xff]   ;;  %v2210_v17 = vld [vmem:[%s2641_s1 + $0x148] sm:$0xff]   ;;  %v2212_v20 = vld [vmem:[%s2641_s1 + $0x150] sm:$0xff]  }
  0x26   : >> { %1987 = vmatpush3.bf16.msra.mxu1 %v2171_v18  ;;  %1976 = vmatprep.subr.bf16.mxu0 %v2257_v3  ;;  %v2217_v18 = vld [vmem:[%s2329_s6 + $0x8] ss:$0 sps:$4 sm:$0x66]   ;;  %v2213_v23 = vld [vmem:[%s2641_s1 + $0x170] sm:$0xff]   ;;  %v2214_v25 = vld [vmem:[%s2641_s1 + $0x158] sm:$0xff]  }
  0x27   : >> { %1988 = vmatprep.subr.bf16.mxu1 %v2257_v3  ;;  %1982 = vmatprep.mubr.msk.bf16.mxu0 %vm2258_vm0, %v2257_v3  ;;  %v958_v14 = vor.u32 %v957_v11, %v953_v10  ;;  %v2216_v24 = vld [vmem:[%s2329_s6 + $0x8] ss:$0 sps:$4 sm:$0x22]   ;;  %v2215_v28 = vld [vmem:[%s2641_s1 + $0x178] sm:$0xff]   ;;  %v1805_v43 = vld [vmem:[%s2329_s6 + $0xc] sm:$0x1] }
  0x28   : >> { %1994 = vmatprep.mubr.msk.bf16.mxu1 %vm2258_vm0, %v2257_v3  ;;  %v1040_v29 = vrot.slane %v2216_v24, 1  ;;  %v2221_v35 = vld [vmem:[%s2641_s1 + $0x1a8] sm:$0xff]   ;;  %v2224_v39 = vld [vmem:[%s2641_s1 + $0x198] sm:$0xff]   ;;  %v2231_v50 = vld [vmem:[%s2641_s1 + $0x1d0] sm:$0xff]  }
  0x29   : >> { %1977 = vmatpush3.bf16.msra.mxu0 %v2172_v19  ;;  %v2211_v19 = vld [vmem:[%s2641_s1 + $0x168] sm:$0xff]   ;;  %v2225_v42 = vld [vmem:[%s2641_s1 + $0x1b8] sm:$0xff]   ;;  %v2232_v53 = vld [vmem:[%s2641_s1 + $0x1f0] sm:$0xff]  }
  0x2a   : >> { %1989 = vmatpush3.bf16.msra.mxu1 %v2173_v21  ;;  %1978 = vmatprep.subr.bf16.mxu0 %v2257_v3  ;;  %v1123_v21 = vshrl.u32 %v2217_v18, 16  ;;  %v2235_v54 = vld [vmem:[%s2329_s6 + $0xc] ss:$0 sps:$4 sm:$0x22]   ;;  %v2234_v58 = vld [vmem:[%s2641_s1 + $0x1f8] sm:$0xff]  }
  0x2b   : >> { %1990 = vmatprep.subr.bf16.mxu1 %v2257_v3  ;;  %v1380_v59 = vrot.slane %v2235_v54, 1 }
  0x2d   : >> { %1979 = vmatpush3.bf16.msra.mxu0 %v2174_v22  ;;  %v1126_v22 = vshll.u32 %v2217_v18, 16 }
  0x2e   : >> { %1991 = vmatpush3.bf16.msra.mxu1 %v2175_v26  ;;  %1980 = vmatprep.subr.bf16.mxu0 %v2257_v3  ;;  %v1125_v26 = vrot.slane %v1123_v21, 1 }
  0x2f   : >> { %1992 = vmatprep.subr.bf16.mxu1 %v2257_v3 }
  0x31   : >> { %1981 = vmatpush3.bf16.msra.mxu0 %v2176_v27  ;;  %v1128_v27 = vrot.slane %v1126_v22, 2 }
  0x32   : >> { %1993 = vmatpush3.bf16.msra.mxu1 %v2177_v30  ;;  %1998 = vmatprep.subr.bf16.mxu0 %v2257_v3 }
  0x33   : >> { %2010 = vmatprep.subr.bf16.mxu1 %v2257_v3  ;;  %v1129_v30 = vor.u32 %v1128_v27, %v1125_v26 }
  0x34   : >> { %1983 = vmatmul.mubr.msk.bf16.vlgmr.msra.gmra.mrb[4].mxu0 %vm236_vm1, %v360_v31  ;;  %v2218_v31 = vld [vmem:[%s2641_s1 + $0x180] sm:$0xff]  }
  0x35   : >> { %1995 = vmatmul.mubr.msk.bf16.vlgmr.msra.gmra.mrb[4].mxu1 %vm236_vm1, %v449_v32  ;;  %1999 = vmatpush3.bf16.msra.mxu0 %v2180_v33  ;;  %v2219_v32 = vld [vmem:[%s2641_s1 + $0x1a0] sm:$0xff]   ;;  %v2220_v33 = vld [vmem:[%s2641_s1 + $0x188] sm:$0xff]  }
  0x36   : >> { %2011 = vmatpush3.bf16.msra.mxu1 %v2181_v34  ;;  %2000 = vmatprep.subr.bf16.mxu0 %v2257_v3  ;;  %v2226_v34 = vld [vmem:[%s2329_s6 + $0xc] ss:$0 sps:$4 sm:$0x33]  }
  0x37   : >> { %2012 = vmatprep.subr.bf16.mxu1 %v2257_v3  ;;  %2006 = vmatprep.mubr.msk.bf16.mxu0 %vm2258_vm0, %v2257_v3 }
  0x38   : >> { %2018 = vmatprep.mubr.msk.bf16.mxu1 %vm2258_vm0, %v2257_v3 }
  0x39   : >> { %2001 = vmatpush3.bf16.msra.mxu0 %v2182_v36  ;;  %v2222_v36 = vld [vmem:[%s2641_s1 + $0x190] sm:$0xff]  }
  0x3a   : >> { %2013 = vmatpush3.bf16.msra.mxu1 %v2183_v37  ;;  %2002 = vmatprep.subr.bf16.mxu0 %v2257_v3  ;;  %v1295_v37 = vshll.u32 %v2226_v34, 16 }
  0x3b   : >> { %2014 = vmatprep.subr.bf16.mxu1 %v2257_v3 }
  0x3d   : >> { %2003 = vmatpush3.bf16.msra.mxu0 %v2184_v38  ;;  %v2223_v38 = vld [vmem:[%s2641_s1 + $0x1b0] sm:$0xff]  }
  0x3e   : >> { %2015 = vmatpush3.bf16.msra.mxu1 %v2185_v40  ;;  %2004 = vmatprep.subr.bf16.mxu0 %v2257_v3  ;;  %v1293_v40 = vshrl.u32 %v2226_v34, 16 }
  0x3f   : >> { %2016 = vmatprep.subr.bf16.mxu1 %v2257_v3 }
  0x41   : >> { %2005 = vmatpush3.bf16.msra.mxu0 %v2186_v41  ;;  %v1297_v41 = vrot.slane %v1295_v37, 1 }
  0x42   : >> { %2017 = vmatpush3.bf16.msra.mxu1 %v2187_v44  ;;  %2022 = vmatprep.subr.bf16.mxu0 %v2257_v3 }
  0x43   : >> { %2034 = vmatprep.subr.bf16.mxu1 %v2257_v3  ;;  %v1298_v44 = vor.u32 %v1297_v41, %v1293_v40 }
  0x44   : >> { %2007 = vmatmul.mubr.msk.bf16.vlgmr.msra.gmra.mrb[8].mxu0 %vm236_vm1, %v1685_v45  ;;  %v2227_v45 = vld [vmem:[%s2641_s1 + $0x1c0] sm:$0xff]  }
  0x45   : >> { %2019 = vmatmul.mubr.msk.bf16.vlgmr.msra.gmra.mrb[8].mxu1 %vm236_vm1, %v618_v46  ;;  %2023 = vmatpush3.bf16.msra.mxu0 %v2189_v47  ;;  %v2228_v46 = vld [vmem:[%s2641_s1 + $0x1e0] sm:$0xff]   ;;  %v2229_v47 = vld [vmem:[%s2641_s1 + $0x1c8] sm:$0xff]  }
  0x46   : >> { %2035 = vmatpush3.bf16.msra.mxu1 %v2190_v48  ;;  %2024 = vmatprep.subr.bf16.mxu0 %v2257_v3  ;;  %v2236_v48 = vld [vmem:[%s2329_s6 + $0xc] ss:$0 sps:$4 sm:$0x66]   ;;  %s1866_s6 = sshll.u32 %s2255_s23, 1  ;;  %s180_s23 = sadd.s32 1, %s2255_s23  }
  0x47   : >> { %2036 = vmatprep.subr.bf16.mxu1 %v2257_v3  ;;  %2030 = vmatprep.mubr.msk.bf16.mxu0 %vm2258_vm0, %v2257_v3  ;;  %s1552_s12 = scalar_lea.vmem %s2295_s19, %s1866_s6  ;;  %p177_p4 = scmp.ge.s32.totalorder %s180_s23, 2  }
  0x48   : >> { %2042 = vmatprep.mubr.msk.bf16.mxu1 %vm2258_vm0, %v2257_v3 }
  0x49   : >> { %2025 = vmatpush3.bf16.msra.mxu0 %v2191_v49  ;;  %v2230_v49 = vld [vmem:[%s2641_s1 + $0x1e8] sm:$0xff]  }
  0x4a   : >> { %2037 = vmatpush3.bf16.msra.mxu1 %v2192_v51  ;;  %2026 = vmatprep.subr.bf16.mxu0 %v2257_v3  ;;  %v1463_v51 = vshrl.u32 %v2236_v48, 16 }
  0x4b   : >> { %2038 = vmatprep.subr.bf16.mxu1 %v2257_v3 }
  0x4c   : >> { %v1465_v56 = vrot.slane %v1463_v51, 1 }
  0x4d   : >> { %2027 = vmatpush3.bf16.msra.mxu0 %v2193_v52  ;;  %v1466_v52 = vshll.u32 %v2236_v48, 16 }
  0x4e   : >> { %2039 = vmatpush3.bf16.msra.mxu1 %v2194_v55  ;;  %2028 = vmatprep.subr.bf16.mxu0 %v2257_v3  ;;  %v2233_v55 = vld [vmem:[%s2641_s1 + $0x1d8] sm:$0xff]  }
  0x4f   : >> { %2040 = vmatprep.subr.bf16.mxu1 %v2257_v3 }
  0x51   : >> { %2029 = vmatpush3.bf16.msra.mxu0 %v2195_v57  ;;  %v1468_v57 = vrot.slane %v1466_v52, 2 }
  0x52   : >> { %2041 = vmatpush3.bf16.msra.mxu1 %v2196_v60  ;;  %2046 = vmatprep.subr.bf16.mxu0 %v2257_v3 }
  0x53   : >> { %2058 = vmatprep.subr.bf16.mxu1 %v2257_v3  ;;  %v1469_v60 = vor.u32 %v1468_v57, %v1465_v56 }
  0x54   : >> { %2031 = vmatmul.mubr.msk.bf16.vlgmr.msra.gmra.mrb[12].mxu0 %vm236_vm1, %v700_v61 }
  0x55   : >> { %2043 = vmatmul.mubr.msk.bf16.vlgmr.msra.gmra.mrb[12].mxu1 %vm236_vm1, %v789_v62  ;;  %2047 = vmatpush3.bf16.msra.mxu0 %v2199_v63 }
  0x56   : >> { %2059 = vmatpush3.bf16.msra.mxu1 %v2200_v0  ;;  %2048 = vmatprep.subr.bf16.mxu0 %v2257_v3 }
  0x57   : >> { %2060 = vmatprep.subr.bf16.mxu1 %v2257_v3  ;;  %2054 = vmatprep.mubr.msk.bf16.mxu0 %vm2258_vm0, %v2257_v3 }
  0x58   : >> { %2066 = vmatprep.mubr.msk.bf16.mxu1 %vm2258_vm0, %v2257_v3 }
  0x59   : >> { %2049 = vmatpush3.bf16.msra.mxu0 %v2201_v2 }
  0x5a   : >> { %2061 = vmatpush3.bf16.msra.mxu1 %v2202_v4  ;;  %2050 = vmatprep.subr.bf16.mxu0 %v2257_v3 }
  0x5b   : >> { %2062 = vmatprep.subr.bf16.mxu1 %v2257_v3 }
  0x5d   : >> { %2051 = vmatpush3.bf16.msra.mxu0 %v2203_v6 }
  0x5e   : >> { %2063 = vmatpush3.bf16.msra.mxu1 %v2204_v8  ;;  %2052 = vmatprep.subr.bf16.mxu0 %v2257_v3 }
  0x5f   : >> { %2064 = vmatprep.subr.bf16.mxu1 %v2257_v3 }
  0x61   : >> { %2053 = vmatpush3.bf16.msra.mxu0 %v2205_v9 }
  0x62   : >> { %2065 = vmatpush3.bf16.msra.mxu1 %v2206_v12  ;;  %2070 = vmatprep.subr.bf16.mxu0 %v2257_v3 }
  0x63   : >> { %2082 = vmatprep.subr.bf16.mxu1 %v2257_v3 }
  0x64   : >> { %2055 = vmatmul.mubr.msk.bf16.vlgmr.msra.gmra.mrb[16].mxu0 %vm236_vm1, %v1745_v13 }
  0x65   : >> { %2067 = vmatmul.mubr.msk.bf16.vlgmr.msra.gmra.mrb[16].mxu1 %vm236_vm1, %v958_v14  ;;  %2071 = vmatpush3.bf16.msra.mxu0 %v2208_v15 }
  0x66   : >> { %2083 = vmatpush3.bf16.msra.mxu1 %v2209_v16  ;;  %2072 = vmatprep.subr.bf16.mxu0 %v2257_v3 }
  0x67   : >> { %2084 = vmatprep.subr.bf16.mxu1 %v2257_v3  ;;  %2078 = vmatprep.mubr.msk.bf16.mxu0 %vm2258_vm0, %v2257_v3 }
  0x68   : >> { %2090 = vmatprep.mubr.msk.bf16.mxu1 %vm2258_vm0, %v2257_v3 }
  0x69   : >> { %2073 = vmatpush3.bf16.msra.mxu0 %v2210_v17 }
  0x6a   : >> { %2085 = vmatpush3.bf16.msra.mxu1 %v2211_v19  ;;  %2074 = vmatprep.subr.bf16.mxu0 %v2257_v3 }
  0x6b   : >> { %2086 = vmatprep.subr.bf16.mxu1 %v2257_v3 }
  0x6d   : >> { %2075 = vmatpush3.bf16.msra.mxu0 %v2212_v20 }
  0x6e   : >> { %2087 = vmatpush3.bf16.msra.mxu1 %v2213_v23  ;;  %2076 = vmatprep.subr.bf16.mxu0 %v2257_v3 }
  0x6f   : >> { %2088 = vmatprep.subr.bf16.mxu1 %v2257_v3 }
  0x71   : >> { %2077 = vmatpush3.bf16.msra.mxu0 %v2214_v25 }
  0x72   : >> { %2089 = vmatpush3.bf16.msra.mxu1 %v2215_v28  ;;  %2094 = vmatprep.subr.bf16.mxu0 %v2257_v3 }
  0x73   : >> { %2106 = vmatprep.subr.bf16.mxu1 %v2257_v3 }
  0x74   : >> { %2079 = vmatmul.mubr.msk.bf16.vlgmr.msra.gmra.mrb[20].mxu0 %vm236_vm1, %v1040_v29 }
  0x75   : >> { %2091 = vmatmul.mubr.msk.bf16.vlgmr.msra.gmra.mrb[20].mxu1 %vm236_vm1, %v1129_v30  ;;  %2095 = vmatpush3.bf16.msra.mxu0 %v2218_v31 }
  0x76   : >> { %2107 = vmatpush3.bf16.msra.mxu1 %v2219_v32  ;;  %2096 = vmatprep.subr.bf16.mxu0 %v2257_v3 }
  0x77   : >> { %2108 = vmatprep.subr.bf16.mxu1 %v2257_v3  ;;  %2102 = vmatprep.mubr.msk.bf16.mxu0 %vm2258_vm0, %v2257_v3 }
  0x78   : >> { %2114 = vmatprep.mubr.msk.bf16.mxu1 %vm2258_vm0, %v2257_v3 }
  0x79   : >> { %2097 = vmatpush3.bf16.msra.mxu0 %v2220_v33 }
  0x7a   : >> { %2109 = vmatpush3.bf16.msra.mxu1 %v2221_v35  ;;  %2098 = vmatprep.subr.bf16.mxu0 %v2257_v3 }
  0x7b   : >> { %2110 = vmatprep.subr.bf16.mxu1 %v2257_v3 }
  0x7d   : >> { %2099 = vmatpush3.bf16.msra.mxu0 %v2222_v36 }
  0x7e   : >> { %2111 = vmatpush3.bf16.msra.mxu1 %v2223_v38  ;;  %2100 = vmatprep.subr.bf16.mxu0 %v2257_v3 }
  0x7f   : >> { %2112 = vmatprep.subr.bf16.mxu1 %v2257_v3 }
  0x81   : >> { %2101 = vmatpush3.bf16.msra.mxu0 %v2224_v39 }
  0x82   : >> { %2113 = vmatpush3.bf16.msra.mxu1 %v2225_v42  ;;  %2118 = vmatprep.subr.bf16.mxu0 %v2257_v3 }
  0x83   : >> { %2130 = vmatprep.subr.bf16.mxu1 %v2257_v3 }
  0x84   : >> { %2103 = vmatmul.mubr.msk.bf16.vlgmr.msra.gmra.mrb[24].mxu0 %vm236_vm1, %v1805_v43 }
  0x85   : >> { %2115 = vmatmul.mubr.msk.bf16.vlgmr.msra.gmra.mrb[24].mxu1 %vm236_vm1, %v1298_v44  ;;  %2119 = vmatpush3.bf16.msra.mxu0 %v2227_v45 }
  0x86   : >> { %2131 = vmatpush3.bf16.msra.mxu1 %v2228_v46  ;;  %2120 = vmatprep.subr.bf16.mxu0 %v2257_v3 }
  0x87   : >> { %2132 = vmatprep.subr.bf16.mxu1 %v2257_v3  ;;  %2126 = vmatprep.mubr.msk.bf16.mxu0 %vm2258_vm0, %v2257_v3 }
  0x88   : >> { %2138 = vmatprep.mubr.msk.bf16.mxu1 %vm2258_vm0, %v2257_v3 }
  0x89   : >> { %2121 = vmatpush3.bf16.msra.mxu0 %v2229_v47 }
  0x8a   : >> { %2133 = vmatpush3.bf16.msra.mxu1 %v2230_v49  ;;  %2122 = vmatprep.subr.bf16.mxu0 %v2257_v3 }
  0x8b   : >> { %2134 = vmatprep.subr.bf16.mxu1 %v2257_v3 }
  0x8d   : >> { %2123 = vmatpush3.bf16.msra.mxu0 %v2231_v50 }
  0x8e   : >> { %2135 = vmatpush3.bf16.msra.mxu1 %v2232_v53  ;;  %2124 = vmatprep.subr.bf16.mxu0 %v2257_v3 }
  0x8f   : >> { %2136 = vmatprep.subr.bf16.mxu1 %v2257_v3 }
  0x91   : >> { %2125 = vmatpush3.bf16.msra.mxu0 %v2233_v55 }
  0x92   : >> { %2137 = vmatpush3.bf16.msra.mxu1 %v2234_v58 }
  0x94   : >> { %2127 = vmatmul.mubr.msk.bf16.vlgmr.msra.gmra.mrb[28].mxu0 %vm236_vm1, %v1380_v59 }
  0x95   : >> { %2139 = vmatmul.mubr.msk.bf16.vlgmr.msra.gmra.mrb[28].mxu1 %vm236_vm1, %v1469_v60 }
  0xf7   : >> { %v274_v61 = vpop.f32.mrb[0].mxu0 }
  0xf8   : >> { %v341_v62 = vpop.f32.mrb[0].mxu1  ;;  %v1960_v63 = vpop.f32.mrb[1].mxu0 }
  0xf9   : >> { %v342_v0 = vadd.f32 %v341_v62, %v274_v61  ;;  %v1972_v2 = vpop.f32.mrb[1].mxu1  ;;  %v277_v4 = vpop.f32.mrb[2].mxu0 }
  0xfa   : >> { %v344_v5 = vpop.f32.mrb[2].mxu1  ;;  %v1961_v6 = vpop.f32.mrb[3].mxu0 }
  0xfb   : >> { %v1973_v7 = vpop.f32.mrb[3].mxu1 }
 0x107   : >> { %v422_v8 = vpop.f32.mrb[4].mxu0 }
 0x108   : >> { %v428_v9 = vadd.f32 %v422_v8, %v342_v0  ;;  %v511_v3 = vpop.f32.mrb[4].mxu1  ;;  %v1984_v10 = vpop.f32.mrb[5].mxu0 }
 0x109   : >> { %v1996_v11 = vpop.f32.mrb[5].mxu1  ;;  %v425_v12 = vpop.f32.mrb[6].mxu0 }
 0x10a   : >> { %v517_v13 = vadd.f32 %v511_v3, %v428_v9  ;;  %v514_v14 = vpop.f32.mrb[6].mxu1  ;;  %v1985_v15 = vpop.f32.mrb[7].mxu0 }
 0x10b   : >> { %v1997_v16 = vpop.f32.mrb[7].mxu1 }
 0x117   : >> { %v592_v17 = vpop.f32.mrb[8].mxu0 }
 0x118   : >> { %v598_v18 = vadd.f32 %v592_v17, %v517_v13  ;;  %v680_v19 = vpop.f32.mrb[8].mxu1  ;;  %v2008_v20 = vpop.f32.mrb[9].mxu0 }
 0x119   : >> { %v2020_v21 = vpop.f32.mrb[9].mxu1  ;;  %v595_v22 = vpop.f32.mrb[10].mxu0 }
 0x11a   : >> { %v686_v23 = vadd.f32 %v680_v19, %v598_v18  ;;  %v683_v24 = vpop.f32.mrb[10].mxu1  ;;  %v2009_v25 = vpop.f32.mrb[11].mxu0 }
 0x11b   : >> { %v2021_v26 = vpop.f32.mrb[11].mxu1 }
 0x127   : >> { %v762_v27 = vpop.f32.mrb[12].mxu0 }
 0x128   : >> { %v768_v28 = vadd.f32 %v762_v27, %v686_v23  ;;  %v851_v29 = vpop.f32.mrb[12].mxu1  ;;  %v2032_v30 = vpop.f32.mrb[13].mxu0 }
 0x129   : >> { %v2044_v31 = vpop.f32.mrb[13].mxu1  ;;  %v765_v32 = vpop.f32.mrb[14].mxu0 }
 0x12a   : >> { %v857_v33 = vadd.f32 %v851_v29, %v768_v28  ;;  %v854_v34 = vpop.f32.mrb[14].mxu1  ;;  %v2033_v35 = vpop.f32.mrb[15].mxu0 }
 0x12b   : >> { %v2045_v36 = vpop.f32.mrb[15].mxu1 }
 0x137   : >> { %v932_v37 = vpop.f32.mrb[16].mxu0 }
 0x138   : >> { %v938_v38 = vadd.f32 %v932_v37, %v857_v33  ;;  %v1020_v39 = vpop.f32.mrb[16].mxu1  ;;  %v2056_v40 = vpop.f32.mrb[17].mxu0 }
 0x139   : >> { %v2068_v41 = vpop.f32.mrb[17].mxu1  ;;  %v935_v42 = vpop.f32.mrb[18].mxu0 }
 0x13a   : >> { %v1026_v43 = vadd.f32 %v1020_v39, %v938_v38  ;;  %v1023_v44 = vpop.f32.mrb[18].mxu1  ;;  %v2057_v45 = vpop.f32.mrb[19].mxu0 }
 0x13b   : >> { %v2069_v46 = vpop.f32.mrb[19].mxu1 }
 0x147   : >> { %v1102_v47 = vpop.f32.mrb[20].mxu0 }
 0x148   : >> { %v1108_v48 = vadd.f32 %v1102_v47, %v1026_v43  ;;  %v1191_v49 = vpop.f32.mrb[20].mxu1  ;;  %v2080_v50 = vpop.f32.mrb[21].mxu0 }
 0x149   : >> { %v2092_v51 = vpop.f32.mrb[21].mxu1  ;;  %v1105_v52 = vpop.f32.mrb[22].mxu0 }
 0x14a   : >> { %v1197_v53 = vadd.f32 %v1191_v49, %v1108_v48  ;;  %v1194_v54 = vpop.f32.mrb[22].mxu1  ;;  %v2081_v55 = vpop.f32.mrb[23].mxu0 }
 0x14b   : >> { %v2093_v56 = vpop.f32.mrb[23].mxu1 }
 0x157   : >> { %v1272_v57 = vpop.f32.mrb[24].mxu0 }
 0x158   : >> { %v1278_v58 = vadd.f32 %v1272_v57, %v1197_v53  ;;  %v1360_v59 = vpop.f32.mrb[24].mxu1  ;;  %v2104_v60 = vpop.f32.mrb[25].mxu0 }
 0x159   : >> { %v2116_v61 = vpop.f32.mrb[25].mxu1  ;;  %v1275_v62 = vpop.f32.mrb[26].mxu0 }
 0x15a   : >> { %v1366_v63 = vadd.f32 %v1360_v59, %v1278_v58  ;;  %v1363_v0 = vpop.f32.mrb[26].mxu1  ;;  %v2105_v2 = vpop.f32.mrb[27].mxu0 }
 0x15b   : >> { %v2117_v4 = vpop.f32.mrb[27].mxu1 }
 0x167   : >> { %v1442_v5 = vpop.f32.mrb[28].mxu0 }
 0x168   : >> { %v1448_v6 = vadd.f32 %v1442_v5, %v1366_v63  ;;  %v1531_v7 = vpop.f32.mrb[28].mxu1  ;;  %v2128_v8 = vpop.f32.mrb[29].mxu0 }
 0x169   : >> { %v2140_v9 = vpop.f32.mrb[29].mxu1  ;;  %v1445_v3 = vpop.f32.mrb[30].mxu0 }
 0x16a   : >> { %v1537_v10 = vadd.f32 %v1531_v7, %v1448_v6  ;;  %v1534_v11 = vpop.f32.mrb[30].mxu1  ;;  %v2129_v12 = vpop.f32.mrb[31].mxu0 }
 0x16b   : >> { %v2141_v13 = vpop.f32.mrb[31].mxu1 }
 0x16c   : >> { %v1544_v14 = vadd.f32 %v2290_v1, %v1537_v10 }
 0x16e   : >> { %v1865_v15 = vmul.f32 -1.442695, %v1544_v14 }
 0x170   : >> { %2237 = vpow2.f32 %v1865_v15 }
 0x17a   : >> { %v2238_v16 = vpop.eup %2237 }
 0x17b   : >> { %v1548_v17 = vadd.f32 1.0, %v2238_v16 }
 0x17d   : >> { %2239 = vrcp.f32 %v1548_v17 }
 0x182   : > { %179 = sbr.rel (!%p177_p4) target bundleno = 19 (0x13), region = 89 }
 0x187   : >> { %v2240_v18 = vpop.eup %2239 }
 0x188   : >> { %1554 = vst.msk [vmem:[%s1552_s12] sm:$0x3] %vm1553_vm2, %v2240_v18 }
 0x189 PF: > { %s15_s14 = sadd.s32 1, %s2251_s14  }
 0x18a   : > { %p12_p5 = scmp.ge.s32.totalorder %s15_s14, 4  }
 0x18c   :  { %14 = sbr.rel (!%p12_p5) target bundleno = 3 (0x3), region = 100 }

</bundles_post_ra>
